<compile_context>
chip_gen: v7x
topology: tpu7x:2x2x1
jax: 0.10.0
libtpu: 0.0.40
codegen_flags: <defaults>
</compile_context>

<pallas_src>
import functools

import jax
import jax.numpy as jnp
from jax import lax
from jax.experimental import pallas as pl
from jax.experimental.pallas import tpu as pltpu


# Static geometry implied by fc1.in_features = 16 * 12 * 12 = 2304 (28x28 input).
_H = _W = 28                       # input spatial
_H1, _W1, _C1 = 26, 26, 8          # after conv1 (3x3, stride 1, valid)
_W1P = 32                          # conv1 wo padded 26 -> 32 (lane-dense columns)
_C1COLS = _W1P * _C1               # 256
_H2, _W2, _C2 = 24, 24, 16         # after conv2
_C2COLS = _W2 * _C2                # 384
_HP = _WP = 12                     # after 2x2 max pool
_FLAT = _H2 * _C2COLS              # 9216: un-compacted flatten fed to fc1
_NH1, _NH1_PAD = 64, 128           # fc1 out padded 64 -> 128
_NLOGIT, _NLOGIT_PAD = 10, 128     # fc2 out padded 10 -> 128


# ---------------------------------------------------------------------------
# Fused forward kernel: one batch block of `nb` images per grid step.
# ---------------------------------------------------------------------------
def _net_kernel(x_ref, b1_ref, s1_ref, t1_ref, b2_ref, s2_ref, t2_ref,
                fw1_ref, fb1_ref, fw2_ref, fb2_ref, o_ref, *, nb, pool_bf16):
    bf16, f32 = jnp.bfloat16, jnp.float32

    # --- conv1 (1->8) + BN1 + ReLU: one K-concatenated banded MXU matmul ---
    # activation columns: wo*8 + c   (wo padded to 32, padded cols are zero)
    x = x_ref[...]                                                   # (nb,28,28) bf16
    xcat = jnp.concatenate([x[:, 0:_H1, :], x[:, 1:_H1 + 1, :],
                            x[:, 2:_H1 + 2, :]], axis=-1)            # (nb,26,84)
    xcat = xcat.reshape(nb * _H1, 3 * _W)
    a1 = jnp.dot(xcat, b1_ref[...], preferred_element_type=f32)      # (nb*26,256)
    a1 = jnp.maximum(a1 * s1_ref[...] + t1_ref[...], 0.0)            # folded BN + ReLU
    a1 = a1.astype(bf16).reshape(nb, _H1, _C1COLS)

    # --- conv2 (8->16) + BN2 + ReLU: one K-concatenated banded MXU matmul ---
    # activation columns: wo*16 + c
    a1cat = jnp.concatenate([a1[:, 0:_H2, :], a1[:, 1:_H2 + 1, :],
                             a1[:, 2:_H2 + 2, :]], axis=-1)           # (nb,24,768)
    a1cat = a1cat.reshape(nb * _H2, 3 * _C1COLS)
    a2 = jnp.dot(a1cat, b2_ref[...], preferred_element_type=f32)      # (nb*24,384)
    a2 = jnp.maximum(a2 * s2_ref[...] + t2_ref[...], 0.0)             # folded BN + ReLU
    if pool_bf16:
        a2 = a2.astype(bf16)    # monotone rounding: max commutes with the cast

    # --- 2x2 max pool, lane/sublane preserving (compaction folded into fc1) ---
    # W-pool partner: -16-lane rotation  => partner[:, w*16+c] = a2[:, (w+1)*16+c]
    wpart = jnp.concatenate([a2[:, _C2:], a2[:, :_C2]], axis=1)
    pw = jnp.maximum(a2, wpart)                       # valid at even-wo groups
    # H-pool partner: -1-row shift       => partner[r, :] = pw[r+1, :]
    hpart = jnp.concatenate([pw[1:, :], pw[:1, :]], axis=0)
    pooled = jnp.maximum(pw, hpart)                   # valid at (even ho, even wo)
    flat = pooled.reshape(nb, _FLAT).astype(bf16)     # (nb, 9216)
    # dropout1 / dropout2: identity in eval (inference) mode.

    # --- fc1 + ReLU + fc2 (both outputs padded to 128 lanes) ---
    h = jnp.dot(flat, fw1_ref[...], preferred_element_type=f32) + fb1_ref[...]
    h = jnp.maximum(h, 0.0).astype(bf16)                              # (nb,128)
    out = jnp.dot(h, fw2_ref[...], preferred_element_type=f32) + fb2_ref[...]
    o_ref[...] = out.reshape(1, nb, _NLOGIT_PAD)


def _net_pallas(x, b1, s1, t1, b2, s2, t2, fw1, fb1, fw2, fb2, *,
                nb, vmem_bytes, pool_bf16):
    n_pad = x.shape[0]
    num_blocks = n_pad // nb
    kernel = functools.partial(_net_kernel, nb=nb, pool_bf16=pool_bf16)

    def full(shape):
        return pl.BlockSpec(shape, lambda i, _s=shape: (0,) * len(_s))

    out = pl.pallas_call(
        kernel,
        out_shape=jax.ShapeDtypeStruct((num_blocks, nb, _NLOGIT_PAD), jnp.float32),
        grid=(num_blocks,),
        in_specs=[
            pl.BlockSpec((nb, _H, _W), lambda i: (i, 0, 0)),   # images (bf16)
            full(b1.shape), full(s1.shape), full(t1.shape),    # conv1 band + BN1
            full(b2.shape), full(s2.shape), full(t2.shape),    # conv2 band + BN2
            full(fw1.shape), full(fb1.shape),                  # fc1 (pool-folded)
            full(fw2.shape), full(fb2.shape),                  # fc2 (padded)
        ],
        out_specs=pl.BlockSpec((1, nb, _NLOGIT_PAD), lambda i: (i, 0, 0)),
        compiler_params=pltpu.CompilerParams(
            dimension_semantics=("parallel",),   # shard blocks across TCs (v7x)
            vmem_limit_bytes=vmem_bytes,
        ),
    )(x, b1, s1, t1, b2, s2, t2, fw1, fb1, fw2, fb2)
    return out.reshape(n_pad, _NLOGIT_PAD)


# ---------------------------------------------------------------------------
# Parameter preparation: BN folding, merged banded conv weights, fc padding.
# ---------------------------------------------------------------------------
def _prepare(params, eps=1e-5):
    f32, bf16 = jnp.float32, jnp.bfloat16

    # Fold BatchNorm (eval mode, running stats) into per-channel scale / shift.
    s1 = params["bn1_gamma"] * lax.rsqrt(params["bn1_var"] + eps)
    t1 = (params["conv1_b"] - params["bn1_mean"]) * s1 + params["bn1_beta"]
    s2 = params["bn2_gamma"] * lax.rsqrt(params["bn2_var"] + eps)
    t2 = (params["conv2_b"] - params["bn2_mean"]) * s2 + params["bn2_beta"]

    # conv1 band, kh taps merged:  b1[kh*28 + wi, wo*8 + co] = W1[co,0,kh,wi-wo]
    w1t = jnp.transpose(params["conv1_w"].astype(f32), (2, 3, 1, 0)).reshape(3, 3, _C1)
    wi = jnp.arange(_W)[:, None]
    wo = jnp.arange(_W1P)[None, :]
    k = wi - wo
    valid = (k >= 0) & (k < 3) & (wo < _W1)
    b1 = jnp.where(valid[None, :, :, None], w1t[:, jnp.clip(k, 0, 2), :], 0.0)
    b1 = b1.reshape(3 * _W, _C1COLS)                                  # (84, 256)

    # conv2 band, kh taps merged: b2[kh*256 + wi*8 + ci, wo*16 + co] = W2[co,ci,kh,wi-wo]
    w2t = jnp.transpose(params["conv2_w"].astype(f32), (2, 3, 1, 0))  # (kh,kw,ci,co)
    wi = jnp.arange(_W1P)[:, None]
    wo = jnp.arange(_W2)[None, :]
    k = wi - wo
    valid = (k >= 0) & (k < 3)
    b2 = jnp.where(valid[None, :, :, None, None], w2t[:, jnp.clip(k, 0, 2)], 0.0)
    b2 = jnp.transpose(b2, (0, 1, 3, 2, 4)).reshape(3 * _C1COLS, _C2COLS)  # (768, 384)

    # BN scale/shift laid out over activation columns (zero on padded conv1 cols).
    pad_mask = (jnp.arange(_W1P)[:, None] < _W1)
    s1c = jnp.where(pad_mask, s1[None, :], 0.0).reshape(1, _C1COLS).astype(f32)
    t1c = jnp.where(pad_mask, t1[None, :], 0.0).reshape(1, _C1COLS).astype(f32)
    s2c = jnp.tile(s2, _W2).reshape(1, _C2COLS).astype(f32)
    t2c = jnp.tile(t2, _W2).reshape(1, _C2COLS).astype(f32)

    # fc1: fold pooling compaction + torch NCHW flatten (c*144 + hp*12 + wp) into
    # zero-padded rows of a (9216, 128) weight; pooled values live at
    # rows (ho = 2*hp, wo = 2*wp) of the un-compacted (ho, wo, c) layout.
    w = params["fc1_w"].astype(f32).reshape(_NH1, _C2, _HP, _WP)
    w = jnp.transpose(w, (2, 3, 1, 0))                                # (hp,wp,c,64)
    fw1 = jnp.zeros((_H2, _W2, _C2, _NH1_PAD), f32)
    fw1 = fw1.at[0::2, 0::2, :, :_NH1].set(w)
    fw1 = fw1.reshape(_FLAT, _NH1_PAD)                                # (9216, 128)
    fb1 = jnp.zeros((1, _NH1_PAD), f32).at[0, :_NH1].set(params["fc1_b"])

    # fc2: pad to (128, 128); rows >= 64 and cols >= 10 are zero.
    fw2 = jnp.zeros((_NH1_PAD, _NLOGIT_PAD), f32)
    fw2 = fw2.at[:_NH1, :_NLOGIT].set(params["fc2_w"].astype(f32).T)
    fb2 = jnp.zeros((1, _NLOGIT_PAD), f32).at[0, :_NLOGIT].set(params["fc2_b"])

    return (b1.astype(bf16), s1c, t1c,
            b2.astype(bf16), s2c, t2c,
            fw1.astype(bf16), fb1,
            fw2.astype(bf16), fb2)


# ---------------------------------------------------------------------------
# Generation-aware block / VMEM configuration.
# ---------------------------------------------------------------------------
def _choose_block(n, target):
    """Images per grid step; keep an even number of blocks so both v7x TCs work."""
    if n <= 1:
        return 1
    if n < 2 * target:
        return (n + 1) // 2
    blocks = -(-n // target)
    blocks += blocks % 2
    return -(-n // blocks)


def _tpu_config(n):
    kind = ""
    try:
        kind = jax.devices()[0].device_kind.lower()
    except Exception:
        pass
    if "v5" in kind:      # 128 MiB VMEM, no bf16 VPU: big blocks, f32 pooling
        target, vmem, pool_bf16 = 256, 96 * 1024 * 1024, False
    elif "v6" in kind:    # 128 MiB VMEM, bf16 VPU: big blocks, bf16 pooling
        target, vmem, pool_bf16 = 256, 96 * 1024 * 1024, True
    else:                 # v7x (64 MiB VMEM, 2 TCs) or unknown: conservative
        target, vmem, pool_bf16 = 128, 48 * 1024 * 1024, True
    return dict(nb=_choose_block(n, target), vmem_bytes=vmem, pool_bf16=pool_bf16)


@functools.partial(jax.jit, static_argnames=("nb", "vmem_bytes", "pool_bf16"))
def _forward_impl(x_nchw, params, *, nb, vmem_bytes, pool_bf16):
    n = x_nchw.shape[0]
    prep = _prepare(params)
    x = x_nchw[:, 0, :, :].astype(jnp.bfloat16)          # Cin = 1; bf16 in wrapper
    n_pad = -(-n // nb) * nb
    if n_pad != n:
        x = jnp.pad(x, ((0, n_pad - n), (0, 0), (0, 0)))
    logits = _net_pallas(x, *prep, nb=nb, vmem_bytes=vmem_bytes, pool_bf16=pool_bf16)
    return logits[:n, :_NLOGIT]


def net_forward(x_nchw, params):
    return _forward_impl(x_nchw, params, **_tpu_config(x_nchw.shape[0]))


# ---------------------------------------------------------------------------
# Pure-JAX f32 reference of the PyTorch forward (eval mode) for validation.
# ---------------------------------------------------------------------------
def _reference_forward(x_nchw, params, eps=1e-5):
    f32 = jnp.float32
    x = x_nchw.astype(f32)

    def conv(z, w, b):
        y = lax.conv_general_dilated(z, w.astype(f32), (1, 1), "VALID",
                                     dimension_numbers=("NCHW", "OIHW", "NCHW"))
        return y + b[None, :, None, None]

    def bn(z, g, beta, m, v):
        s = (g * lax.rsqrt(v + eps))[None, :, None, None]
        return (z - m[None, :, None, None]) * s + beta[None, :, None, None]

    y = jnp.maximum(bn(conv(x, params["conv1_w"], params["conv1_b"]),
                       params["bn1_gamma"], params["bn1_beta"],
                       params["bn1_mean"], params["bn1_var"]), 0.0)
    y = jnp.maximum(bn(conv(y, params["conv2_w"], params["conv2_b"]),
                       params["bn2_gamma"], params["bn2_beta"],
                       params["bn2_mean"], params["bn2_var"]), 0.0)
    n = y.shape[0]
    y = y.reshape(n, _C2, _HP, 2, _WP, 2).max(axis=(3, 5))     # max_pool2d(2)
    flat = y.reshape(n, _C2 * _HP * _WP)                        # torch NCHW flatten
    h = jnp.maximum(flat @ params["fc1_w"].T + params["fc1_b"], 0.0)
    return h @ params["fc2_w"].T + params["fc2_b"]


# ---------------------------------------------------------------------------
# Deterministic example parameters (torch layouts) and smoke test.
# ---------------------------------------------------------------------------
def init_params(key):
    ks = jax.random.split(key, 12)
    f32 = jnp.float32
    return {
        # conv1: Conv2d(1, 8, 3, 1)   (torch layout (Cout, Cin, KH, KW))
        "conv1_w": 0.10 * jax.random.normal(ks[0], (8, 1, 3, 3), f32),
        "conv1_b": 0.10 * jax.random.normal(ks[1], (8,), f32),
        "bn1_gamma": 1.0 + 0.10 * jax.random.normal(ks[2], (8,), f32),
        "bn1_beta": 0.10 * jax.random.normal(ks[3], (8,), f32),
        "bn1_mean": jnp.zeros((8,), f32),
        "bn1_var": jnp.ones((8,), f32),
        # conv2: Conv2d(8, 16, 3, 1)
        "conv2_w": 0.05 * jax.random.normal(ks[4], (16, 8, 3, 3), f32),
        "conv2_b": 0.10 * jax.random.normal(ks[5], (16,), f32),
        "bn2_gamma": 1.0 + 0.10 * jax.random.normal(ks[6], (16,), f32),
        "bn2_beta": 0.10 * jax.random.normal(ks[7], (16,), f32),
        "bn2_mean": jnp.zeros((16,), f32),
        "bn2_var": jnp.ones((16,), f32),
        # fc1: Linear(2304, 64), fc2: Linear(64, 10)  (torch layout (out, in))
        "fc1_w": 0.02 * jax.random.normal(ks[8], (64, 2304), f32),
        "fc1_b": 0.10 * jax.random.normal(ks[9], (64,), f32),
        "fc2_w": 0.10 * jax.random.normal(ks[10], (10, 64), f32),
        "fc2_b": 0.10 * jax.random.normal(ks[11], (10,), f32),
    }


if __name__ == "__main__":
    key = jax.random.PRNGKey(0)
    pkey, xkey = jax.random.split(key)
    params = init_params(pkey)
    # Input size is fixed by fc1.in_features = 16*12*12 = 2304 -> 28x28, Cin = 1.
    x = jax.random.normal(xkey, (2, 1, 28, 28), jnp.float32)

    out = jax.block_until_ready(net_forward(x, params))
    ref = _reference_forward(x, params)

    assert out.shape == (2, _NLOGIT)
    assert bool(jnp.all(jnp.isfinite(out)))
    err = float(jnp.max(jnp.abs(out - ref)))
    assert bool(jnp.allclose(out, ref, atol=2e-2, rtol=2e-2)), f"max abs err {err}"
    print("KERNEL_OK")
</pallas_src>

<mosaic_0001>
module attributes {stable_mosaic.version = 11 : i64} {
  func.func @_net_kernel(%arg0: i32, %arg1: memref<1x28x28xbf16, #tpu.memory_space<vmem>>, %arg2: memref<84x256xbf16, #tpu.memory_space<vmem>>, %arg3: memref<1x256xf32, #tpu.memory_space<vmem>>, %arg4: memref<1x256xf32, #tpu.memory_space<vmem>>, %arg5: memref<768x384xbf16, #tpu.memory_space<vmem>>, %arg6: memref<1x384xf32, #tpu.memory_space<vmem>>, %arg7: memref<1x384xf32, #tpu.memory_space<vmem>>, %arg8: memref<9216x128xbf16, #tpu.memory_space<vmem>>, %arg9: memref<1x128xf32, #tpu.memory_space<vmem>>, %arg10: memref<128x128xbf16, #tpu.memory_space<vmem>>, %arg11: memref<1x128xf32, #tpu.memory_space<vmem>>, %arg12: memref<1x1x128xf32, #tpu.memory_space<vmem>>) attributes {dimension_semantics = [#tpu.dimension_semantics<parallel>], iteration_bounds = array<i64: 2>, scalar_prefetch = 0 : i64, scratch_operands = 0 : i64, tpu.core_type = #tpu.core_type<tc>, window_params = [{transform_indices = @transform_0, window_bounds = array<i64: 1, 28, 28>}, {pipeline_mode = #tpu.pipeline_mode<synchronous>, transform_indices = @transform_1, window_bounds = array<i64: 84, 256>}, {pipeline_mode = #tpu.pipeline_mode<synchronous>, transform_indices = @transform_2, window_bounds = array<i64: 1, 256>}, {pipeline_mode = #tpu.pipeline_mode<synchronous>, transform_indices = @transform_3, window_bounds = array<i64: 1, 256>}, {pipeline_mode = #tpu.pipeline_mode<synchronous>, transform_indices = @transform_4, window_bounds = array<i64: 768, 384>}, {pipeline_mode = #tpu.pipeline_mode<synchronous>, transform_indices = @transform_5, window_bounds = array<i64: 1, 384>}, {pipeline_mode = #tpu.pipeline_mode<synchronous>, transform_indices = @transform_6, window_bounds = array<i64: 1, 384>}, {pipeline_mode = #tpu.pipeline_mode<synchronous>, transform_indices = @transform_7, window_bounds = array<i64: 9216, 128>}, {pipeline_mode = #tpu.pipeline_mode<synchronous>, transform_indices = @transform_8, window_bounds = array<i64: 1, 128>}, {pipeline_mode = #tpu.pipeline_mode<synchronous>, transform_indices = @transform_9, window_bounds = array<i64: 128, 128>}, {pipeline_mode = #tpu.pipeline_mode<synchronous>, transform_indices = @transform_10, window_bounds = array<i64: 1, 128>}, {transform_indices = @transform_11, window_bounds = array<i64: 1, 1, 128>}]} {
    %c0 = arith.constant 0 : index
    %c0_0 = arith.constant 0 : index
    %c0_1 = arith.constant 0 : index
    %0 = vector.load %arg1[%c0, %c0_0, %c0_1] : memref<1x28x28xbf16, #tpu.memory_space<vmem>>, vector<1x28x28xbf16>
    %1 = vector.extract_strided_slice %0 {offsets = [0, 0, 0], sizes = [1, 26, 28], strides = [1, 1, 1]} : vector<1x28x28xbf16> to vector<1x26x28xbf16>
    %2 = vector.extract_strided_slice %0 {offsets = [0, 1, 0], sizes = [1, 26, 28], strides = [1, 1, 1]} : vector<1x28x28xbf16> to vector<1x26x28xbf16>
    %3 = vector.extract_strided_slice %0 {offsets = [0, 2, 0], sizes = [1, 26, 28], strides = [1, 1, 1]} : vector<1x28x28xbf16> to vector<1x26x28xbf16>
    %4 = tpu.concatenate %1, %2, %3 in 2 : vector<1x26x28xbf16>, vector<1x26x28xbf16>, vector<1x26x28xbf16> -> vector<1x26x84xbf16>
    %5 = vector.shape_cast %4 : vector<1x26x84xbf16> to vector<26x84xbf16>
    %c0_2 = arith.constant 0 : index
    %c0_3 = arith.constant 0 : index
    %6 = vector.load %arg2[%c0_2, %c0_3] : memref<84x256xbf16, #tpu.memory_space<vmem>>, vector<84x256xbf16>
    %cst = arith.constant dense<0.000000e+00> : vector<26x256xf32>
    %7 = tpu.matmul %5, %6, %cst {dimension_numbers = #tpu.dot_dimension_numbers<[1], [0], [0], [1], [0, 0, 1, 1], [], []>} : vector<26x84xbf16>, vector<84x256xbf16>, vector<26x256xf32> -> vector<26x256xf32>
    %c0_4 = arith.constant 0 : index
    %c0_5 = arith.constant 0 : index
    %8 = vector.load %arg3[%c0_4, %c0_5] : memref<1x256xf32, #tpu.memory_space<vmem>>, vector<1x256xf32>
    %9 = vector.broadcast %8 : vector<1x256xf32> to vector<26x256xf32>
    %10 = arith.mulf %7, %9 : vector<26x256xf32>
    %c0_6 = arith.constant 0 : index
    %c0_7 = arith.constant 0 : index
    %11 = vector.load %arg4[%c0_6, %c0_7] : memref<1x256xf32, #tpu.memory_space<vmem>>, vector<1x256xf32>
    %12 = vector.broadcast %11 : vector<1x256xf32> to vector<26x256xf32>
    %13 = arith.addf %10, %12 : vector<26x256xf32>
    %cst_8 = arith.constant 0.000000e+00 : f32
    %14 = vector.broadcast %cst_8 : f32 to vector<26x256xf32>
    %15 = arith.maximumf %13, %14 : vector<26x256xf32>
    %16 = arith.truncf %15 : vector<26x256xf32> to vector<26x256xbf16>
    %17 = vector.shape_cast %16 : vector<26x256xbf16> to vector<1x26x256xbf16>
    %18 = vector.extract_strided_slice %17 {offsets = [0, 0, 0], sizes = [1, 24, 256], strides = [1, 1, 1]} : vector<1x26x256xbf16> to vector<1x24x256xbf16>
    %19 = vector.extract_strided_slice %17 {offsets = [0, 1, 0], sizes = [1, 24, 256], strides = [1, 1, 1]} : vector<1x26x256xbf16> to vector<1x24x256xbf16>
    %20 = vector.extract_strided_slice %17 {offsets = [0, 2, 0], sizes = [1, 24, 256], strides = [1, 1, 1]} : vector<1x26x256xbf16> to vector<1x24x256xbf16>
    %21 = tpu.concatenate %18, %19, %20 in 2 : vector<1x24x256xbf16>, vector<1x24x256xbf16>, vector<1x24x256xbf16> -> vector<1x24x768xbf16>
    %22 = vector.shape_cast %21 : vector<1x24x768xbf16> to vector<24x768xbf16>
    %c0_9 = arith.constant 0 : index
    %c0_10 = arith.constant 0 : index
    %23 = vector.load %arg5[%c0_9, %c0_10] : memref<768x384xbf16, #tpu.memory_space<vmem>>, vector<768x384xbf16>
    %cst_11 = arith.constant dense<0.000000e+00> : vector<24x384xf32>
    %24 = tpu.matmul %22, %23, %cst_11 {dimension_numbers = #tpu.dot_dimension_numbers<[1], [0], [0], [1], [0, 0, 1, 1], [], []>} : vector<24x768xbf16>, vector<768x384xbf16>, vector<24x384xf32> -> vector<24x384xf32>
    %c0_12 = arith.constant 0 : index
    %c0_13 = arith.constant 0 : index
    %25 = vector.load %arg6[%c0_12, %c0_13] : memref<1x384xf32, #tpu.memory_space<vmem>>, vector<1x384xf32>
    %26 = vector.broadcast %25 : vector<1x384xf32> to vector<24x384xf32>
    %27 = arith.mulf %24, %26 : vector<24x384xf32>
    %c0_14 = arith.constant 0 : index
    %c0_15 = arith.constant 0 : index
    %28 = vector.load %arg7[%c0_14, %c0_15] : memref<1x384xf32, #tpu.memory_space<vmem>>, vector<1x384xf32>
    %29 = vector.broadcast %28 : vector<1x384xf32> to vector<24x384xf32>
    %30 = arith.addf %27, %29 : vector<24x384xf32>
    %cst_16 = arith.constant 0.000000e+00 : f32
    %31 = vector.broadcast %cst_16 : f32 to vector<24x384xf32>
    %32 = arith.maximumf %30, %31 : vector<24x384xf32>
    %33 = arith.truncf %32 : vector<24x384xf32> to vector<24x384xbf16>
    %34 = vector.extract_strided_slice %33 {offsets = [0, 16], sizes = [24, 368], strides = [1, 1]} : vector<24x384xbf16> to vector<24x368xbf16>
    %35 = vector.extract_strided_slice %33 {offsets = [0, 0], sizes = [24, 16], strides = [1, 1]} : vector<24x384xbf16> to vector<24x16xbf16>
    %36 = tpu.concatenate %34, %35 in 1 : vector<24x368xbf16>, vector<24x16xbf16> -> vector<24x384xbf16>
    %37 = arith.maximumf %33, %36 : vector<24x384xbf16>
    %38 = vector.extract_strided_slice %37 {offsets = [1, 0], sizes = [23, 384], strides = [1, 1]} : vector<24x384xbf16> to vector<23x384xbf16>
    %39 = vector.extract_strided_slice %37 {offsets = [0, 0], sizes = [1, 384], strides = [1, 1]} : vector<24x384xbf16> to vector<1x384xbf16>
    %40 = tpu.concatenate %38, %39 in 0 : vector<23x384xbf16>, vector<1x384xbf16> -> vector<24x384xbf16>
    %41 = arith.maximumf %37, %40 : vector<24x384xbf16>
    %42 = vector.shape_cast %41 : vector<24x384xbf16> to vector<1x9216xbf16>
    %c0_17 = arith.constant 0 : index
    %c0_18 = arith.constant 0 : index
    %43 = vector.load %arg8[%c0_17, %c0_18] : memref<9216x128xbf16, #tpu.memory_space<vmem>>, vector<9216x128xbf16>
    %cst_19 = arith.constant dense<0.000000e+00> : vector<1x128xf32>
    %44 = tpu.matmul %42, %43, %cst_19 {dimension_numbers = #tpu.dot_dimension_numbers<[1], [0], [0], [1], [0, 0, 1, 1], [], []>} : vector<1x9216xbf16>, vector<9216x128xbf16>, vector<1x128xf32> -> vector<1x128xf32>
    %c0_20 = arith.constant 0 : index
    %c0_21 = arith.constant 0 : index
    %45 = vector.load %arg9[%c0_20, %c0_21] : memref<1x128xf32, #tpu.memory_space<vmem>>, vector<1x128xf32>
    %46 = arith.addf %44, %45 : vector<1x128xf32>
    %cst_22 = arith.constant 0.000000e+00 : f32
    %47 = vector.broadcast %cst_22 : f32 to vector<1x128xf32>
    %48 = arith.maximumf %46, %47 : vector<1x128xf32>
    %49 = arith.truncf %48 : vector<1x128xf32> to vector<1x128xbf16>
    %c0_23 = arith.constant 0 : index
    %c0_24 = arith.constant 0 : index
    %50 = vector.load %arg10[%c0_23, %c0_24] : memref<128x128xbf16, #tpu.memory_space<vmem>>, vector<128x128xbf16>
    %cst_25 = arith.constant dense<0.000000e+00> : vector<1x128xf32>
    %51 = tpu.matmul %49, %50, %cst_25 {dimension_numbers = #tpu.dot_dimension_numbers<[1], [0], [0], [1], [0, 0, 1, 1], [], []>} : vector<1x128xbf16>, vector<128x128xbf16>, vector<1x128xf32> -> vector<1x128xf32>
    %c0_26 = arith.constant 0 : index
    %c0_27 = arith.constant 0 : index
    %52 = vector.load %arg11[%c0_26, %c0_27] : memref<1x128xf32, #tpu.memory_space<vmem>>, vector<1x128xf32>
    %53 = arith.addf %51, %52 : vector<1x128xf32>
    %54 = vector.shape_cast %53 : vector<1x128xf32> to vector<1x1x128xf32>
    %c0_28 = arith.constant 0 : index
    %c0_29 = arith.constant 0 : index
    %c0_30 = arith.constant 0 : index
    %55 = vector.load %arg12[%c0_28, %c0_29, %c0_30] : memref<1x1x128xf32, #tpu.memory_space<vmem>>, vector<1x1x128xf32>
    tpu.vector_store %arg12[%c0_28, %c0_29, %c0_30], %54 {strides = array<i32>} : memref<1x1x128xf32, #tpu.memory_space<vmem>>, vector<1x1x128xf32>,
    return
  }
  func.func @transform_0(%arg0: i32) -> (i32, i32, i32) {
    %c0_i32 = arith.constant 0 : i32
    %c0_i32_0 = arith.constant 0 : i32
    %c0_i32_1 = arith.constant 0 : i32
    return %arg0, %c0_i32, %c0_i32_0 : i32, i32, i32
  }
  func.func @transform_1(%arg0: i32) -> (i32, i32) {
    %c0_i32 = arith.constant 0 : i32
    %c0_i32_0 = arith.constant 0 : i32
    %c0_i32_1 = arith.constant 0 : i32
    return %c0_i32, %c0_i32_0 : i32, i32
  }
  func.func @transform_2(%arg0: i32) -> (i32, i32) {
    %c0_i32 = arith.constant 0 : i32
    %c0_i32_0 = arith.constant 0 : i32
    %c0_i32_1 = arith.constant 0 : i32
    return %c0_i32, %c0_i32_0 : i32, i32
  }
  func.func @transform_3(%arg0: i32) -> (i32, i32) {
    %c0_i32 = arith.constant 0 : i32
    %c0_i32_0 = arith.constant 0 : i32
    %c0_i32_1 = arith.constant 0 : i32
    return %c0_i32, %c0_i32_0 : i32, i32
  }
  func.func @transform_4(%arg0: i32) -> (i32, i32) {
    %c0_i32 = arith.constant 0 : i32
    %c0_i32_0 = arith.constant 0 : i32
    %c0_i32_1 = arith.constant 0 : i32
    return %c0_i32, %c0_i32_0 : i32, i32
  }
  func.func @transform_5(%arg0: i32) -> (i32, i32) {
    %c0_i32 = arith.constant 0 : i32
    %c0_i32_0 = arith.constant 0 : i32
    %c0_i32_1 = arith.constant 0 : i32
    return %c0_i32, %c0_i32_0 : i32, i32
  }
  func.func @transform_6(%arg0: i32) -> (i32, i32) {
    %c0_i32 = arith.constant 0 : i32
    %c0_i32_0 = arith.constant 0 : i32
    %c0_i32_1 = arith.constant 0 : i32
    return %c0_i32, %c0_i32_0 : i32, i32
  }
  func.func @transform_7(%arg0: i32) -> (i32, i32) {
    %c0_i32 = arith.constant 0 : i32
    %c0_i32_0 = arith.constant 0 : i32
    %c0_i32_1 = arith.constant 0 : i32
    return %c0_i32, %c0_i32_0 : i32, i32
  }
  func.func @transform_8(%arg0: i32) -> (i32, i32) {
    %c0_i32 = arith.constant 0 : i32
    %c0_i32_0 = arith.constant 0 : i32
    %c0_i32_1 = arith.constant 0 : i32
    return %c0_i32, %c0_i32_0 : i32, i32
  }
  func.func @transform_9(%arg0: i32) -> (i32, i32) {
    %c0_i32 = arith.constant 0 : i32
    %c0_i32_0 = arith.constant 0 : i32
    %c0_i32_1 = arith.constant 0 : i32
    return %c0_i32, %c0_i32_0 : i32, i32
  }
  func.func @transform_10(%arg0: i32) -> (i32, i32) {
    %c0_i32 = arith.constant 0 : i32
    %c0_i32_0 = arith.constant 0 : i32
    %c0_i32_1 = arith.constant 0 : i32
    return %c0_i32, %c0_i32_0 : i32, i32
  }
  func.func @transform_11(%arg0: i32) -> (i32, i32, i32) {
    %c0_i32 = arith.constant 0 : i32
    %c0_i32_0 = arith.constant 0 : i32
    %c0_i32_1 = arith.constant 0 : i32
    return %arg0, %c0_i32, %c0_i32_0 : i32, i32, i32
  }
}

</mosaic_0001>

<bundles_post_ra>
// kernel: tile.13
= control target key start
LH: loop header
LB: loop body
LE: loop exit
PB: predicated region body
PF: predicated region fallthrough
CT: control target
= control target key end

     0   :  { %s34_s0 = inlined_call_operand.vmem [shape: f32[16], index: 0, kind: input, shape index: {}]   ;;  %s35_s1 = inlined_call_operand.vmem [shape: f32[24,16], index: 1, kind: output, shape index: {}]  }
   0x1   :  { %v4_v0 = vld [vmem:[%s34_s0] ss:$0 sm:$0xff] }
   0x2   :  { %5 = vst [vmem:[%s35_s1] sm:$0xff] %v4_v0  ;;  %10 = vst [vmem:[%s35_s1 + $0x8] sm:$0xff] %v4_v0 }
   0x3   :  { %11 = vst [vmem:[%s35_s1 + $0x10] sm:$0xff] %v4_v0 }

// kernel: tile.14
= control target key start
LH: loop header
LB: loop body
LE: loop exit
PB: predicated region body
PF: predicated region fallthrough
CT: control target
= control target key end

     0   :  { %s81_s8 = smov 112   ;;  %s82_s11 = smov 80   ;;  %vm3_vm0 = vcmask 130048   ;;  %vm9_vm1 = vcmask 1048448   ;;  %vm15_vm2 = vcmask 917248   ;;  %vm21_vm3 = vcmask 786048   ;;  %s131_s0 = inlined_call_operand.vmem [shape: f32[24,16], index: 0, kind: input, shape index: {}]   ;;  %s132_s1 = inlined_call_operand.vmem [shape: f32[1,384], index: 1, kind: output, shape index: {}]  }
   0x1   :  { %v65_v0 = vld [vmem:[%s131_s0 + $0x7] ss:$8 sm:$0x7]   ;;  %v67_v1 = vld [vmem:[%s131_s0 + $0x5] ss:$8 sm:$0x7]  }
   0x2   :  { %7 = vrot.lane.b32.xlu0 %v65_v0, %s81_s8  ;;  %19 = vrot.lane.b32.xlu1 %v67_v1, %s82_s11  ;;  %v66_v2 = vld [vmem:[%s131_s0 + $0x6] ss:$8 sm:$0x7]   ;;  %v68_v3 = vld [vmem:[%s131_s0 + $0x4] ss:$8 sm:$0x7]  }
   0x3   :  { %s83_s16 = smov 96   ;;  %v2_v4 = vld [vmem:[%s131_s0] ss:$8 sm:$0x7]   ;;  %s84_s19 = smov 64   ;;  %vm27_vm4 = vcmask 654848  }
   0x4   :  { %v69_v5 = vld [vmem:[%s131_s0 + $0x3] ss:$8 sm:$0x7]   ;;  %4 = vst.msk [vmem:[#allocation0] ss:$8 sm:$0x7] %vm3_vm0, %v2_v4  }
   0x5   :  { %v70_v6 = vld [vmem:[%s131_s0 + $0x2] ss:$8 sm:$0x7]   ;;  %s85_s24 = smov 48   ;;  %s86_s25 = smov 32   ;;  %vm33_vm5 = vcmask 523648  }
   0x6   :  { %13 = vrot.lane.b32.xlu0 %v66_v2, %s83_s16  ;;  %25 = vrot.lane.b32.xlu1 %v68_v3, %s84_s19  ;;  %v71_v7 = vld [vmem:[%s131_s0 + $0x1] ss:$8 sm:$0x7]   ;;  %s87_s0 = smov 16   ;;  %vm39_vm6 = vcmask 392448   ;;  %vm45_vm7 = vcmask 261248  }
   0xa   :  { %31 = vrot.lane.b32.xlu0 %v69_v5, %s85_s24  ;;  %37 = vrot.lane.b32.xlu1 %v70_v6, %s86_s25 }
   0xe   :  { %43 = vrot.lane.b32.xlu0 %v71_v7, %s87_s0 }
  0x74   :  { %v8_v8 = vpop.permute.xlu0 %7   ;;  %v20_v9 = vpop.permute.xlu1 %19  }
  0x75   :  { %10 = vst.msk [vmem:[#allocation0] ss:$8 sm:$0x7] %vm9_vm1, %v8_v8  }
  0x78   :  { %v14_v10 = vpop.permute.xlu0 %13   ;;  %v26_v11 = vpop.permute.xlu1 %25  }
  0x79   :  { %16 = vst.msk [vmem:[#allocation0] ss:$8 sm:$0x7] %vm15_vm2, %v14_v10  }
  0x7a   :  { %22 = vst.msk [vmem:[#allocation0] ss:$8 sm:$0x7] %vm21_vm3, %v20_v9  }
  0x7b   :  { %28 = vst.msk [vmem:[#allocation0] ss:$8 sm:$0x7] %vm27_vm4, %v26_v11  }
  0x7c   :  { %v32_v12 = vpop.permute.xlu0 %31   ;;  %v38_v13 = vpop.permute.xlu1 %37  }
  0x7d   :  { %34 = vst.msk [vmem:[#allocation0] ss:$8 sm:$0x7] %vm33_vm5, %v32_v12  }
  0x7e   :  { %40 = vst.msk [vmem:[#allocation0] ss:$8 sm:$0x7] %vm39_vm6, %v38_v13  }
  0x80   :  { %v44_v14 = vpop.permute.xlu0 %43  }
  0x81   :  { %46 = vst.msk [vmem:[#allocation0] ss:$8 sm:$0x7] %vm45_vm7, %v44_v14  }
  0x88   :  { %v50_v15 = vld [vmem:[#allocation0] sm:$0x1]  ;;  %v54_v16 = vld [vmem:[#allocation0 + $0x8] sm:$0x1]  ;;  %v59_v17 = vld [vmem:[#allocation0 + $0x10] sm:$0x1] }
  0x89   :  { %52 = vst [vmem:[%s132_s1] sm:$0x1] %v50_v15  ;;  %72 = vst [vmem:[%s132_s1 + $0x1] sm:$0x1] %v54_v16 }
  0x8a   :  { %73 = vst [vmem:[%s132_s1 + $0x2] sm:$0x1] %v59_v17 }

// kernel: _forward_impl.1
= control target key start
LH: loop header
LB: loop body
LE: loop exit
PB: predicated region body
PF: predicated region fallthrough
CT: control target
= control target key end

     0   :  { %16 = vsyncpa [#allocation3], 0  ;;  %s14044_s0 = inlined_call_operand.vmem [shape: bf16[2,28,28], index: 0, kind: input, shape index: {}]   ;;  %s14045_s1 = inlined_call_operand.vmem [shape: bf16[84,256], index: 1, kind: input, shape index: {}]   ;;  %s14046_s2 = inlined_call_operand.vmem [shape: f32[1,256], index: 2, kind: input, shape index: {}]   ;;  %s14047_s3 = inlined_call_operand.vmem [shape: f32[1,256], index: 3, kind: input, shape index: {}]   ;;  %s14048_s4 = inlined_call_operand.vmem [shape: bf16[768,384], index: 4, kind: input, shape index: {}]   ;;  %s14049_s5 = inlined_call_operand.vmem [shape: f32[1,384], index: 5, kind: input, shape index: {}]   ;;  %s14050_s6 = inlined_call_operand.vmem [shape: f32[1,384], index: 6, kind: input, shape index: {}]   ;;  %s14051_s7 = inlined_call_operand.vmem [shape: bf16[9216,128], index: 7, kind: input, shape index: {}]   ;;  %s14052_s8 = inlined_call_operand.vmem [shape: f32[1,128], index: 8, kind: input, shape index: {}]   ;;  %s14053_s9 = inlined_call_operand.vmem [shape: bf16[128,128], index: 9, kind: input, shape index: {}]   ;;  %s14054_s10 = inlined_call_operand.vmem [shape: f32[1,128], index: 10, kind: input, shape index: {}]   ;;  %s14055_s11 = inlined_call_operand.hbm [shape: f32[2,1,128], index: 11, kind: output, shape index: {}]  }
   0x1   :  { %18 = vsyncpa [#allocation3 + $0x1], 0  ;;  %s11186_s17 = smov 0   ;;  %s11188_s18 = smov 0  }
   0x2   :  { %s11190_s19 = smov 0   ;;  %s11192_s20 = smov 0  }
   0x3 LB: > { %14058 = sst [smem:[#allocation5_spill]] %s11113_s19  ;;  %s11207_s21 = sadd.s32 4294967295, %s11117_s20   ;;  %s11117_s20 = sphi %s11192_s20, %s14096_s20   ;;  %s11113_s19 = sphi %s11190_s19, %s14093_s19   ;;  %s11109_s18 = sphi %s11188_s18, %s14095_s18   ;;  %s11105_s17 = sphi %s11186_s17, %s14094_s17  }
   0x4   : > { %s8539_s22 = sadd.s32 4294967294, %s11117_s20   ;;  %s11211_s23 = sadd.s32 1, %s11117_s20  }
   0x5   : > { %s267_s24 = sadd.s32 1, %s11113_s19  ;;  %s264_s25 = ssub.s32 %s11117_s20, %s11211_s23 }
   0x6   : > { %p277_p0 = scmp.ne.s32.totalorder %s11113_s19, %s11109_s18  ;;  %p265_p1 = scmp.eq.s32.totalorder %s264_s25, 0 }
   0x7   : > { %p278_p2 = scmp.eq.s32.totalorder %s11207_s21, 1  ;;  %p283_p3 = scmp.ne.s32.totalorder %s11109_s18, %s11105_s17 }
   0x8   : > { %p284_p4 = scmp.eq.s32.totalorder %s8539_s22, 1  ;;  %p8542_p7 = scmp.ge.s32.totalorder %s11117_s20, 1 }
   0x9   : > { %s11222_s26 = scalar_select %p265_p1, %s11113_s19, %s267_s24  }
   0xa   : > { %p11224_p5 = por %p278_p2, %p277_p0  ;;  %p11228_p6 = por %p284_p4, %p283_p3 }
   0xb   : > { %14059 = sst [smem:[#allocation6_spill]] %s11222_s26  ;;  %p340_p8 = scmp.lt.s32.totalorder %s11117_s20, 3 }
   0xd   : > { %p341_p9 = pnand %p8542_p7, %p340_p8 }
   0xf   : > { %344 = sbr.rel (%p341_p9) target bundleno = 1894 (0x766), region = 64 }
  0x16   : > { %p379_p10 = scmp.lt.s32.totalorder %s11207_s21, 1  ;;  %v10262_v0 = vld [vmem:[%s14045_s1 + $0x4] ss:$8 sps:$4 sm:$0xff]   ;;  %v10264_v1 = vld [vmem:[%s14045_s1] ss:$8 sps:$4 sm:$0xff]   ;;  %v11119_v8 = vmov 0  }
  0x17   : > { %v10265_v2 = vld [vmem:[%s14045_s1 + $0x14] ss:$8 sps:$4 sm:$0xff]   ;;  %515 = vmatprep.subr.bf16.mxu0 %v10262_v0  ;;  %v10267_v3 = vld [vmem:[%s14045_s1 + $0x10] ss:$8 sps:$4 sm:$0xff]   ;;  %v10268_v4 = vld [vmem:[%s14045_s1 + $0x24] ss:$8 sps:$4 sm:$0xff]   ;;  %547 = vmatprep.mubr.bf16.mxu0 %v11119_v8 }
  0x18   : > { %s380_s14 = scalar_select %p379_p10, %s11207_s21, 1  ;;  %516 = vmatpush1.bf16.msra.mxu0 %v10264_v1  ;;  %v10270_v7 = vld [vmem:[%s14045_s1 + $0x20] ss:$8 sps:$4 sm:$0xff]   ;;  %v10271_v12 = vld [vmem:[%s14045_s1 + $0x34] ss:$8 sps:$4 sm:$0xff]   ;;  %vm419_vm1 = vcmask 1046528  }
  0x19   : > { %517 = vmatprep.subr.bf16.mxu0 %v10265_v2  ;;  %v10273_v14 = vld [vmem:[%s14045_s1 + $0x30] ss:$8 sps:$4 sm:$0xff]   ;;  %v10274_v17 = vld [vmem:[%s14045_s1 + $0x44] ss:$8 sps:$4 sm:$0xff]   ;;  %vm399_vm0 = vsmask.f32 7424 }
  0x1a   : > { %s9293_s22 = sshll.u32 %s380_s14, 4  ;;  %v447_v18 = vld [vmem:[%s14045_s1 + $0x50] sm:$0x33]  ;;  %s11120_s30 = smov 28   ;;  %v10276_v24 = vld [vmem:[%s14045_s1 + $0x40] ss:$8 sps:$4 sm:$0xff]  }
  0x1b   : > { %s383_s29 = scalar_lea.vmem %s14044_s0, %s9293_s22  ;;  %v10279_v25 = vld [vmem:[%s14048_s4 + $0x4] ss:$12 sps:$4 sm:$0xff]   ;;  %v10281_v26 = vld [vmem:[%s14048_s4] ss:$12 sps:$4 sm:$0xff]   ;;  %v8558_v28 = vcombine.high %v447_v18, %v447_v18  ;;  %v8557_v29 = vcombine.low %v447_v18, %v447_v18  ;;  %v10282_v30 = vld [vmem:[%s14048_s4 + $0x1c] ss:$12 sps:$4 sm:$0xff]  }
  0x1c   : > { %v11254_v5 = vld [vmem:[%s383_s29] sm:$0xff]   ;;  %v11256_v6 = vld [vmem:[%s383_s29 + $0x8] sm:$0x3f]   ;;  %518 = vmatpush1.bf16.msra.mxu0 %v10267_v3  ;;  %vm508_vm2 = vcmask 1041408   ;;  %1628 = vmatprep.subr.bf16.mxu1 %v10279_v25  ;;  %s11121_s24 = smov 56   ;;  %vm427_vm3 = vcmask 228352  }
  0x1d   : > { %v401_v9 = vshrl.u32 %v11254_v5, 16  ;;  %v403_v10 = vshll.u32 %v11254_v5, 16  ;;  %v408_v11 = vshll.u32 %v11256_v6, 16  ;;  %519 = vmatprep.subr.bf16.mxu0 %v10268_v4  ;;  %v412_v13 = vshrl.u32 %v11256_v6, 16  ;;  %1629 = vmatpush1.bf16.msra.mxu1 %v10281_v26  ;;  %v10284_v31 = vld [vmem:[%s14048_s4 + $0x18] ss:$12 sps:$4 sm:$0xff]  }
  0x1e   : > { %v420_v20 = vrot.slane %v11254_v5, 1  ;;  %v421_v21 = vrot.slane %v11256_v6, 1  ;;  %v10285_v32 = vld [vmem:[%s14048_s4 + $0x34] ss:$12 sps:$4 sm:$0xff]   ;;  %v510_v33 = vsel %vm508_vm2, %v8557_v29, 0  ;;  %1630 = vmatprep.subr.bf16.mxu1 %v10282_v30  ;;  %vm432_vm4 = vcmask 457728  }
  0x1f   : > { %v405_v15 = vrot.slane %v403_v10, 1  ;;  %v410_v16 = vrot.slane %v408_v11, 1  ;;  %v10305_v34 = vld [vmem:[%s14048_s4 + $0xc8] ss:$12 sps:$4 sm:$0xff]   ;;  %v10287_v35 = vld [vmem:[%s14048_s4 + $0x30] ss:$12 sps:$4 sm:$0xff]  }
  0x20   : > { %520 = vmatpush1.bf16.msra.mxu0 %v10270_v7  ;;  %v422_v27 = vsel %vm419_vm1, %v420_v20, %v421_v21  ;;  %v10288_v36 = vld [vmem:[%s14048_s4 + $0x4c] ss:$12 sps:$4 sm:$0xff]   ;;  %v10290_v37 = vld [vmem:[%s14048_s4 + $0x48] ss:$12 sps:$4 sm:$0xff]   ;;  %v10291_v38 = vld [vmem:[%s14048_s4 + $0x64] ss:$12 sps:$4 sm:$0xff]  }
  0x21   : > { %v406_v19 = vor.u32 %v405_v15, %v401_v9  ;;  %v414_v22 = vor.u32 %v412_v13, %v410_v16  ;;  %521 = vmatprep.subr.bf16.mxu0 %v10271_v12  ;;  %1631 = vmatpush1.bf16.msra.mxu1 %v10284_v31  ;;  %v10293_v39 = vld [vmem:[%s14048_s4 + $0x60] ss:$12 sps:$4 sm:$0xff]   ;;  %v10294_v40 = vld [vmem:[%s14048_s4 + $0x7c] ss:$12 sps:$4 sm:$0xff]   ;;  %v10296_v41 = vld [vmem:[%s14048_s4 + $0x78] ss:$12 sps:$4 sm:$0xff]  }
  0x22   : > { %1632 = vmatprep.subr.bf16.mxu1 %v10285_v32  ;;  %v10297_v42 = vld [vmem:[%s14048_s4 + $0x94] ss:$12 sps:$4 sm:$0xff]   ;;  %v10299_v43 = vld [vmem:[%s14048_s4 + $0x90] ss:$12 sps:$4 sm:$0xff]   ;;  %v10300_v44 = vld [vmem:[%s14048_s4 + $0xac] ss:$12 sps:$4 sm:$0xff]  }
  0x23   : > { %v411_v23 = vsel %vm399_vm0, %v406_v19, %v410_v16  ;;  %417 = vrot.lane.b32.xlu1 %v414_v22, %s11120_s30  ;;  %v10302_v45 = vld [vmem:[%s14048_s4 + $0xa8] ss:$12 sps:$4 sm:$0xff]   ;;  %v10303_v46 = vld [vmem:[%s14048_s4 + $0xc4] ss:$12 sps:$4 sm:$0xff]   ;;  %v10306_v47 = vld [vmem:[%s14048_s4 + $0xc0] ss:$12 sps:$4 sm:$0xff]  }
  0x24   : > { %415 = vrot.lane.b32.xlu0 %v411_v23, %s11120_s30  ;;  %522 = vmatpush1.bf16.msra.mxu0 %v10273_v14  ;;  %v10308_v48 = vld [vmem:[%s14048_s4 + $0xdc] ss:$12 sps:$4 sm:$0xff]   ;;  %v10311_v49 = vld [vmem:[%s14048_s4 + $0xd8] ss:$12 sps:$4 sm:$0xff]   ;;  %v10313_v50 = vld [vmem:[%s14048_s4 + $0xf4] ss:$12 sps:$4 sm:$0xff]   ;;  %v570_v23 = vlaneseq }
  0x25   : > { %523 = vmatprep.subr.bf16.mxu0 %v10274_v17  ;;  %1633 = vmatpush1.bf16.msra.mxu1 %v10287_v35  ;;  %v10316_v51 = vld [vmem:[%s14048_s4 + $0xf0] ss:$12 sps:$4 sm:$0xff]   ;;  %v10318_v52 = vld [vmem:[%s14048_s4 + $0x10c] ss:$12 sps:$4 sm:$0xff]   ;;  %v10321_v53 = vld [vmem:[%s14048_s4 + $0x108] ss:$12 sps:$4 sm:$0xff]  }
  0x26   : > { %1634 = vmatprep.subr.bf16.mxu1 %v10288_v36  ;;  %v10323_v54 = vld [vmem:[%s14048_s4 + $0x124] ss:$12 sps:$4 sm:$0xff]   ;;  %v10326_v55 = vld [vmem:[%s14048_s4 + $0x120] ss:$12 sps:$4 sm:$0xff]   ;;  %vm503_vm5 = vcmask 687104   ;;  %s11122_s25 = smov 112  }
  0x27   : > { %425 = vrot.lane.b32.xlu1 %v421_v21, %s11121_s24  ;;  %v10307_v57 = vld [vmem:[%s14048_s4 + $0x8] ss:$12 sps:$4 sm:$0xff]   ;;  %v10310_v59 = vld [vmem:[%s14048_s4 + $0xe0] ss:$12 sps:$4 sm:$0xff]   ;;  %v10315_v0 = vld [vmem:[%s14048_s4 + $0xf8] ss:$12 sps:$4 sm:$0xff]  }
  0x28   : > { %423 = vrot.lane.b32.xlu0 %v422_v27, %s11121_s24  ;;  %524 = vmatpush1.bf16.msra.mxu0 %v10276_v24  ;;  %v10312_v63 = vld [vmem:[%s14048_s4 + $0x20] ss:$12 sps:$4 sm:$0xff]   ;;  %v10317_v3 = vld [vmem:[%s14048_s4 + $0x38] ss:$12 sps:$4 sm:$0xff]   ;;  %v10320_v4 = vld [vmem:[%s14048_s4 + $0x110] ss:$12 sps:$4 sm:$0xff]  }
  0x29   : > { %8559 = vmatprep.subr.msk.bf16.mxu0 %vm508_vm2, %v8558_v28  ;;  %1635 = vmatpush1.bf16.msra.mxu1 %v10290_v37  ;;  %v10322_v7 = vld [vmem:[%s14048_s4 + $0x50] ss:$12 sps:$4 sm:$0xff]   ;;  %v10330_v10 = vld [vmem:[%s14048_s4 + $0x140] ss:$12 sps:$4 sm:$0xff]   ;;  %v10331_v11 = vld [vmem:[%s14048_s4 + $0x138] ss:$12 sps:$4 sm:$0xff]  }
  0x2a   : > { %1636 = vmatprep.subr.bf16.mxu1 %v10291_v38  ;;  %v10328_v9 = vld [vmem:[%s14048_s4 + $0x13c] ss:$12 sps:$4 sm:$0xff]   ;;  %v10332_v12 = vld [vmem:[%s14048_s4 + $0x80] ss:$12 sps:$4 sm:$0xff]   ;;  %v10335_v14 = vld [vmem:[%s14048_s4 + $0x158] ss:$12 sps:$4 sm:$0xff]  }
  0x2b   : > { %v10333_v13 = vld [vmem:[%s14048_s4 + $0x154] ss:$12 sps:$4 sm:$0xff]   ;;  %v10336_v15 = vld [vmem:[%s14048_s4 + $0x150] ss:$12 sps:$4 sm:$0xff]   ;;  %v10337_v16 = vld [vmem:[%s14048_s4 + $0x98] ss:$12 sps:$4 sm:$0xff]  }
  0x2c   : > { %526 = vmatpush1.bf16.msra.mxu0 %v510_v33  ;;  %v10338_v17 = vld [vmem:[%s14048_s4 + $0x16c] ss:$12 sps:$4 sm:$0xff]   ;;  %v10340_v18 = vld [vmem:[%s14048_s4 + $0x170] ss:$12 sps:$4 sm:$0xff]   ;;  %v10341_v19 = vld [vmem:[%s14048_s4 + $0x168] ss:$12 sps:$4 sm:$0xff]  }
  0x2d   : > { %9294 = vmatprep.subr.bf16.mxu0 %v10305_v34  ;;  %1637 = vmatpush1.bf16.msra.mxu1 %v10293_v39  ;;  %v10342_v20 = vld [vmem:[%s14048_s4 + $0xb0] ss:$12 sps:$4 sm:$0xff]   ;;  %v10346_v22 = vld [vmem:[%s14048_s4 + $0x248] ss:$12 sps:$4 sm:$0xff]   ;;  %v11442_v24 = vshrl.u32 %v570_v23, 7  ;;  %vm2010_vm6 = vcmask 916480  }
  0x2e   : > { %1638 = vmatprep.subr.bf16.mxu1 %v10294_v40  ;;  %v10345_v21 = vld [vmem:[%s14048_s4 + $0x184] ss:$12 sps:$4 sm:$0xff]   ;;  %v568_v26 = vld [vmem:[%s14046_s2] sm:$0x3]  ;;  %vm2091_vm7 = vcmask 1043456   ;;  %vm11124_vm11 = vmmov 0  }
  0x2f   : > { %v11445_v25 = vsub.s32 0, %v11442_v24  ;;  %v588_v27 = vld [vmem:[%s14047_s3] sm:$0x3]  ;;  %v11454_v28 = vsub.s32 1, %v11442_v24  ;;  %vm2092_vm8 = vsmask.f32 3328 }
  0x30   : > { %vm2103_vm9 = vsmask.f32 256  ;;  %vm11944_vm10 = vmand %vm2091_vm7, %vm2092_vm8  ;;  %s377_s29 = sand.u32 1, %s11109_s18   ;;  %s9290_s12 = sshll.u32 %s11207_s21, 4 }
  0x31   : > { %1639 = vmatpush1.bf16.msra.mxu1 %v10296_v41  ;;  %v573_v29 = vrot.slane %v568_v26, %v11445_v25  ;;  %v577_v30 = vrot.slane %v568_v26, %v11454_v28  ;;  %v593_v31 = vrot.slane %v588_v27, %v11445_v25  ;;  %v597_v33 = vrot.slane %v588_v27, %v11454_v28  ;;  %v10358_v27 = vld [vmem:[%s14048_s4 + $0x1c8] ss:$12 sps:$4 sm:$0xff]   ;;  %s378_s13 = scalar_lea.vmem [#allocation2], %s377_s29  ;;  %s14002_s15 = scalar_lea.hbm %s14055_s11, %s9290_s12 }
  0x32   : > { %1640 = vmatprep.subr.bf16.mxu1 %v10297_v42  ;;  %s8484_s14 = sshll.u32 %s378_s13, 4  ;;  %s8472_s16 = scalar_lea.sflag [#allocation3], %s377_s29  ;;  %s14004_s14 = int_to_ptr.vmem [resolvable:$true] %s8484_s14 }
  0x33   : > { %s11055_s21 = scalar_lea.vmem %s14004_s14, 16  ;;  %s11125_s22 = smov [#allocation2]  }
  0x34   : > { %p11056_p11 = scmp.ne.s32.totalorder %s14004_s14, %s11055_s21  ;;  %s11059_s24 = sshll.u32 %s11125_s22, 4  ;;  %s11060_s24 = int_to_ptr.vmem [resolvable:$false] %s11059_s24 }
  0x35   : > { %1641 = vmatpush1.bf16.msra.mxu1 %v10299_v43  ;;  %s11061_s30 = scalar_lea.vmem %s11060_s24, 32  ;;  %p11062_p0 = scmp.lt.s32.totalorder %s14004_s14, %s11060_s24 }
  0x36   : > { %1642 = vmatprep.subr.bf16.mxu1 %v10300_v44  ;;  %p11057_p12 = pnand %p11056_p11, %p11224_p5  ;;  %p11063_p1 = scmp.lt.s32.totalorder %s11061_s30, %s11055_s21 }
  0x38   : > { %p11058_p13 = pneg %p11057_p12  ;;  %p11064_p2 = por %p11063_p1, %p11062_p0 }
  0x39   : > { %1643 = vmatpush1.bf16.msra.mxu1 %v10302_v45 }
  0x3a   : > { %1644 = vmatprep.subr.bf16.mxu1 %v10303_v46  ;;  %p11065_p3 = pnand %p11064_p2, %p11058_p13 }
  0x3d   : > { %1645 = vmatpush1.bf16.msra.mxu1 %v10306_v47 }
  0x3e   : > { %1646 = vmatprep.subr.bf16.mxu1 %v10308_v48 }
  0x41   : > { %1647 = vmatpush1.bf16.msra.mxu1 %v10311_v49 }
  0x42   : > { %1648 = vmatprep.subr.bf16.mxu1 %v10313_v50  ;;  %v10343_v50 = vld [vmem:[%s14048_s4 + $0x180] ss:$12 sps:$4 sm:$0xff]  }
  0x45   : > { %1649 = vmatpush1.bf16.msra.mxu1 %v10316_v51  ;;  %v10347_v51 = vld [vmem:[%s14048_s4 + $0x188] ss:$12 sps:$4 sm:$0xff]  }
  0x46   : > { %1650 = vmatprep.subr.bf16.mxu1 %v10318_v52 }
  0x49   : > { %1651 = vmatpush1.bf16.msra.mxu1 %v10321_v53 }
  0x4a   : > { %1652 = vmatprep.subr.bf16.mxu1 %v10323_v54 }
  0x4d   : > { %1653 = vmatpush1.bf16.msra.mxu1 %v10326_v55  ;;  %v10350_v55 = vld [vmem:[%s14048_s4 + $0x19c] ss:$12 sps:$4 sm:$0xff]  }
  0x4e   : > { %1654 = vmatprep.subr.bf16.mxu1 %v10328_v9 }
  0x51   : > { %1655 = vmatpush1.bf16.msra.mxu1 %v10331_v11 }
  0x52   : > { %1656 = vmatprep.subr.bf16.mxu1 %v10333_v13 }
  0x55   : > { %1657 = vmatpush1.bf16.msra.mxu1 %v10336_v15  ;;  %v10357_v15 = vld [vmem:[%s14048_s4 + $0x1b8] ss:$12 sps:$4 sm:$0xff]  }
  0x56   : > { %1658 = vmatprep.subr.bf16.mxu1 %v10338_v17 }
  0x59   : > { %1659 = vmatpush1.bf16.msra.mxu1 %v10341_v19  ;;  %v10361_v19 = vld [vmem:[%s14048_s4 + $0x290] ss:$12 sps:$4 sm:$0xff]  }
  0x5a   : > { %1679 = vmatprep.subr.bf16.mxu1 %v10345_v21 }
  0x95   : > { %v418_v58 = vpop.permute.xlu1 %417 }
  0x96   : > { %v416_v56 = vpop.permute.xlu0 %415  ;;  %v431_v1 = vsel %vm427_vm3, %v11256_v6, %v418_v58  ;;  %v10325_v6 = vld [vmem:[%s14048_s4 + $0x128] ss:$12 sps:$4 sm:$0xff]  }
  0x97   : > { %v429_v60 = vsel %vm427_vm3, %v11254_v5, %v416_v56 }
  0x99   : > { %v426_v2 = vpop.permute.xlu1 %425 }
  0x9a   : > { %v424_v61 = vpop.permute.xlu0 %423  ;;  %v436_v5 = vsel %vm432_vm4, %v431_v1, %v426_v2  ;;  %v10348_v2 = vld [vmem:[%s14048_s4 + $0x198] ss:$12 sps:$4 sm:$0xff]  }
  0x9b   : > { %v434_v62 = vsel %vm432_vm4, %v429_v60, %v424_v61 }
  0x9c   : > { %8560 = vmatmul.mubr.msk.bf16.vlgmr.msra.gmra.mrb[0].mxu0 %vm503_vm5, %v434_v62  ;;  %v10351_v62 = vld [vmem:[%s14048_s4 + $0x260] ss:$12 sps:$4 sm:$0xff]  }
  0x9d   : > { %557 = vmatprep.mubr.bf16.mxu0 %v11119_v8  ;;  %9295 = vmatpush3.bf16.msra.mxu0 %v10307_v57  ;;  %v10327_v8 = vld [vmem:[%s14048_s4 + $0x68] ss:$12 sps:$4 sm:$0xff]  }
  0x9e   : > { %9296 = vmatprep.subr.bf16.mxu0 %v10310_v59 }
  0xa1   : > { %9297 = vmatpush3.bf16.msra.mxu0 %v10312_v63 }
  0xa2   : > { %9298 = vmatprep.subr.bf16.mxu0 %v10315_v0 }
  0xa4   : > { %8561 = vmatmul.mubr.msk.bf16.gmra.mrb[4].mxu0 %vm503_vm5, %v436_v5 }
  0xa5   : > { %9299 = vmatpush3.bf16.msra.mxu0 %v10317_v3  ;;  %v10352_v3 = vld [vmem:[%s14048_s4 + $0x1a0] ss:$12 sps:$4 sm:$0xff]  }
  0xa6   : > { %9300 = vmatprep.subr.bf16.mxu0 %v10320_v4 }
  0xa9   : > { %9301 = vmatpush3.bf16.msra.mxu0 %v10322_v7 }
  0xaa   : > { %9302 = vmatprep.subr.bf16.mxu0 %v10325_v6  ;;  %v10355_v6 = vld [vmem:[%s14048_s4 + $0x1b4] ss:$12 sps:$4 sm:$0xff]  }
  0xad   : > { %9303 = vmatpush3.bf16.msra.mxu0 %v10327_v8 }
  0xae   : > { %9304 = vmatprep.subr.bf16.mxu0 %v10330_v10  ;;  %v10356_v10 = vld [vmem:[%s14048_s4 + $0x278] ss:$12 sps:$4 sm:$0xff]  }
  0xb1   : > { %9305 = vmatpush3.bf16.msra.mxu0 %v10332_v12 }
  0xb2   : > { %9306 = vmatprep.subr.bf16.mxu0 %v10335_v14  ;;  %v10353_v14 = vld [vmem:[%s14048_s4 + $0x1b0] ss:$12 sps:$4 sm:$0xff]  }
  0xb5   : > { %9307 = vmatpush3.bf16.msra.mxu0 %v10337_v16 }
  0xb6   : > { %9308 = vmatprep.subr.bf16.mxu0 %v10340_v18  ;;  %v10360_v18 = vld [vmem:[%s14048_s4 + $0x1cc] ss:$12 sps:$4 sm:$0xff]  }
  0xb9   : > { %9309 = vmatpush3.bf16.msra.mxu0 %v10342_v20 }
  0xba   : > { %9322 = vmatprep.subr.bf16.mxu0 %v10346_v22 }
 0x16f   : > { %v549_v32 = vpop.f32.mrb[0].mxu0 }
 0x170   : > { %v580_v34 = vmul.f32 %v573_v29, %v549_v32  ;;  %v551_v35 = vpop.f32.mrb[1].mxu0 }
 0x171   : > { %v581_v36 = vmul.f32 %v577_v30, %v551_v35  ;;  %v553_v37 = vpop.f32.mrb[2].mxu0  ;;  %v10366_v35 = vld [vmem:[%s14048_s4 + $0x2a8] ss:$12 sps:$4 sm:$0xff]  }
 0x172   : > { %v600_v38 = vadd.f32 %v593_v31, %v580_v34  ;;  %v582_v39 = vmul.f32 %v573_v29, %v553_v37  ;;  %v555_v40 = vpop.f32.mrb[3].mxu0  ;;  %v10365_v34 = vld [vmem:[%s14048_s4 + $0x1e4] ss:$12 sps:$4 sm:$0xff]  }
 0x173   : > { %v601_v41 = vadd.f32 %v597_v33, %v581_v36  ;;  %v583_v42 = vmul.f32 %v577_v30, %v555_v40 }
 0x174   : > { %v602_v43 = vadd.f32 %v593_v31, %v582_v39  ;;  %v608_v44 = vmax.f32 %v600_v38, 0.0 }
 0x175   : > { %v603_v45 = vadd.f32 %v597_v33, %v583_v42  ;;  %v609_v46 = vmax.f32 %v601_v41, 0.0 }
 0x176   : > { %v610_v47 = vmax.f32 %v602_v43, 0.0 }
 0x177   : > { %v611_v48 = vmax.f32 %v603_v45, 0.0  ;;  %v559_v49 = vpop.f32.mrb[4].mxu0  ;;  %v10367_v45 = vld [vmem:[%s14048_s4 + $0x1e8] ss:$12 sps:$4 sm:$0xff]  }
 0x178   : > { %v11466_v52 = vpack.c.bf16 %v610_v47, %v608_v44  ;;  %v584_v53 = vmul.f32 %v573_v29, %v559_v49  ;;  %v561_v54 = vpop.f32.mrb[5].mxu0  ;;  %v10363_v44 = vld [vmem:[%s14048_s4 + $0x1e0] ss:$12 sps:$4 sm:$0xff]  }
 0x179   : > { %v11471_v56 = vpack.c.bf16 %v611_v48, %v609_v46  ;;  %v585_v57 = vmul.f32 %v577_v30, %v561_v54  ;;  %v563_v58 = vpop.f32.mrb[6].mxu0  ;;  %v10370_v46 = vld [vmem:[%s14048_s4 + $0x1fc] ss:$12 sps:$4 sm:$0xff]   ;;  %v10371_v47 = vld [vmem:[%s14048_s4 + $0x2c0] ss:$12 sps:$4 sm:$0xff]  }
 0x17a   : > { %v604_v59 = vadd.f32 %v593_v31, %v584_v53  ;;  %v586_v60 = vmul.f32 %v573_v29, %v563_v58  ;;  %v565_v61 = vpop.f32.mrb[7].mxu0  ;;  %v623_v63 = vshll.u32 %v11466_v52, 16  ;;  %v621_v22 = vshrl.u32 %v11466_v52, 16  ;;  %v10368_v48 = vld [vmem:[%s14048_s4 + $0x1f8] ss:$12 sps:$4 sm:$0xff]  }
 0x17b   : > { %v605_v0 = vadd.f32 %v597_v33, %v585_v57  ;;  %v587_v1 = vmul.f32 %v577_v30, %v565_v61  ;;  %1660 = vmatprep.mubr.bf16.mxu1 %v11471_v56  ;;  %1813 = vmatprep.mubr.bf16.mxu0 %v11471_v56  ;;  %v635_v4 = vshll.u32 %v11471_v56, 16  ;;  %v633_v21 = vshrl.u32 %v11471_v56, 16  ;;  %v10362_v30 = vld [vmem:[%s14048_s4 + $0x1d0] ss:$12 sps:$4 sm:$0xff]   ;;  %v10372_v49 = vld [vmem:[%s14048_s4 + $0x200] ss:$12 sps:$4 sm:$0xff]  }
 0x17c   : > { %v612_v5 = vmax.f32 %v604_v59, 0.0  ;;  %v606_v7 = vadd.f32 %v593_v31, %v586_v60  ;;  %1661 = vmatmul.mubr.bf16.vlgmr.msra.gmra.mrb[0].mxu1 %v11466_v52  ;;  %1814 = vmatmul.mubr.bf16.vlgmr.msra.gmra.mrb[8].mxu0 %v11466_v52  ;;  %v625_v12 = vrot.slane %v623_v63, 1  ;;  %v661_v26 = vrot.slane %v11471_v56, 1  ;;  %v10373_v53 = vld [vmem:[%s14048_s4 + $0x210] ss:$12 sps:$4 sm:$0xff]  }
 0x17d   : > { %v613_v8 = vmax.f32 %v605_v0, 0.0  ;;  %v607_v9 = vadd.f32 %v597_v33, %v587_v1  ;;  %1680 = vmatpush1.bf16.msra.mxu1 %v10343_v50  ;;  %9323 = vmatpush3.bf16.msra.mxu0 %v10347_v51  ;;  %v637_v16 = vrot.slane %v635_v4, 1  ;;  %v658_v32 = vrot.slane %v11466_v52, 1  ;;  %v10375_v50 = vld [vmem:[%s14048_s4 + $0x214] ss:$12 sps:$4 sm:$0xff]  }
 0x17e   : > { %v614_v11 = vmax.f32 %v606_v7, 0.0  ;;  %1681 = vmatprep.subr.bf16.mxu1 %v10350_v55  ;;  %9324 = vmatprep.subr.bf16.mxu0 %v10351_v62  ;;  %v626_v36 = vor.u32 %v625_v12, %v621_v22  ;;  %v10376_v51 = vld [vmem:[%s14048_s4 + $0x2d8] ss:$12 sps:$4 sm:$0xff]   ;;  %v10381_v57 = vld [vmem:[%s14048_s4 + $0x2f0] ss:$12 sps:$4 sm:$0xff]  }
 0x17f   : > { %v615_v13 = vmax.f32 %v607_v9, 0.0  ;;  %v638_v39 = vor.u32 %v637_v16, %v633_v21  ;;  %v10377_v54 = vld [vmem:[%s14048_s4 + $0x218] ss:$12 sps:$4 sm:$0xff]   ;;  %v10378_v58 = vld [vmem:[%s14048_s4 + $0x228] ss:$12 sps:$4 sm:$0xff]  }
 0x180   : > { %v11500_v17 = vpack.c.bf16 %v614_v11, %v612_v5  ;;  %v10380_v55 = vld [vmem:[%s14048_s4 + $0x22c] ss:$12 sps:$4 sm:$0xff]   ;;  %v10382_v59 = vld [vmem:[%s14048_s4 + $0x230] ss:$12 sps:$4 sm:$0xff]   ;;  %v10386_v61 = vld [vmem:[%s14048_s4 + $0x3c8] ss:$12 sps:$4 sm:$0xff]  }
 0x181   : > { %v11508_v20 = vpack.c.bf16 %v615_v13, %v613_v8  ;;  %1682 = vmatpush1.bf16.msra.mxu1 %v10348_v2  ;;  %9325 = vmatpush3.bf16.msra.mxu0 %v10352_v3  ;;  %v10385_v60 = vld [vmem:[%s14048_s4 + $0x244] ss:$12 sps:$4 sm:$0xff]   ;;  %v10383_v62 = vld [vmem:[%s14048_s4 + $0x240] ss:$12 sps:$4 sm:$0xff]   ;;  %v10387_v63 = vld [vmem:[%s14048_s4 + $0x308] ss:$12 sps:$4 sm:$0xff]  }
 0x182   : > { %1683 = vmatprep.subr.bf16.mxu1 %v10355_v6  ;;  %9326 = vmatprep.subr.bf16.mxu0 %v10356_v10  ;;  %v628_v23 = vshll.u32 %v11500_v17, 16  ;;  %v644_v31 = vshrl.u32 %v11500_v17, 16  ;;  %v11526_v33 = vrot.slane %v11500_v17, 1  ;;  %v10390_v0 = vld [vmem:[%s14048_s4 + $0x25c] ss:$12 sps:$4 sm:$0xff]  }
 0x183   : > { %1670 = vmatprep.mubr.bf16.mxu1 %v11508_v20  ;;  %1821 = vmatprep.mubr.bf16.mxu0 %v11508_v20  ;;  %v640_v29 = vshll.u32 %v11508_v20, 16  ;;  %v647_v38 = vshrl.u32 %v11508_v20, 16  ;;  %v11540_v41 = vrot.slane %v11508_v20, 1  ;;  %v10391_v1 = vld [vmem:[%s14048_s4 + $0x3e0] ss:$12 sps:$4 sm:$0xff]  }
 0x184   : > { %1671 = vmatmul.mubr.bf16.gmra.mrb[4].mxu1 %v11500_v17  ;;  %1822 = vmatmul.mubr.bf16.gmra.mrb[12].mxu0 %v11500_v17  ;;  %v11536_v37 = vrot.slane %v628_v23, 1  ;;  %v10388_v2 = vld [vmem:[%s14048_s4 + $0x258] ss:$12 sps:$4 sm:$0xff]   ;;  %v10392_v3 = vld [vmem:[%s14048_s4 + $0x320] ss:$12 sps:$4 sm:$0xff]  }
 0x185   : > { %1684 = vmatpush1.bf16.msra.mxu1 %v10353_v14  ;;  %9327 = vmatpush3.bf16.msra.mxu0 %v10357_v15  ;;  %v642_v40 = vrot.slane %v640_v29, 1  ;;  %v10395_v5 = vld [vmem:[%s14048_s4 + $0x274] ss:$12 sps:$4 sm:$0xff]   ;;  %v10396_v7 = vld [vmem:[%s14048_s4 + $0x3f8] ss:$12 sps:$4 sm:$0xff]   ;;  %v663_v16 = vsel %vm419_vm1, %v661_v26, %v11540_v41 }
 0x186   : > { %1685 = vmatprep.subr.bf16.mxu1 %v10360_v18  ;;  %9328 = vmatprep.subr.bf16.mxu0 %v10361_v19  ;;  %v11544_v42 = vsel %vm399_vm0, %v626_v36, %v11536_v37  ;;  %v10393_v6 = vld [vmem:[%s14048_s4 + $0x270] ss:$12 sps:$4 sm:$0xff]   ;;  %v10397_v8 = vld [vmem:[%s14048_s4 + $0x338] ss:$12 sps:$4 sm:$0xff]   ;;  %v11632_v9 = vor.u32 %v644_v31, %v11536_v37  ;;  %v10398_v12 = vld [vmem:[%s14048_s4 + $0x288] ss:$12 sps:$4 sm:$0xff]  }
 0x187   : > { %v643_v43 = vsel %vm399_vm0, %v638_v39, %v642_v40  ;;  %v11613_v4 = vor.u32 %v647_v38, %v642_v40  ;;  %v10400_v10 = vld [vmem:[%s14048_s4 + $0x28c] ss:$12 sps:$4 sm:$0xff]   ;;  %v10401_v11 = vld [vmem:[%s14048_s4 + $0x410] ss:$12 sps:$4 sm:$0xff]   ;;  %v10406_v15 = vld [vmem:[%s14048_s4 + $0x428] ss:$12 sps:$4 sm:$0xff]   ;;  %v11712_v38 = vsel %vm419_vm1, %v658_v32, %v11526_v33 }
 0x188   : > { %1711 = vmatprep.mubr.bf16.mxu1 %v643_v43  ;;  %1861 = vmatprep.mubr.bf16.mxu0 %v643_v43  ;;  %v10402_v13 = vld [vmem:[%s14048_s4 + $0x350] ss:$12 sps:$4 sm:$0xff]   ;;  %v10403_v17 = vld [vmem:[%s14048_s4 + $0x2a0] ss:$12 sps:$4 sm:$0xff]   ;;  %v10407_v18 = vld [vmem:[%s14048_s4 + $0x368] ss:$12 sps:$4 sm:$0xff]  }
 0x189   : > { %1686 = vmatpush1.bf16.msra.mxu1 %v10358_v27  ;;  %9329 = vmatpush3.bf16.msra.mxu0 %v10362_v30  ;;  %v10405_v14 = vld [vmem:[%s14048_s4 + $0x2a4] ss:$12 sps:$4 sm:$0xff]   ;;  %v10410_v19 = vld [vmem:[%s14048_s4 + $0x2bc] ss:$12 sps:$4 sm:$0xff]   ;;  %v10411_v56 = vld [vmem:[%s14048_s4 + $0x440] ss:$12 sps:$4 sm:$0xff]  }
 0x18a   : > { %1687 = vmatprep.subr.bf16.mxu1 %v10365_v34  ;;  %9330 = vmatprep.subr.bf16.mxu0 %v10366_v35  ;;  %v10408_v20 = vld [vmem:[%s14048_s4 + $0x2b8] ss:$12 sps:$4 sm:$0xff]   ;;  %v10412_v21 = vld [vmem:[%s14048_s4 + $0x380] ss:$12 sps:$4 sm:$0xff]   ;;  %v10413_v26 = vld [vmem:[%s14048_s4 + $0x2d0] ss:$12 sps:$4 sm:$0xff]  }
 0x18b   : > { %v10415_v22 = vld [vmem:[%s14048_s4 + $0x2d4] ss:$12 sps:$4 sm:$0xff]   ;;  %v10416_v23 = vld [vmem:[%s14048_s4 + $0x458] ss:$12 sps:$4 sm:$0xff]   ;;  %v10421_v30 = vld [vmem:[%s14048_s4 + $0x470] ss:$12 sps:$4 sm:$0xff]  }
 0x18c   : > { %v10417_v27 = vld [vmem:[%s14048_s4 + $0x398] ss:$12 sps:$4 sm:$0xff]   ;;  %v10418_v31 = vld [vmem:[%s14048_s4 + $0x2e8] ss:$12 sps:$4 sm:$0xff]   ;;  %v10422_v34 = vld [vmem:[%s14048_s4 + $0x3b0] ss:$12 sps:$4 sm:$0xff]  }
 0x18d   : > { %1688 = vmatpush1.bf16.msra.mxu1 %v10363_v44  ;;  %9331 = vmatpush3.bf16.msra.mxu0 %v10367_v45  ;;  %v10420_v29 = vld [vmem:[%s14048_s4 + $0x2ec] ss:$12 sps:$4 sm:$0xff]   ;;  %v10425_v35 = vld [vmem:[%s14048_s4 + $0x304] ss:$12 sps:$4 sm:$0xff]   ;;  %v10428_v37 = vld [vmem:[%s14048_s4 + $0x31c] ss:$12 sps:$4 sm:$0xff]  }
 0x18e   : > { %1689 = vmatprep.subr.bf16.mxu1 %v10370_v46  ;;  %9332 = vmatprep.subr.bf16.mxu0 %v10371_v47  ;;  %v10423_v36 = vld [vmem:[%s14048_s4 + $0x300] ss:$12 sps:$4 sm:$0xff]   ;;  %v10426_v39 = vld [vmem:[%s14048_s4 + $0x318] ss:$12 sps:$4 sm:$0xff]   ;;  %v10429_v52 = vld [vmem:[%s14048_s4 + $0x330] ss:$12 sps:$4 sm:$0xff]  }
 0x18f   : > { %v10431_v40 = vld [vmem:[%s14048_s4 + $0x334] ss:$12 sps:$4 sm:$0xff]   ;;  %v10434_v32 = vld [vmem:[%s14048_s4 + $0x34c] ss:$12 sps:$4 sm:$0xff]   ;;  %v10437_v43 = vld [vmem:[%s14048_s4 + $0x364] ss:$12 sps:$4 sm:$0xff]  }
 0x190   : > { %v10435_v44 = vld [vmem:[%s14048_s4 + $0x360] ss:$12 sps:$4 sm:$0xff]   ;;  %v10440_v45 = vld [vmem:[%s14048_s4 + $0x37c] ss:$12 sps:$4 sm:$0xff]   ;;  %v10438_v46 = vld [vmem:[%s14048_s4 + $0x378] ss:$12 sps:$4 sm:$0xff]  }
 0x191   : > { %1690 = vmatpush1.bf16.msra.mxu1 %v10368_v48  ;;  %9333 = vmatpush3.bf16.msra.mxu0 %v10372_v49  ;;  %v10443_v47 = vld [vmem:[%s14048_s4 + $0x394] ss:$12 sps:$4 sm:$0xff]   ;;  %v10441_v48 = vld [vmem:[%s14048_s4 + $0x390] ss:$12 sps:$4 sm:$0xff]   ;;  %v10446_v49 = vld [vmem:[%s14048_s4 + $0x3ac] ss:$12 sps:$4 sm:$0xff]  }
 0x192   : > { %1691 = vmatprep.subr.bf16.mxu1 %v10375_v50  ;;  %9334 = vmatprep.subr.bf16.mxu0 %v10376_v51  ;;  %v10444_v50 = vld [vmem:[%s14048_s4 + $0x3a8] ss:$12 sps:$4 sm:$0xff]   ;;  %v10449_v51 = vld [vmem:[%s14048_s4 + $0x3c4] ss:$12 sps:$4 sm:$0xff]  }
 0x195   : > { %1692 = vmatpush1.bf16.msra.mxu1 %v10373_v53  ;;  %9335 = vmatpush3.bf16.msra.mxu0 %v10377_v54  ;;  %v10447_v53 = vld [vmem:[%s14048_s4 + $0x3c0] ss:$12 sps:$4 sm:$0xff]   ;;  %v10452_v54 = vld [vmem:[%s14048_s4 + $0x3dc] ss:$12 sps:$4 sm:$0xff]  }
 0x196   : > { %1693 = vmatprep.subr.bf16.mxu1 %v10380_v55  ;;  %9336 = vmatprep.subr.bf16.mxu0 %v10381_v57  ;;  %v10450_v55 = vld [vmem:[%s14048_s4 + $0x3d8] ss:$12 sps:$4 sm:$0xff]   ;;  %v10455_v57 = vld [vmem:[%s14048_s4 + $0x3f4] ss:$12 sps:$4 sm:$0xff]  }
 0x199   : > { %1694 = vmatpush1.bf16.msra.mxu1 %v10378_v58  ;;  %9337 = vmatpush3.bf16.msra.mxu0 %v10382_v59  ;;  %v10453_v58 = vld [vmem:[%s14048_s4 + $0x3f0] ss:$12 sps:$4 sm:$0xff]   ;;  %v10458_v59 = vld [vmem:[%s14048_s4 + $0x40c] ss:$12 sps:$4 sm:$0xff]  }
 0x19a   : > { %1695 = vmatprep.subr.bf16.mxu1 %v10385_v60  ;;  %9350 = vmatprep.subr.bf16.mxu0 %v10386_v61  ;;  %v10456_v60 = vld [vmem:[%s14048_s4 + $0x408] ss:$12 sps:$4 sm:$0xff]   ;;  %v10461_v61 = vld [vmem:[%s14048_s4 + $0x424] ss:$12 sps:$4 sm:$0xff]  }
 0x19c   : > { %1862 = vmatmul.mubr.bf16.vlgmr.msra.gmra.mrb[16].mxu0 %v11544_v42 }
 0x19d   : > { %1696 = vmatpush1.bf16.msra.mxu1 %v10383_v62  ;;  %9351 = vmatpush3.bf16.msra.mxu0 %v10387_v63  ;;  %v10459_v62 = vld [vmem:[%s14048_s4 + $0x420] ss:$12 sps:$4 sm:$0xff]   ;;  %v10464_v63 = vld [vmem:[%s14048_s4 + $0x43c] ss:$12 sps:$4 sm:$0xff]  }
 0x19e   : > { %1697 = vmatprep.subr.bf16.mxu1 %v10390_v0  ;;  %9352 = vmatprep.subr.bf16.mxu0 %v10391_v1  ;;  %v10462_v0 = vld [vmem:[%s14048_s4 + $0x438] ss:$12 sps:$4 sm:$0xff]   ;;  %v10467_v1 = vld [vmem:[%s14048_s4 + $0x454] ss:$12 sps:$4 sm:$0xff]  }
 0x19f   : > { %1869 = vmatprep.mubr.bf16.mxu0 %v11613_v4 }
 0x1a1   : > { %1698 = vmatpush1.bf16.msra.mxu1 %v10388_v2  ;;  %9353 = vmatpush3.bf16.msra.mxu0 %v10392_v3  ;;  %v10465_v2 = vld [vmem:[%s14048_s4 + $0x450] ss:$12 sps:$4 sm:$0xff]   ;;  %v10470_v3 = vld [vmem:[%s14048_s4 + $0x46c] ss:$12 sps:$4 sm:$0xff]  }
 0x1a2   : > { %1699 = vmatprep.subr.bf16.mxu1 %v10395_v5  ;;  %9354 = vmatprep.subr.bf16.mxu0 %v10396_v7 }
 0x1a4   : > { %1870 = vmatmul.mubr.bf16.gmra.mrb[20].mxu0 %v11632_v9 }
 0x1a5   : > { %1700 = vmatpush1.bf16.msra.mxu1 %v10393_v6  ;;  %9355 = vmatpush3.bf16.msra.mxu0 %v10397_v8 }
 0x1a6   : > { %1909 = vmatprep.mubr.bf16.mxu0 %v663_v16  ;;  %1701 = vmatprep.subr.bf16.mxu1 %v10400_v10 }
 0x1a7   : > { %9356 = vmatprep.subr.bf16.mxu0 %v10401_v11 }
 0x1a9   : > { %1702 = vmatpush1.bf16.msra.mxu1 %v10398_v12  ;;  %9357 = vmatpush3.bf16.msra.mxu0 %v10402_v13 }
 0x1aa   : > { %1703 = vmatprep.subr.bf16.mxu1 %v10405_v14  ;;  %9358 = vmatprep.subr.bf16.mxu0 %v10406_v15 }
 0x1ad   : > { %1704 = vmatpush1.bf16.msra.mxu1 %v10403_v17  ;;  %9359 = vmatpush3.bf16.msra.mxu0 %v10407_v18 }
 0x1ae   : > { %1705 = vmatprep.subr.bf16.mxu1 %v10410_v19  ;;  %9360 = vmatprep.subr.bf16.mxu0 %v10411_v56 }
 0x1b1   : > { %1706 = vmatpush1.bf16.msra.mxu1 %v10408_v20  ;;  %9361 = vmatpush3.bf16.msra.mxu0 %v10412_v21 }
 0x1b2   : > { %1707 = vmatprep.subr.bf16.mxu1 %v10415_v22  ;;  %9362 = vmatprep.subr.bf16.mxu0 %v10416_v23 }
 0x1b5   : > { %1708 = vmatpush1.bf16.msra.mxu1 %v10413_v26  ;;  %9363 = vmatpush3.bf16.msra.mxu0 %v10417_v27 }
 0x1b6   : > { %1709 = vmatprep.subr.bf16.mxu1 %v10420_v29  ;;  %9364 = vmatprep.subr.bf16.mxu0 %v10421_v30  ;;  %v1937_v30 = vsub.s32 2, %v11442_v24  ;;  %v10472_v24 = vld [vmem:[%s14051_s7] sm:$0xff]  }
 0x1b9   : > { %1710 = vmatpush1.bf16.msra.mxu1 %v10418_v31  ;;  %9365 = vmatpush3.bf16.msra.mxu0 %v10422_v34  ;;  %v1925_v31 = vld [vmem:[%s14049_s5] sm:$0x7] }
 0x1ba   : > { %1730 = vmatprep.subr.bf16.mxu1 %v10425_v35 }
 0x1bc   : > { %1712 = vmatmul.mubr.bf16.vlgmr.msra.gmra.mrb[0].mxu1 %v11544_v42  ;;  %1910 = vmatmul.mubr.bf16.vlgmr.msra.gmra.mrb[24].mxu0 %v11712_v38  ;;  %v10432_v42 = vld [vmem:[%s14048_s4 + $0x348] ss:$12 sps:$4 sm:$0xff]  }
 0x1bd   : > { %1721 = vmatprep.mubr.bf16.mxu1 %v11613_v4  ;;  %1731 = vmatpush1.bf16.msra.mxu1 %v10423_v36  ;;  %v10468_v4 = vld [vmem:[%s14048_s4 + $0x468] ss:$12 sps:$4 sm:$0xff]   ;;  %v1951_v36 = vld [vmem:[%s14050_s6] sm:$0x7] }
 0x1be   : > { %1917 = vmatprep.mubr.bf16.mxu0 %v11540_v41  ;;  %1732 = vmatprep.subr.bf16.mxu1 %v10428_v37 }
 0x1c1   : > { %1733 = vmatpush1.bf16.msra.mxu1 %v10426_v39 }
 0x1c2   : > { %1734 = vmatprep.subr.bf16.mxu1 %v10431_v40  ;;  %v10471_v40 = vld [vmem:[%s14051_s7 + $0x40] sm:$0xff]  }
 0x1c3   : > { %9378 = vmatprep.subr.bf16.mxu0 %v10471_v40 }
 0x1c4   : > { %1722 = vmatmul.mubr.bf16.gmra.mrb[4].mxu1 %v11632_v9  ;;  %1918 = vmatmul.mubr.bf16.gmra.mrb[28].mxu0 %v11526_v33 }
 0x1c5   : > { %1735 = vmatpush1.bf16.msra.mxu1 %v10429_v52  ;;  %1762 = vmatprep.mubr.bf16.mxu1 %v663_v16  ;;  %v10473_v52 = vld [vmem:[%s14051_s7 + $0x1c0] sm:$0xff]  }
 0x1c6   : > { %1736 = vmatprep.subr.bf16.mxu1 %v10434_v32  ;;  %9379 = vmatpush3.bf16.msra.mxu0 %v10472_v24 }
 0x1c9   : > { %1737 = vmatpush1.bf16.msra.mxu1 %v10432_v42  ;;  %v10474_v42 = vld [vmem:[%s14051_s7 + $0x180] sm:$0xff]  }
 0x1ca   : > { %1738 = vmatprep.subr.bf16.mxu1 %v10437_v43  ;;  %v10475_v43 = vld [vmem:[%s14051_s7 + $0x48] sm:$0xff]  }
 0x1cb   : > { %9380 = vmatprep.subr.bf16.mxu0 %v10475_v43 }
 0x1cd   : > { %1739 = vmatpush1.bf16.msra.mxu1 %v10435_v44 }
 0x1ce   : > { %1740 = vmatprep.subr.bf16.mxu1 %v10440_v45 }
 0x1d1   : > { %1741 = vmatpush1.bf16.msra.mxu1 %v10438_v46  ;;  %v1964_v46 = vrot.slane %v1951_v36, %v1937_v30 }
 0x1d2   : > { %1742 = vmatprep.subr.bf16.mxu1 %v10443_v47  ;;  %v10477_v47 = vld [vmem:[%s14051_s7 + $0x1c8] sm:$0xff]  }
 0x1d5   : > { %1743 = vmatpush1.bf16.msra.mxu1 %v10441_v48  ;;  %v10476_v48 = vld [vmem:[%s14051_s7 + $0x8] sm:$0xff]  }
 0x1d6   : > { %1744 = vmatprep.subr.bf16.mxu1 %v10446_v49  ;;  %v10478_v49 = vld [vmem:[%s14051_s7 + $0x188] sm:$0xff]   ;;  %9381 = vmatpush3.bf16.msra.mxu0 %v10476_v48 }
 0x1d9   : > { %1745 = vmatpush1.bf16.msra.mxu1 %v10444_v50 }
 0x1da   : > { %1746 = vmatprep.subr.bf16.mxu1 %v10449_v51 }
 0x1dd   : > { %1747 = vmatpush1.bf16.msra.mxu1 %v10447_v53  ;;  %v10479_v53 = vld [vmem:[%s14051_s7 + $0x50] sm:$0xff]  }
 0x1de   : > { %1748 = vmatprep.subr.bf16.mxu1 %v10452_v54  ;;  %v10481_v54 = vld [vmem:[%s14051_s7 + $0x1d0] sm:$0xff]   ;;  %9382 = vmatprep.subr.bf16.mxu0 %v10479_v53 }
 0x1e1   : > { %1749 = vmatpush1.bf16.msra.mxu1 %v10450_v55 }
 0x1e2   : > { %1750 = vmatprep.subr.bf16.mxu1 %v10455_v57 }
 0x1e5   : > { %1751 = vmatpush1.bf16.msra.mxu1 %v10453_v58 }
 0x1e6   : > { %1752 = vmatprep.subr.bf16.mxu1 %v10458_v59 }
 0x1e9   : > { %1753 = vmatpush1.bf16.msra.mxu1 %v10456_v60  ;;  %v10480_v60 = vld [vmem:[%s14051_s7 + $0x10] sm:$0xff]  }
 0x1ea   : > { %1754 = vmatprep.subr.bf16.mxu1 %v10461_v61  ;;  %9383 = vmatpush3.bf16.msra.mxu0 %v10480_v60 }
 0x1ed   : > { %1755 = vmatpush1.bf16.msra.mxu1 %v10459_v62 }
 0x1ee   : > { %1756 = vmatprep.subr.bf16.mxu1 %v10464_v63 }
 0x1f1   : > { %1757 = vmatpush1.bf16.msra.mxu1 %v10462_v0 }
 0x1f2   : > { %1758 = vmatprep.subr.bf16.mxu1 %v10467_v1 }
 0x1f5   : > { %1759 = vmatpush1.bf16.msra.mxu1 %v10465_v2 }
 0x1f6   : > { %1760 = vmatprep.subr.bf16.mxu1 %v10470_v3 }
 0x1f9   : > { %1761 = vmatpush1.bf16.msra.mxu1 %v10468_v4 }
 0x1fa   : > { %9444 = vmatprep.subr.bf16.mxu1 %v10473_v52  ;;  %v10493_v52 = vld [vmem:[%s14051_s7 + $0x1e8] sm:$0xff]  }
 0x1fc   : > { %1763 = vmatmul.mubr.bf16.vlgmr.msra.gmra.mrb[0].mxu1 %v11712_v38  ;;  %v1938_v38 = vrot.slane %v1925_v31, %v1937_v30 }
 0x1fd   : > { %1772 = vmatprep.mubr.bf16.mxu1 %v11540_v41  ;;  %9445 = vmatpush3.bf16.msra.mxu1 %v10474_v42 }
 0x1fe   : > { %9446 = vmatprep.subr.bf16.mxu1 %v10477_v47 }
 0x201   : > { %9447 = vmatpush3.bf16.msra.mxu1 %v10478_v49  ;;  %v10496_v49 = vld [vmem:[%s14051_s7 + $0x30] sm:$0xff]  }
 0x202   : > { %9448 = vmatprep.subr.bf16.mxu1 %v10481_v54  ;;  %v10498_v54 = vld [vmem:[%s14051_s7 + $0x1b0] sm:$0xff]  }
 0x204   : > { %1773 = vmatmul.mubr.bf16.gmra.mrb[4].mxu1 %v11526_v33 }
 0x24f   : > { %v9310_v5 = vpop.f32.mrb[8].mxu0 }
 0x250   : > { %v9311_v7 = vpop.f32.mrb[9].mxu0 }
 0x251   : > { %v9312_v6 = vadd.f32 %v9311_v7, %v9310_v5  ;;  %v9313_v8 = vpop.f32.mrb[10].mxu0 }
 0x252   : > { %v9314_v9 = vpop.f32.mrb[11].mxu0 }
 0x253   : > { %v9315_v10 = vadd.f32 %v9314_v9, %v9313_v8  ;;  %v1934_v8 = vrot.slane %v1925_v31, %v11454_v28  ;;  %v10482_v9 = vld [vmem:[%s14051_s7 + $0x190] sm:$0xff]  }
 0x254   : > { %9449 = vmatpush3.bf16.msra.mxu1 %v10482_v9 }
 0x257   : > { %v9316_v11 = vpop.f32.mrb[12].mxu0 }
 0x258   : > { %v9317_v12 = vpop.f32.mrb[13].mxu0 }
 0x259   : > { %v9318_v13 = vadd.f32 %v9317_v12, %v9316_v11  ;;  %v9319_v14 = vpop.f32.mrb[14].mxu0  ;;  %v10483_v11 = vld [vmem:[%s14051_s7 + $0x58] sm:$0xff]  }
 0x25a   : > { %v9320_v15 = vpop.f32.mrb[15].mxu0  ;;  %v10484_v14 = vld [vmem:[%s14051_s7 + $0x18] sm:$0xff]   ;;  %9384 = vmatprep.subr.bf16.mxu0 %v10483_v11 }
 0x25b   : > { %9385 = vmatpush3.bf16.msra.mxu0 %v10484_v14 }
 0x26f   : > { %v9338_v16 = vpop.f32.mrb[16].mxu0 }
 0x270   : > { %v9339_v17 = vpop.f32.mrb[17].mxu0 }
 0x271   : > { %v9340_v18 = vadd.f32 %v9339_v17, %v9338_v16  ;;  %v9341_v19 = vpop.f32.mrb[18].mxu0  ;;  %v10485_v17 = vld [vmem:[%s14051_s7 + $0x1d8] sm:$0xff]  }
 0x272   : > { %v9342_v56 = vpop.f32.mrb[19].mxu0  ;;  %9450 = vmatprep.subr.bf16.mxu1 %v10485_v17 }
 0x273   : > { %v1864_v20 = vadd.f32 %v9340_v18, %v9312_v6  ;;  %v9343_v41 = vadd.f32 %v9342_v56, %v9341_v19  ;;  %v1930_v6 = vrot.slane %v1925_v31, %v11445_v25  ;;  %v10486_v19 = vld [vmem:[%s14051_s7 + $0x198] sm:$0xff]  }
 0x274   : > { %9451 = vmatpush3.bf16.msra.mxu1 %v10486_v19 }
 0x275   : > { %v1867_v21 = vadd.f32 %v9343_v41, %v9315_v10  ;;  %v1956_v10 = vrot.slane %v1951_v36, %v11445_v25  ;;  %v10487_v41 = vld [vmem:[%s14051_s7 + $0x60] sm:$0xff]  }
 0x276   : > { %9386 = vmatprep.subr.bf16.mxu0 %v10487_v41 }
 0x277   : > { %v9344_v33 = vpop.f32.mrb[20].mxu0 }
 0x278   : > { %v9345_v22 = vpop.f32.mrb[21].mxu0 }
 0x279   : > { %v9346_v23 = vadd.f32 %v9345_v22, %v9344_v33  ;;  %v9347_v26 = vpop.f32.mrb[22].mxu0  ;;  %v10488_v22 = vld [vmem:[%s14051_s7 + $0x20] sm:$0xff]  }
 0x27a   : > { %v9348_v27 = vpop.f32.mrb[23].mxu0  ;;  %v10489_v26 = vld [vmem:[%s14051_s7 + $0x1e0] sm:$0xff]   ;;  %9387 = vmatpush3.bf16.msra.mxu0 %v10488_v22 }
 0x27b   : > { %v1872_v29 = vadd.f32 %v9346_v23, %v9318_v13  ;;  %v1960_v13 = vrot.slane %v1951_v36, %v11454_v28  ;;  %9452 = vmatprep.subr.bf16.mxu1 %v10489_v26 }
 0x28f   : > { %v9366_v34 = vpop.f32.mrb[24].mxu0 }
 0x290   : > { %v9367_v35 = vpop.f32.mrb[25].mxu0 }
 0x291   : > { %v9368_v37 = vadd.f32 %v9367_v35, %v9366_v34  ;;  %v9369_v39 = vpop.f32.mrb[26].mxu0  ;;  %v10491_v34 = vld [vmem:[%s14051_s7 + $0x68] sm:$0xff]  }
 0x292   : > { %v9370_v32 = vpop.f32.mrb[27].mxu0  ;;  %9388 = vmatprep.subr.bf16.mxu0 %v10491_v34 }
 0x293   : > { %v1912_v44 = vadd.f32 %v9368_v37, %v1864_v20  ;;  %v9371_v45 = vadd.f32 %v9370_v32, %v9369_v39 }
 0x295   : > { %v1944_v50 = vmul.f32 %v1938_v38, %v1912_v44  ;;  %v1915_v51 = vadd.f32 %v9371_v45, %v1867_v21  ;;  %v10494_v44 = vld [vmem:[%s14051_s7 + $0x1a8] sm:$0xff]  }
 0x297   : > { %v1947_v55 = vmul.f32 %v1938_v38, %v1915_v51  ;;  %v9372_v57 = vpop.f32.mrb[28].mxu0  ;;  %v1970_v58 = vadd.f32 %v1964_v46, %v1944_v50  ;;  %v10497_v51 = vld [vmem:[%s14051_s7 + $0x1f0] sm:$0xff]  }
 0x298   : > { %v9373_v59 = vpop.f32.mrb[29].mxu0 }
 0x299   : > { %v9374_v61 = vadd.f32 %v9373_v59, %v9372_v57  ;;  %v9375_v62 = vpop.f32.mrb[30].mxu0  ;;  %v1973_v63 = vadd.f32 %v1964_v46, %v1947_v55  ;;  %v1979_v2 = vmax.f32 %v1970_v58, 0.0  ;;  %v10499_v55 = vld [vmem:[%s14051_s7 + $0x78] sm:$0xff]  }
 0x29a   : > { %v9376_v0 = vpop.f32.mrb[31].mxu0  ;;  %v10500_v59 = vld [vmem:[%s14051_s7 + $0x38] sm:$0xff]  }
 0x29b   : > { %v1920_v1 = vadd.f32 %v9374_v61, %v1872_v29  ;;  %v1982_v3 = vmax.f32 %v1973_v63, 0.0  ;;  %v10490_v29 = vld [vmem:[%s14051_s7 + $0x1a0] sm:$0xff]   ;;  %v10501_v61 = vld [vmem:[%s14051_s7 + $0x1f8] sm:$0xff]  }
 0x29c   : > { %9453 = vmatpush3.bf16.msra.mxu1 %v10490_v29  ;;  %v10502_v62 = vld [vmem:[%s14051_s7 + $0x1b8] sm:$0xff]   ;;  %v10503_v63 = vld [vmem:[%s14051_s7 + $0xc0] sm:$0xff]  }
 0x29d   : > { %v1950_v4 = vmul.f32 %v1938_v38, %v1920_v1  ;;  %v11850_v5 = vpack.c.bf16 %v1982_v3, %v1979_v2  ;;  %v10492_v38 = vld [vmem:[%s14051_s7 + $0x28] sm:$0xff]   ;;  %9454 = vmatprep.subr.bf16.mxu1 %v10493_v52  ;;  %v10505_v1 = vld [vmem:[%s14051_s7 + $0x2c0] sm:$0xff]  }
 0x29e   : > { %9389 = vmatpush3.bf16.msra.mxu0 %v10492_v38 }
 0x29f   : > { %2002 = vrot.lane.b32.xlu1 %v11850_v5, %s11122_s25  ;;  %v11854_v7 = vadd.f32 %v1964_v46, %v1950_v4  ;;  %v10495_v46 = vld [vmem:[%s14051_s7 + $0x70] sm:$0xff]  }
 0x2a0   : > { %9455 = vmatpush3.bf16.msra.mxu1 %v10494_v44  ;;  %9390 = vmatprep.subr.bf16.mxu0 %v10495_v46 }
 0x2a1   : > { %v1985_v50 = vmax.f32 %v11854_v7, 0.0  ;;  %9456 = vmatprep.subr.bf16.mxu1 %v10497_v51 }
 0x2a2   : > { %9391 = vmatpush3.bf16.msra.mxu0 %v10496_v49 }
 0x2a3   : > { %v1991_v60 = vpack.c.bf16 %v1985_v50, %v1985_v50  ;;  %9392 = vmatprep.subr.bf16.mxu0 %v10499_v55 }
 0x2a4   : > { %9457 = vmatpush3.bf16.msra.mxu1 %v10498_v54 }
 0x2a5   : > { %9458 = vmatprep.subr.bf16.mxu1 %v10501_v61 }
 0x2a6   : > { %9393 = vmatpush3.bf16.msra.mxu0 %v10500_v59 }
 0x2a7   : > { %9400 = vmatprep.subr.bf16.mxu0 %v10503_v63 }
 0x2a8   : > { %9459 = vmatpush3.bf16.msra.mxu1 %v10502_v62 }
 0x2a9   : > { %9488 = vmatprep.subr.bf16.mxu1 %v10505_v1 }
 0x2cf   : > { %v1764_v12 = vpop.f32.mrb[0].mxu1 }
 0x2d0   : > { %v1942_v15 = vmul.f32 %v1930_v6, %v1764_v12  ;;  %v1766_v16 = vpop.f32.mrb[1].mxu1 }
 0x2d1   : > { %v1943_v25 = vmul.f32 %v1934_v8, %v1766_v16  ;;  %v1768_v18 = vpop.f32.mrb[2].mxu1 }
 0x2d2   : > { %v1968_v28 = vadd.f32 %v1956_v10, %v1942_v15  ;;  %v1945_v56 = vmul.f32 %v1930_v6, %v1768_v18  ;;  %v1770_v20 = vpop.f32.mrb[3].mxu1 }
 0x2d3   : > { %v1969_v21 = vadd.f32 %v1960_v13, %v1943_v25  ;;  %v1946_v33 = vmul.f32 %v1934_v8, %v1770_v20 }
 0x2d4   : > { %v1971_v23 = vadd.f32 %v1956_v10, %v1945_v56  ;;  %v1977_v30 = vmax.f32 %v1968_v28, 0.0 }
 0x2d5   : > { %v1972_v27 = vadd.f32 %v1960_v13, %v1946_v33  ;;  %v1978_v35 = vmax.f32 %v1969_v21, 0.0 }
 0x2d6   : > { %v1980_v31 = vmax.f32 %v1971_v23, 0.0 }
 0x2d7   : > { %v1981_v36 = vmax.f32 %v1972_v27, 0.0  ;;  %v1774_v37 = vpop.f32.mrb[4].mxu1 }
 0x2d8   : > { %v1948_v39 = vmul.f32 %v1930_v6, %v1774_v37  ;;  %v1776_v40 = vpop.f32.mrb[5].mxu1  ;;  %v1986_v24 = vpack.c.bf16 %v1980_v31, %v1977_v30 }
 0x2d9   : > { %v1949_v32 = vmul.f32 %v1934_v8, %v1776_v40  ;;  %v1778_v42 = vpop.f32.mrb[6].mxu1  ;;  %v1987_v43 = vpack.c.bf16 %v1981_v36, %v1978_v35 }
 0x2da   : > { %1998 = vrot.lane.b32.xlu0 %v1986_v24, %s11122_s25  ;;  %v1779_v45 = vpop.f32.mrb[7].mxu1  ;;  %v1974_v47 = vadd.f32 %v1956_v10, %v1948_v39 }
 0x2db   : > { %v1975_v48 = vadd.f32 %v1960_v13, %v1949_v32 }
 0x2dc   : > { %v1983_v57 = vmax.f32 %v1974_v47, 0.0 }
 0x2dd   : > { %v1984_v53 = vmax.f32 %v1975_v48, 0.0 }
 0x2de   : > { %2000 = vrot.lane.b32.xlu0 %v1987_v43, %s11122_s25  ;;  %v1989_v0 = vpack.c.bf16 %v1983_v57, %v1983_v57  ;;  %v10504_v57 = vld [vmem:[%s14051_s7 + $0x80] sm:$0xff]  }
 0x2df   : > { %v1990_v58 = vpack.c.bf16 %v1984_v53, %v1984_v53 }
 0x2e1   : > { %2006 = vrot.lane.b32.xlu1 %v1990_v58, %s11122_s25 }
 0x2e2   : > { %2008 = vrot.lane.b32.xlu0 %v1991_v60, %s11122_s25 }
 0x2e5   : > { %2004 = vrot.lane.b32.xlu1 %v1989_v0, %s11122_s25 }
 0x311   : > { %v2003_v2 = vpop.permute.xlu1 %2002 }
 0x34c   : > { %v1999_v3 = vpop.permute.xlu0 %1998 }
 0x34d   : > { %v2022_v4 = vsel %vm2010_vm6, %v2003_v2, %v1999_v3 }
 0x34e   : > { %v2030_v7 = vmax.bf16 %v2022_v4, %v11850_v5 }
 0x350   : > { %v2001_v6 = vpop.permute.xlu0 %2000  ;;  %v2061_v12 = vshll.u32 %v2030_v7, 16  ;;  %v2059_v41 = vshrl.u32 %v2030_v7, 16 }
 0x351   : > { %v2011_v8 = vsel %vm2010_vm6, %v1999_v3, %v2001_v6  ;;  %v2012_v9 = vsel %vm2010_vm6, %v2001_v6, %v2003_v2  ;;  %v10506_v6 = vld [vmem:[%s14051_s7 + $0x280] sm:$0xff]  }
 0x352   : > { %v2028_v10 = vmax.bf16 %v2011_v8, %v1986_v24  ;;  %v2029_v11 = vmax.bf16 %v2012_v9, %v1987_v43  ;;  %v2063_v18 = vrot.slane %v2061_v12, 1  ;;  %v2087_v31 = vrot.slane %v2061_v12, 5  ;;  %v10508_v9 = vld [vmem:[%s14051_s7 + $0x88] sm:$0xff]  }
 0x353   : > { %v2007_v13 = vpop.permute.xlu1 %2006 }
 0x354   : > { %v2009_v14 = vpop.permute.xlu0 %2008  ;;  %v2037_v15 = vshll.u32 %v2028_v10, 16  ;;  %v2049_v16 = vshll.u32 %v2029_v11, 16  ;;  %v2047_v28 = vshrl.u32 %v2029_v11, 16  ;;  %v2064_v30 = vor.u32 %v2063_v18, %v2059_v41  ;;  %v10513_v41 = vld [vmem:[%s14051_s7 + $0x2d0] sm:$0xff]  }
 0x355   : > { %v2014_v17 = vsel %vm2010_vm6, %v2007_v13, %v2009_v14  ;;  %v2035_v34 = vshrl.u32 %v2028_v10, 16 }
 0x356   : > { %v2032_v25 = vmax.bf16 %v2014_v17, %v1990_v58  ;;  %v2051_v19 = vrot.slane %v2049_v16, 1  ;;  %v2039_v21 = vrot.slane %v2037_v15, 1  ;;  %v2086_v37 = vrot.slane %v2049_v16, 5 }
 0x357   : > { %v2005_v5 = vpop.permute.xlu1 %2004  ;;  %v2085_v43 = vrot.slane %v2037_v15, 5  ;;  %v10511_v15 = vld [vmem:[%s14051_s7 + $0xd0] sm:$0xff]  }
 0x358   : > { %v2054_v56 = vshll.u32 %v2032_v25, 16  ;;  %v2013_v20 = vsel %vm2010_vm6, %v2005_v5, %v2007_v13  ;;  %v2026_v33 = vsel %vm2010_vm6, %v2009_v14, %v2005_v5  ;;  %v2052_v23 = vor.u32 %v2051_v19, %v2047_v28  ;;  %v10509_v14 = vld [vmem:[%s14051_s7 + $0x2c8] sm:$0xff]  }
 0x359   : > { %v2031_v22 = vmax.bf16 %v2013_v20, %v1989_v0  ;;  %v2073_v27 = vshrl.u32 %v2032_v25, 16  ;;  %v2033_v29 = vmax.bf16 %v2026_v33, %v1991_v60  ;;  %v2040_v24 = vor.u32 %v2039_v21, %v2035_v34  ;;  %v10507_v60 = vld [vmem:[%s14051_s7 + $0xc8] sm:$0xff]   ;;  %v10512_v20 = vld [vmem:[%s14051_s7 + $0x90] sm:$0xff]  }
 0x35a   : > { %v2056_v26 = vrot.slane %v2054_v56, 1  ;;  %v10510_v19 = vld [vmem:[%s14051_s7 + $0x288] sm:$0xff]  }
 0x35b   : > { %v2042_v36 = vshll.u32 %v2031_v22, 16  ;;  %v2066_v40 = vshll.u32 %v2033_v29, 16  ;;  %v2070_v42 = vshrl.u32 %v2031_v22, 16  ;;  %v2076_v46 = vshrl.u32 %v2033_v29, 16 }
 0x35c   : > { %v2057_v38 = vsel %vm399_vm0, %v2052_v23, %v2056_v26  ;;  %v2075_v39 = vor.u32 %v2073_v27, %v2056_v26  ;;  %v10515_v26 = vld [vmem:[%s14051_s7 + $0xd8] sm:$0xff]  }
 0x35d   : > { %v11949_v52 = vmax.bf16 %v2057_v38, %v2029_v11  ;;  %v2044_v32 = vrot.slane %v2042_v36, 1  ;;  %v2068_v45 = vrot.slane %v2066_v40, 1  ;;  %v10514_v38 = vld [vmem:[%s14051_s7 + $0x290] sm:$0xff]  }
 0x35e   : > { %v2095_v44 = vsel %vm11944_vm10, %v2075_v39, %v2086_v37 }
 0x35f   : > { %v11953_v47 = vmax.bf16 %v2095_v44, %v2032_v25  ;;  %v2045_v48 = vsel %vm399_vm0, %v2040_v24, %v2044_v32  ;;  %v2072_v49 = vor.u32 %v2070_v42, %v2044_v32  ;;  %v2105_v50 = vsel %vm2103_vm9, %v11949_v52, 0  ;;  %v10516_v42 = vld [vmem:[%s14051_s7 + $0x98] sm:$0xff]  }
 0x360   : > { %v2069_v51 = vsel %vm399_vm0, %v2064_v30, %v2068_v45  ;;  %v2078_v53 = vor.u32 %v2076_v46, %v2068_v45  ;;  %v11959_v54 = vmax.bf16 %v2045_v48, %v2028_v10  ;;  %6955 = vmatprep.mubr.bf16.mxu0 %v2105_v50  ;;  %v2121_v55 = vrot.slane %v11949_v52, 1 }
 0x361   : > { %v2094_v58 = vsel %vm11944_vm10, %v2072_v49, %v2085_v43  ;;  %v11967_v59 = vmax.bf16 %v2069_v51, %v2030_v7  ;;  %v2112_v61 = vshrl.u32 %v11949_v52, 16  ;;  %v2157_v62 = vrot.slane %v11949_v52, 3  ;;  %v10517_v43 = vld [vmem:[%s14051_s7 + $0x2d8] sm:$0xff]   ;;  %v10519_v49 = vld [vmem:[%s14051_s7 + $0xe0] sm:$0xff]  }
 0x362   : > { %v2096_v63 = vsel %vm11944_vm10, %v2078_v53, %v2087_v31  ;;  %v11976_v0 = vmax.bf16 %v2094_v58, %v2031_v22  ;;  %v2122_v1 = vsel %vm2103_vm9, %v2121_v55, 0  ;;  %v2104_v2 = vsel %vm2103_vm9, %v11959_v54, 0 }
 0x363   : > { %v11981_v3 = vmax.bf16 %v2096_v63, %v2033_v29  ;;  %7075 = vmatprep.mubr.bf16.mxu1 %v2122_v1  ;;  %6956 = vmatmul.mubr.bf16.vlgmr.msra.gmra.mrb[32].mxu0 %v2104_v2  ;;  %v2108_v4 = vshrl.u32 %v11959_v54, 16  ;;  %v14057_v7 = vrot.slane %v11959_v54, 1  ;;  %v2123_v8 = vrot.slane %v11967_v59, 1 }
 0x364   : > { %9401 = vmatpush3.bf16.msra.mxu0 %v10504_v57  ;;  %v2137_v10 = vrot.slane %v11959_v54, 2  ;;  %v12004_v16 = vsel %vm2103_vm9, %v2112_v61, 0  ;;  %v12008_v17 = vsel %vm2103_vm9, %v11967_v59, 0  ;;  %v2141_v5 = vrot.slane %v11967_v59, 2 }
 0x365   : > { %v2110_v11 = vsel %vm2103_vm9, %v2108_v4, 0  ;;  %v2120_v12 = vsel %vm2103_vm9, %v14057_v7, 0  ;;  %9402 = vmatprep.subr.bf16.mxu0 %v10507_v60  ;;  %v2134_v13 = vshrl.u32 %v2123_v8, 16  ;;  %v12017_v28 = vsel %vm2103_vm9, %v2157_v62, 0 }
 0x366   : > { %6995 = vmatprep.mubr.bf16.mxu0 %v2110_v11  ;;  %7076 = vmatmul.mubr.bf16.vlgmr.msra.gmra.mrb[8].mxu1 %v2120_v12  ;;  %v12020_v56 = vsel %vm2103_vm9, %v2123_v8, 0  ;;  %v12028_v21 = vshrl.u32 %v2121_v55, 16  ;;  %v12030_v33 = vshrl.u32 %v2137_v10, 16  ;;  %v2139_v22 = vrot.slane %v11949_v52, 2  ;;  %v10521_v8 = vld [vmem:[%s14051_s7 + $0x2e0] sm:$0xff]  }
 0x367   : > { %9489 = vmatpush3.bf16.msra.mxu1 %v10506_v6  ;;  %v2136_v18 = vsel %vm2103_vm9, %v2134_v13, 0  ;;  %v2155_v23 = vrot.slane %v11959_v54, 3  ;;  %v12038_v27 = vsel %vm2103_vm9, %v2141_v5, 0  ;;  %v2159_v29 = vrot.slane %v11967_v59, 3  ;;  %v10520_v6 = vld [vmem:[%s14051_s7 + $0xa0] sm:$0xff]   ;;  %v10523_v13 = vld [vmem:[%s14051_s7 + $0xe8] sm:$0xff]  }
 0x368   : > { %9403 = vmatpush3.bf16.msra.mxu0 %v10508_v9  ;;  %7155 = vmatprep.mubr.bf16.mxu1 %v2136_v18  ;;  %v12042_v30 = vsel %vm2103_vm9, %v2137_v10, 0  ;;  %v2152_v31 = vshrl.u32 %v2141_v5, 16  ;;  %v12045_v34 = vsel %vm2103_vm9, %v2139_v22, 0  ;;  %v2166_v36 = vshrl.u32 %v2157_v62, 16  ;;  %v10518_v62 = vld [vmem:[%s14051_s7 + $0x298] sm:$0xff]  }
 0x369   : > { %9490 = vmatprep.subr.bf16.mxu1 %v10509_v14  ;;  %9404 = vmatprep.subr.bf16.mxu0 %v10511_v15  ;;  %v12048_v35 = vsel %vm2103_vm9, %v2155_v23, 0  ;;  %v2173_v37 = vrot.slane %v11959_v54, 4  ;;  %v2170_v39 = vshrl.u32 %v2159_v29, 16  ;;  %v2148_v24 = vshrl.u32 %v2139_v22, 16 }
 0x36a   : > { %v12055_v40 = vsel %vm2103_vm9, %v2152_v31, 0  ;;  %v2162_v32 = vshrl.u32 %v2155_v23, 16  ;;  %v12064_v44 = vsel %vm2103_vm9, %v2166_v36, 0  ;;  %v2177_v46 = vrot.slane %v11967_v59, 4  ;;  %v10522_v23 = vld [vmem:[%s14051_s7 + $0x2a0] sm:$0xff]  }
 0x36b   : > { %9491 = vmatpush3.bf16.msra.mxu1 %v10510_v19  ;;  %v2180_v45 = vshrl.u32 %v2173_v37, 16  ;;  %v2193_v48 = vrot.slane %v11949_v52, 5  ;;  %v12072_v50 = vsel %vm2103_vm9, %v2170_v39, 0  ;;  %v12075_v51 = vsel %vm2103_vm9, %v2148_v24, 0 }
 0x36c   : > { %9405 = vmatpush3.bf16.msra.mxu0 %v10512_v20  ;;  %9492 = vmatprep.subr.bf16.mxu1 %v10513_v41  ;;  %v12078_v53 = vsel %vm2103_vm9, %v2162_v32, 0  ;;  %v12081_v55 = vsel %vm2103_vm9, %v2159_v29, 0  ;;  %v12087_v58 = vsel %vm2103_vm9, %v2177_v46, 0  ;;  %v2175_v61 = vrot.slane %v11949_v52, 4 }
 0x36d   : > { %9406 = vmatprep.subr.bf16.mxu0 %v10515_v26  ;;  %v12084_v57 = vsel %vm2103_vm9, %v2180_v45, 0  ;;  %v12090_v60 = vsel %vm2103_vm9, %v2193_v48, 0  ;;  %v2191_v63 = vrot.slane %v11959_v54, 5  ;;  %v2195_v1 = vrot.slane %v11967_v59, 5 }
 0x36e   : > { %v12099_v2 = vsel %vm2103_vm9, %v2173_v37, 0  ;;  %v2188_v4 = vshrl.u32 %v2177_v46, 16  ;;  %v12108_v9 = vsel %vm2103_vm9, %v2175_v61, 0  ;;  %v2202_v10 = vshrl.u32 %v2193_v48, 16  ;;  %v10524_v37 = vld [vmem:[%s14051_s7 + $0xa8] sm:$0xff]  }
 0x36f   : > { %9493 = vmatpush3.bf16.msra.mxu1 %v10514_v38  ;;  %v2209_v11 = vrot.slane %v11959_v54, 6  ;;  %v2184_v12 = vshrl.u32 %v2175_v61, 16  ;;  %v12115_v14 = vsel %vm2103_vm9, %v2191_v63, 0  ;;  %v2206_v15 = vshrl.u32 %v2195_v1, 16  ;;  %v10525_v38 = vld [vmem:[%s14051_s7 + $0x2e8] sm:$0xff]  }
 0x370   : > { %9407 = vmatpush3.bf16.msra.mxu0 %v10516_v42  ;;  %9494 = vmatprep.subr.bf16.mxu1 %v10517_v43  ;;  %v12118_v18 = vsel %vm2103_vm9, %v2188_v4, 0  ;;  %v2198_v19 = vshrl.u32 %v2191_v63, 16  ;;  %v12121_v5 = vsel %vm2103_vm9, %v2202_v10, 0  ;;  %v2213_v22 = vrot.slane %v11967_v59, 6  ;;  %v10527_v43 = vld [vmem:[%s14051_s7 + $0xf0] sm:$0xff]  }
 0x371   : > { %9408 = vmatprep.subr.bf16.mxu0 %v10519_v49  ;;  %v2216_v20 = vshrl.u32 %v2209_v11, 16  ;;  %v12124_v41 = vsel %vm2103_vm9, %v2184_v12, 0  ;;  %v12131_v26 = vsel %vm2103_vm9, %v2206_v15, 0  ;;  %v2229_v31 = vrot.slane %v11949_v52, 7  ;;  %v10529_v12 = vld [vmem:[%s14051_s7 + $0x2f0] sm:$0xff]  }
 0x372   : > { %v12134_v29 = vsel %vm2103_vm9, %v2198_v19, 0  ;;  %v12138_v36 = vsel %vm2103_vm9, %v2195_v1, 0  ;;  %v12150_v24 = vsel %vm2103_vm9, %v2213_v22, 0  ;;  %v2211_v32 = vrot.slane %v11949_v52, 6  ;;  %v10526_v1 = vld [vmem:[%s14051_s7 + $0x2a8] sm:$0xff]  }
 0x373   : > { %9495 = vmatpush3.bf16.msra.mxu1 %v10518_v62  ;;  %v12147_v39 = vsel %vm2103_vm9, %v2216_v20, 0  ;;  %v2227_v42 = vrot.slane %v11959_v54, 7  ;;  %v12158_v45 = vsel %vm2103_vm9, %v2229_v31, 0  ;;  %v2231_v46 = vrot.slane %v11967_v59, 7 }
 0x374   : > { %9409 = vmatpush3.bf16.msra.mxu0 %v10520_v6  ;;  %9496 = vmatprep.subr.bf16.mxu1 %v10521_v8  ;;  %v12162_v48 = vsel %vm2103_vm9, %v2209_v11, 0  ;;  %v2224_v49 = vshrl.u32 %v2213_v22, 16  ;;  %v12165_v61 = vsel %vm2103_vm9, %v2211_v32, 0  ;;  %v2238_v62 = vshrl.u32 %v2229_v31, 16  ;;  %v10528_v11 = vld [vmem:[%s14051_s7 + $0xb0] sm:$0xff]   ;;  %v10531_v22 = vld [vmem:[%s14051_s7 + $0xf8] sm:$0xff]  }
 0x375   : > { %9410 = vmatprep.subr.bf16.mxu0 %v10523_v13  ;;  %v12168_v52 = vsel %vm2103_vm9, %v2227_v42, 0  ;;  %v2249_v63 = vshrl.u32 %v11976_v0, 16  ;;  %v2242_v4 = vshrl.u32 %v2231_v46, 16  ;;  %v2220_v8 = vshrl.u32 %v2211_v32, 16 }
 0x376   : > { %v12175_v6 = vsel %vm2103_vm9, %v2224_v49, 0  ;;  %v2234_v10 = vshrl.u32 %v2227_v42, 16  ;;  %v12184_v13 = vsel %vm2103_vm9, %v2238_v62, 0  ;;  %v12191_v19 = vsel %vm2103_vm9, %v11981_v3, 0  ;;  %v10530_v62 = vld [vmem:[%s14051_s7 + $0x2b0] sm:$0xff]  }
 0x377   : > { %9497 = vmatpush3.bf16.msra.mxu1 %v10522_v23  ;;  %v12187_v15 = vsel %vm2103_vm9, %v2249_v63, 0  ;;  %14064 = vst [vmem:[#allocation7_spill] sm:$0xff] %v12191_v19  ;;  %v2262_v20 = vrot.slane %v11953_v47, 1  ;;  %v12198_v23 = vsel %vm2103_vm9, %v2242_v4, 0  ;;  %v12201_v31 = vsel %vm2103_vm9, %v2220_v8, 0 }
 0x378   : > { %9411 = vmatpush3.bf16.msra.mxu0 %v10524_v37  ;;  %9498 = vmatprep.subr.bf16.mxu1 %v10525_v38  ;;  %v12204_v37 = vsel %vm2103_vm9, %v2234_v10, 0  ;;  %v12207_v38 = vsel %vm2103_vm9, %v2231_v46, 0  ;;  %v12214_v42 = vsel %vm2103_vm9, %v11953_v47, 0  ;;  %v2264_v49 = vrot.slane %v11981_v3, 1  ;;  %v10532_v10 = vld [vmem:[%s14051_s7 + $0xb8] sm:$0xff]  }
 0x379   : > { %9412 = vmatprep.subr.bf16.mxu0 %v10527_v43  ;;  %14065 = vst [vmem:[#allocation8_spill] sm:$0xff] %v12207_v38  ;;  %v12210_v32 = vsel %vm2103_vm9, %v2262_v20, 0  ;;  %14067 = vst [vmem:[#allocation10_spill] sm:$0xff] %v12214_v42  ;;  %v2260_v43 = vrot.slane %v11976_v0, 1  ;;  %v12223_v46 = vsel %vm2103_vm9, %v11976_v0, 0  ;;  %v2257_v63 = vshrl.u32 %v11981_v3, 16 }
 0x37a   : > { %14066 = vst [vmem:[#allocation9_spill] sm:$0xff] %v12210_v32  ;;  %14068 = vst [vmem:[#allocation11_spill] sm:$0xff] %v12223_v46  ;;  %v2271_v4 = vshrl.u32 %v2262_v20, 16  ;;  %v2278_v8 = vrot.slane %v11976_v0, 2  ;;  %v2275_v25 = vshrl.u32 %v2264_v49, 16  ;;  %v2253_v46 = vshrl.u32 %v11953_v47, 16 }
 0x37b   : > { %9499 = vmatpush3.bf16.msra.mxu1 %v10526_v1  ;;  %v10533_v1 = vld [vmem:[%s14051_s7 + $0x2f8] sm:$0xff]   ;;  %v12234_v7 = vsel %vm2103_vm9, %v2260_v43, 0  ;;  %v2267_v42 = vshrl.u32 %v2260_v43, 16  ;;  %v2282_v32 = vrot.slane %v11981_v3, 2  ;;  %v2298_v43 = vrot.slane %v11953_v47, 3 }
 0x37c   : > { %9413 = vmatpush3.bf16.msra.mxu0 %v10528_v11  ;;  %9500 = vmatprep.subr.bf16.mxu1 %v10529_v12  ;;  %14069 = vst [vmem:[#allocation12_spill] sm:$0xff] %v12234_v7  ;;  %v10535_v11 = vld [vmem:[%s14051_s7 + $0x140] sm:$0xff]   ;;  %v12241_v12 = vsel %vm2103_vm9, %v2257_v63, 0  ;;  %v12244_v20 = vsel %vm2103_vm9, %v2271_v4, 0  ;;  %v2285_v38 = vshrl.u32 %v2278_v8, 16  ;;  %v12248_v7 = vsel %vm2103_vm9, %v2275_v25, 0 }
 0x37d   : > { %9414 = vmatprep.subr.bf16.mxu0 %v10531_v22  ;;  %14070 = vst [vmem:[#allocation13_spill] sm:$0xff] %v12244_v20  ;;  %v12251_v19 = vsel %vm2103_vm9, %v2253_v46, 0  ;;  %v12254_v22 = vsel %vm2103_vm9, %v2267_v42, 0  ;;  %v10534_v63 = vld [vmem:[%s14051_s7 + $0x2b8] sm:$0xff]   ;;  %v12264_v20 = vsel %vm2103_vm9, %v2282_v32, 0  ;;  %v12267_v25 = vsel %vm2103_vm9, %v2264_v49, 0 }
 0x37e   : > { %14071 = vst [vmem:[#allocation14_spill] sm:$0xff] %v12251_v19  ;;  %14072 = vst [vmem:[#allocation15_spill] sm:$0xff] %v12254_v22  ;;  %v12261_v4 = vsel %vm2103_vm9, %v2285_v38, 0  ;;  %v2280_v46 = vrot.slane %v11953_v47, 2  ;;  %v10536_v42 = vld [vmem:[%s14051_s7 + $0x100] sm:$0xff]   ;;  %v2296_v38 = vrot.slane %v11976_v0, 3 }
 0x37f   : > { %9501 = vmatpush3.bf16.msra.mxu1 %v10530_v62  ;;  %14073 = vst [vmem:[#allocation16_spill] sm:$0xff] %v12264_v20  ;;  %14074 = vst [vmem:[#allocation17_spill] sm:$0xff] %v12267_v25  ;;  %v12274_v62 = vsel %vm2103_vm9, %v2298_v43, 0  ;;  %v2300_v22 = vrot.slane %v11981_v3, 3  ;;  %v12279_v20 = vsel %vm2103_vm9, %v2278_v8, 0  ;;  %v10537_v47 = vld [vmem:[%s14051_s7 + $0x3c0] sm:$0xff]  }
 0x380   : > { %9415 = vmatpush3.bf16.msra.mxu0 %v10532_v10  ;;  %9502 = vmatprep.subr.bf16.mxu1 %v10533_v1  ;;  %14075 = vst [vmem:[#allocation18_spill] sm:$0xff] %v12274_v62  ;;  %14076 = vst [vmem:[#allocation19_spill] sm:$0xff] %v12279_v20  ;;  %v10539_v49 = vld [vmem:[%s14051_s7 + $0x148] sm:$0xff]   ;;  %v12288_v10 = vsel %vm2103_vm9, %v2280_v46, 0  ;;  %v2293_v1 = vshrl.u32 %v2282_v32, 16  ;;  %v2307_v25 = vshrl.u32 %v2298_v43, 16 }
 0x381   : > { %9422 = vmatprep.subr.bf16.mxu0 %v10535_v11  ;;  %v2289_v0 = vshrl.u32 %v2280_v46, 16  ;;  %v12291_v3 = vsel %vm2103_vm9, %v2296_v38, 0  ;;  %v2311_v8 = vshrl.u32 %v2300_v22, 16  ;;  %v2303_v20 = vshrl.u32 %v2296_v38, 16  ;;  %v10538_v32 = vld [vmem:[%s14051_s7 + $0x380] sm:$0xff]   ;;  %v10545_v38 = vld [vmem:[%s14051_s7 + $0x3d0] sm:$0xff]  }
 0x382   : > { %v12294_v11 = vsel %vm2103_vm9, %v2300_v22, 0  ;;  %v14077_v62 = vshrl.u32 %v11967_v59, 16  ;;  %v12304_v43 = vsel %vm2103_vm9, %v2293_v1, 0  ;;  %v12307_v46 = vsel %vm2103_vm9, %v2307_v25, 0  ;;  %v10540_v59 = vld [vmem:[%s14051_s7 + $0x108] sm:$0xff]   ;;  %v10549_v1 = vld [vmem:[%s14051_s7 + $0x3d8] sm:$0xff]  }
 0x383   : > { %9503 = vmatpush3.bf16.msra.mxu1 %v10534_v63  ;;  %6996 = vmatmul.mubr.bf16.vlgmr.msra.gmra.mrb[36].mxu0 %v12008_v17  ;;  %v12310_v22 = vsel %vm2103_vm9, %v2289_v0, 0  ;;  %v10541_v17 = vld [vmem:[%s14051_s7 + $0x3c8] sm:$0xff]   ;;  %v12319_v63 = vsel %vm2103_vm9, %v2311_v8, 0  ;;  %v2132_v25 = vsel %vm2103_vm9, %v12028_v21, 0  ;;  %v10544_v21 = vld [vmem:[%s14051_s7 + $0x110] sm:$0xff]   ;;  %v10551_v0 = vld [vmem:[%s14051_s7 + $0x160] sm:$0xff]  }
 0x384   : > { %v2118_v19 = vsel %vm2103_vm9, %v14077_v62, 0  ;;  %9423 = vmatpush3.bf16.msra.mxu0 %v10536_v42  ;;  %v12322_v62 = vsel %vm2103_vm9, %v2303_v20, 0  ;;  %9532 = vmatprep.subr.bf16.mxu1 %v10537_v47  ;;  %v2146_v42 = vsel %vm2103_vm9, %v12030_v33, 0  ;;  %v10542_v20 = vld [vmem:[%s14051_s7 + $0x388] sm:$0xff]   ;;  %v10547_v33 = vld [vmem:[%s14051_s7 + $0x158] sm:$0xff]   ;;  %v10546_v47 = vld [vmem:[%s14051_s7 + $0x390] sm:$0xff]  }
 0x385   : > { %7035 = vmatprep.mubr.bf16.mxu0 %v2118_v19  ;;  %9424 = vmatprep.subr.bf16.mxu0 %v10539_v49  ;;  %v10543_v19 = vld [vmem:[%s14051_s7 + $0x150] sm:$0xff]   ;;  %v10548_v49 = vld [vmem:[%s14051_s7 + $0x118] sm:$0xff]  }
 0x386   : > { %7156 = vmatmul.mubr.bf16.vlgmr.msra.gmra.mrb[12].mxu1 %v2132_v25  ;;  %v10550_v8 = vld [vmem:[%s14051_s7 + $0x398] sm:$0xff]   ;;  %v10554_v25 = vld [vmem:[%s14051_s7 + $0x3a0] sm:$0xff]  }
 0x387   : > { %9533 = vmatpush3.bf16.msra.mxu1 %v10538_v32  ;;  %7235 = vmatprep.mubr.bf16.mxu1 %v2146_v42  ;;  %v10552_v32 = vld [vmem:[%s14051_s7 + $0x120] sm:$0xff]   ;;  %v10557_v42 = vld [vmem:[%s14051_s7 + $0x3e8] sm:$0xff]  }
 0x388   : > { %9425 = vmatpush3.bf16.msra.mxu0 %v10540_v59  ;;  %9534 = vmatprep.subr.bf16.mxu1 %v10541_v17  ;;  %v10553_v59 = vld [vmem:[%s14051_s7 + $0x3e0] sm:$0xff]   ;;  %v10555_v17 = vld [vmem:[%s14051_s7 + $0x168] sm:$0xff]  }
 0x389   : > { %9426 = vmatprep.subr.bf16.mxu0 %v10543_v19  ;;  %v10556_v19 = vld [vmem:[%s14051_s7 + $0x128] sm:$0xff]  }
 0x38b   : > { %9535 = vmatpush3.bf16.msra.mxu1 %v10542_v20  ;;  %v10559_v20 = vld [vmem:[%s14051_s7 + $0x170] sm:$0xff]  }
 0x38c   : > { %9427 = vmatpush3.bf16.msra.mxu0 %v10544_v21  ;;  %9536 = vmatprep.subr.bf16.mxu1 %v10545_v38  ;;  %v10558_v21 = vld [vmem:[%s14051_s7 + $0x3a8] sm:$0xff]   ;;  %v10560_v38 = vld [vmem:[%s14051_s7 + $0x130] sm:$0xff]  }
 0x38d   : > { %9428 = vmatprep.subr.bf16.mxu0 %v10547_v33  ;;  %v10561_v33 = vld [vmem:[%s14051_s7 + $0x3f0] sm:$0xff]  }
 0x38f   : > { %9537 = vmatpush3.bf16.msra.mxu1 %v10546_v47  ;;  %v10563_v47 = vld [vmem:[%s14051_s7 + $0x178] sm:$0xff]  }
 0x390   : > { %9429 = vmatpush3.bf16.msra.mxu0 %v10548_v49  ;;  %9538 = vmatprep.subr.bf16.mxu1 %v10549_v1  ;;  %v10562_v49 = vld [vmem:[%s14051_s7 + $0x3b0] sm:$0xff]   ;;  %v10564_v1 = vld [vmem:[%s14051_s7 + $0x138] sm:$0xff]  }
 0x391   : > { %9430 = vmatprep.subr.bf16.mxu0 %v10551_v0  ;;  %v10565_v0 = vld [vmem:[%s14051_s7 + $0x3f8] sm:$0xff]  }
 0x393   : > { %9539 = vmatpush3.bf16.msra.mxu1 %v10550_v8  ;;  %v10567_v8 = vld [vmem:[%s14051_s7 + $0x240] sm:$0xff]  }
 0x394   : > { %9431 = vmatpush3.bf16.msra.mxu0 %v10552_v32  ;;  %9540 = vmatprep.subr.bf16.mxu1 %v10553_v59  ;;  %v10566_v32 = vld [vmem:[%s14051_s7 + $0x3b8] sm:$0xff]   ;;  %v14078_v59 = vrot.slane %v11959_v54, 1 }
 0x395   : > { %9432 = vmatprep.subr.bf16.mxu0 %v10555_v17 }
 0x396   : > { %v2126_v17 = vshrl.u32 %v14078_v59, 16  ;;  %v10584_v59 = vld [vmem:[%s14051_s7 + $0x220] sm:$0xff]  }
 0x397   : > { %9541 = vmatpush3.bf16.msra.mxu1 %v10554_v25  ;;  %v10568_v25 = vld [vmem:[%s14051_s7 + $0x200] sm:$0xff]  }
 0x398   : > { %9433 = vmatpush3.bf16.msra.mxu0 %v10556_v19  ;;  %9542 = vmatprep.subr.bf16.mxu1 %v10557_v42  ;;  %v10569_v19 = vld [vmem:[%s14051_s7 + $0x4c0] sm:$0xff]   ;;  %v10571_v42 = vld [vmem:[%s14051_s7 + $0x248] sm:$0xff]   ;;  %v2128_v54 = vsel %vm2103_vm9, %v2126_v17, 0 }
 0x399   : > { %9434 = vmatprep.subr.bf16.mxu0 %v10559_v20  ;;  %v10570_v20 = vld [vmem:[%s14051_s7 + $0x480] sm:$0xff]  }
 0x39a   : > { %v10585_v17 = vld [vmem:[%s14051_s7 + $0x4e0] sm:$0xff]  }
 0x39b   : > { %9543 = vmatpush3.bf16.msra.mxu1 %v10558_v21  ;;  %v10572_v21 = vld [vmem:[%s14051_s7 + $0x208] sm:$0xff]  }
 0x39c   : > { %9435 = vmatpush3.bf16.msra.mxu0 %v10560_v38  ;;  %9544 = vmatprep.subr.bf16.mxu1 %v10561_v33  ;;  %v10573_v38 = vld [vmem:[%s14051_s7 + $0x4c8] sm:$0xff]  }
 0x39d   : > { %9436 = vmatprep.subr.bf16.mxu0 %v10563_v47  ;;  %v10574_v33 = vld [vmem:[%s14051_s7 + $0x488] sm:$0xff]   ;;  %v10576_v47 = vld [vmem:[%s14051_s7 + $0x210] sm:$0xff]  }
 0x39f   : > { %9545 = vmatpush3.bf16.msra.mxu1 %v10562_v49  ;;  %v10577_v49 = vld [vmem:[%s14051_s7 + $0x4d0] sm:$0xff]  }
 0x3a0   : > { %9437 = vmatpush3.bf16.msra.mxu0 %v10564_v1  ;;  %9546 = vmatprep.subr.bf16.mxu1 %v10565_v0  ;;  %v10580_v1 = vld [vmem:[%s14051_s7 + $0x218] sm:$0xff]  }
 0x3a1   : > { %9466 = vmatprep.subr.bf16.mxu0 %v10567_v8  ;;  %v10581_v0 = vld [vmem:[%s14051_s7 + $0x4d8] sm:$0xff]   ;;  %v10583_v8 = vld [vmem:[%s14051_s7 + $0x260] sm:$0xff]  }
 0x3a3   : > { %9547 = vmatpush3.bf16.msra.mxu1 %v10566_v32  ;;  %7036 = vmatmul.mubr.bf16.vlgmr.msra.gmra.mrb[40].mxu0 %v12004_v16  ;;  %v10575_v16 = vld [vmem:[%s14051_s7 + $0x250] sm:$0xff]   ;;  %v10582_v32 = vld [vmem:[%s14051_s7 + $0x498] sm:$0xff]  }
 0x3a4   : > { %9467 = vmatpush3.bf16.msra.mxu0 %v10568_v25  ;;  %7115 = vmatprep.mubr.bf16.mxu0 %v2128_v54  ;;  %v10587_v25 = vld [vmem:[%s14051_s7 + $0x268] sm:$0xff]  }
 0x3a5   : > { %9576 = vmatprep.subr.bf16.mxu1 %v10569_v19  ;;  %9468 = vmatprep.subr.bf16.mxu0 %v10571_v42  ;;  %v10586_v19 = vld [vmem:[%s14051_s7 + $0x4a0] sm:$0xff]   ;;  %v10588_v42 = vld [vmem:[%s14051_s7 + $0x228] sm:$0xff]  }
 0x3a6   : > { %7236 = vmatmul.mubr.bf16.vlgmr.msra.gmra.mrb[16].mxu1 %v12038_v27  ;;  %v10579_v27 = vld [vmem:[%s14051_s7 + $0x258] sm:$0xff]   ;;  %v10589_v54 = vld [vmem:[%s14051_s7 + $0x4e8] sm:$0xff]  }
 0x3a7   : > { %9577 = vmatpush3.bf16.msra.mxu1 %v10570_v20  ;;  %7315 = vmatprep.mubr.bf16.mxu1 %v12017_v28  ;;  %v10578_v28 = vld [vmem:[%s14051_s7 + $0x490] sm:$0xff]  }
 0x3a8   : > { %9469 = vmatpush3.bf16.msra.mxu0 %v10572_v21  ;;  %9578 = vmatprep.subr.bf16.mxu1 %v10573_v38  ;;  %v10591_v20 = vld [vmem:[%s14051_s7 + $0x270] sm:$0xff]   ;;  %v10590_v21 = vld [vmem:[%s14051_s7 + $0x4a8] sm:$0xff]  }
 0x3a9   : > { %9470 = vmatprep.subr.bf16.mxu0 %v10575_v16  ;;  %v10592_v38 = vld [vmem:[%s14051_s7 + $0x230] sm:$0xff]  }
 0x3aa   : > { %v10593_v16 = vld [vmem:[%s14051_s7 + $0x4f0] sm:$0xff]  }
 0x3ab   : > { %9579 = vmatpush3.bf16.msra.mxu1 %v10574_v33  ;;  %v10595_v33 = vld [vmem:[%s14051_s7 + $0x278] sm:$0xff]  }
 0x3ac   : > { %9471 = vmatpush3.bf16.msra.mxu0 %v10576_v47  ;;  %9580 = vmatprep.subr.bf16.mxu1 %v10577_v49  ;;  %v10594_v47 = vld [vmem:[%s14051_s7 + $0x4b0] sm:$0xff]   ;;  %v10596_v49 = vld [vmem:[%s14051_s7 + $0x238] sm:$0xff]  }
 0x3ad   : > { %9472 = vmatprep.subr.bf16.mxu0 %v10579_v27  ;;  %v10597_v27 = vld [vmem:[%s14051_s7 + $0x4f8] sm:$0xff]  }
 0x3af   : > { %9581 = vmatpush3.bf16.msra.mxu1 %v10578_v28  ;;  %v10599_v28 = vld [vmem:[%s14051_s7 + $0x340] sm:$0xff]  }
 0x3b0   : > { %9473 = vmatpush3.bf16.msra.mxu0 %v10580_v1  ;;  %9582 = vmatprep.subr.bf16.mxu1 %v10581_v0  ;;  %v10598_v1 = vld [vmem:[%s14051_s7 + $0x4b8] sm:$0xff]   ;;  %v10600_v0 = vld [vmem:[%s14051_s7 + $0x300] sm:$0xff]  }
 0x3b1   : > { %9474 = vmatprep.subr.bf16.mxu0 %v10583_v8  ;;  %v10601_v8 = vld [vmem:[%s14051_s7 + $0x5c0] sm:$0xff]  }
 0x3b3   : > { %9583 = vmatpush3.bf16.msra.mxu1 %v10582_v32  ;;  %v10603_v32 = vld [vmem:[%s14051_s7 + $0x348] sm:$0xff]  }
 0x3b4   : > { %9475 = vmatpush3.bf16.msra.mxu0 %v10584_v59  ;;  %9584 = vmatprep.subr.bf16.mxu1 %v10585_v17  ;;  %v10602_v59 = vld [vmem:[%s14051_s7 + $0x580] sm:$0xff]   ;;  %v10604_v17 = vld [vmem:[%s14051_s7 + $0x308] sm:$0xff]  }
 0x3b5   : > { %9476 = vmatprep.subr.bf16.mxu0 %v10587_v25  ;;  %v10605_v25 = vld [vmem:[%s14051_s7 + $0x5c8] sm:$0xff]  }
 0x3b7   : > { %9585 = vmatpush3.bf16.msra.mxu1 %v10586_v19  ;;  %v10608_v19 = vld [vmem:[%s14051_s7 + $0x310] sm:$0xff]  }
 0x3b8   : > { %9477 = vmatpush3.bf16.msra.mxu0 %v10588_v42  ;;  %9586 = vmatprep.subr.bf16.mxu1 %v10589_v54  ;;  %v10609_v42 = vld [vmem:[%s14051_s7 + $0x5d0] sm:$0xff]   ;;  %v10612_v54 = vld [vmem:[%s14051_s7 + $0x318] sm:$0xff]  }
 0x3b9   : > { %9478 = vmatprep.subr.bf16.mxu0 %v10591_v20  ;;  %v10613_v20 = vld [vmem:[%s14051_s7 + $0x5d8] sm:$0xff]  }
 0x3bb   : > { %9587 = vmatpush3.bf16.msra.mxu1 %v10590_v21  ;;  %v10615_v21 = vld [vmem:[%s14051_s7 + $0x360] sm:$0xff]  }
 0x3bc   : > { %9479 = vmatpush3.bf16.msra.mxu0 %v10592_v38  ;;  %9588 = vmatprep.subr.bf16.mxu1 %v10593_v16  ;;  %v10614_v38 = vld [vmem:[%s14051_s7 + $0x598] sm:$0xff]   ;;  %v10616_v16 = vld [vmem:[%s14051_s7 + $0x320] sm:$0xff]  }
 0x3bd   : > { %9480 = vmatprep.subr.bf16.mxu0 %v10595_v33  ;;  %v10617_v33 = vld [vmem:[%s14051_s7 + $0x5e0] sm:$0xff]  }
 0x3bf   : > { %9589 = vmatpush3.bf16.msra.mxu1 %v10594_v47  ;;  %v10619_v47 = vld [vmem:[%s14051_s7 + $0x368] sm:$0xff]  }
 0x3c0   : > { %9481 = vmatpush3.bf16.msra.mxu0 %v10596_v49  ;;  %9590 = vmatprep.subr.bf16.mxu1 %v10597_v27  ;;  %v10618_v49 = vld [vmem:[%s14051_s7 + $0x5a0] sm:$0xff]   ;;  %v10620_v27 = vld [vmem:[%s14051_s7 + $0x328] sm:$0xff]  }
 0x3c1   : > { %9510 = vmatprep.subr.bf16.mxu0 %v10599_v28  ;;  %v10621_v28 = vld [vmem:[%s14051_s7 + $0x5e8] sm:$0xff]  }
 0x3c3   : > { %9591 = vmatpush3.bf16.msra.mxu1 %v10598_v1  ;;  %7116 = vmatmul.mubr.bf16.vlgmr.msra.gmra.mrb[44].mxu0 %v12020_v56  ;;  %v10607_v56 = vld [vmem:[%s14051_s7 + $0x350] sm:$0xff]  }
 0x3c4   : > { %9511 = vmatpush3.bf16.msra.mxu0 %v10600_v0  ;;  %7195 = vmatprep.mubr.bf16.mxu0 %v12045_v34  ;;  %v10606_v34 = vld [vmem:[%s14051_s7 + $0x588] sm:$0xff]   ;;  %v10623_v1 = vld [vmem:[%s14051_s7 + $0x370] sm:$0xff]  }
 0x3c5   : > { %9620 = vmatprep.subr.bf16.mxu1 %v10601_v8  ;;  %9512 = vmatprep.subr.bf16.mxu0 %v10603_v32  ;;  %v10622_v0 = vld [vmem:[%s14051_s7 + $0x5a8] sm:$0xff]   ;;  %v10624_v8 = vld [vmem:[%s14051_s7 + $0x330] sm:$0xff]  }
 0x3c6   : > { %7316 = vmatmul.mubr.bf16.vlgmr.msra.gmra.mrb[20].mxu1 %v12048_v35  ;;  %v10611_v35 = vld [vmem:[%s14051_s7 + $0x358] sm:$0xff]   ;;  %v10625_v32 = vld [vmem:[%s14051_s7 + $0x5f0] sm:$0xff]  }
 0x3c7   : > { %9621 = vmatpush3.bf16.msra.mxu1 %v10602_v59  ;;  %7395 = vmatprep.mubr.bf16.mxu1 %v12072_v50  ;;  %v10610_v50 = vld [vmem:[%s14051_s7 + $0x590] sm:$0xff]   ;;  %v10627_v59 = vld [vmem:[%s14051_s7 + $0x378] sm:$0xff]  }
 0x3c8   : > { %9513 = vmatpush3.bf16.msra.mxu0 %v10604_v17  ;;  %9622 = vmatprep.subr.bf16.mxu1 %v10605_v25  ;;  %v10626_v17 = vld [vmem:[%s14051_s7 + $0x5b0] sm:$0xff]   ;;  %v10628_v25 = vld [vmem:[%s14051_s7 + $0x338] sm:$0xff]  }
 0x3c9   : > { %9514 = vmatprep.subr.bf16.mxu0 %v10607_v56  ;;  %v10629_v56 = vld [vmem:[%s14051_s7 + $0x5f8] sm:$0xff]  }
 0x3cb   : > { %9623 = vmatpush3.bf16.msra.mxu1 %v10606_v34  ;;  %v10631_v34 = vld [vmem:[%s14051_s7 + $0x440] sm:$0xff]  }
 0x3cc   : > { %9515 = vmatpush3.bf16.msra.mxu0 %v10608_v19  ;;  %9624 = vmatprep.subr.bf16.mxu1 %v10609_v42  ;;  %v10630_v19 = vld [vmem:[%s14051_s7 + $0x5b8] sm:$0xff]   ;;  %v10632_v42 = vld [vmem:[%s14051_s7 + $0x400] sm:$0xff]  }
 0x3cd   : > { %9516 = vmatprep.subr.bf16.mxu0 %v10611_v35  ;;  %v10633_v35 = vld [vmem:[%s14051_s7 + $0x6c0] sm:$0xff]  }
 0x3cf   : > { %9625 = vmatpush3.bf16.msra.mxu1 %v10610_v50  ;;  %v10635_v50 = vld [vmem:[%s14051_s7 + $0x448] sm:$0xff]  }
 0x3d0   : > { %9517 = vmatpush3.bf16.msra.mxu0 %v10612_v54  ;;  %9626 = vmatprep.subr.bf16.mxu1 %v10613_v20  ;;  %v10634_v54 = vld [vmem:[%s14051_s7 + $0x680] sm:$0xff]   ;;  %v10636_v20 = vld [vmem:[%s14051_s7 + $0x408] sm:$0xff]  }
 0x3d1   : > { %9518 = vmatprep.subr.bf16.mxu0 %v10615_v21  ;;  %v10637_v21 = vld [vmem:[%s14051_s7 + $0x6c8] sm:$0xff]  }
 0x3d3   : > { %9627 = vmatpush3.bf16.msra.mxu1 %v10614_v38  ;;  %v10640_v38 = vld [vmem:[%s14051_s7 + $0x410] sm:$0xff]  }
 0x3d4   : > { %9519 = vmatpush3.bf16.msra.mxu0 %v10616_v16  ;;  %9628 = vmatprep.subr.bf16.mxu1 %v10617_v33  ;;  %v10641_v16 = vld [vmem:[%s14051_s7 + $0x6d0] sm:$0xff]   ;;  %v10644_v33 = vld [vmem:[%s14051_s7 + $0x418] sm:$0xff]  }
 0x3d5   : > { %9520 = vmatprep.subr.bf16.mxu0 %v10619_v47  ;;  %v10645_v47 = vld [vmem:[%s14051_s7 + $0x6d8] sm:$0xff]  }
 0x3d7   : > { %9629 = vmatpush3.bf16.msra.mxu1 %v10618_v49  ;;  %v10647_v49 = vld [vmem:[%s14051_s7 + $0x460] sm:$0xff]  }
 0x3d8   : > { %9521 = vmatpush3.bf16.msra.mxu0 %v10620_v27  ;;  %9630 = vmatprep.subr.bf16.mxu1 %v10621_v28  ;;  %v10646_v27 = vld [vmem:[%s14051_s7 + $0x698] sm:$0xff]   ;;  %v10648_v28 = vld [vmem:[%s14051_s7 + $0x420] sm:$0xff]  }
 0x3d9   : > { %9522 = vmatprep.subr.bf16.mxu0 %v10623_v1  ;;  %v10649_v1 = vld [vmem:[%s14051_s7 + $0x6e0] sm:$0xff]  }
 0x3db   : > { %9631 = vmatpush3.bf16.msra.mxu1 %v10622_v0  ;;  %v10651_v0 = vld [vmem:[%s14051_s7 + $0x468] sm:$0xff]  }
 0x3dc   : > { %9523 = vmatpush3.bf16.msra.mxu0 %v10624_v8  ;;  %9632 = vmatprep.subr.bf16.mxu1 %v10625_v32  ;;  %v10650_v8 = vld [vmem:[%s14051_s7 + $0x6a0] sm:$0xff]   ;;  %v10652_v32 = vld [vmem:[%s14051_s7 + $0x428] sm:$0xff]  }
 0x3dd   : > { %9524 = vmatprep.subr.bf16.mxu0 %v10627_v59  ;;  %v10653_v59 = vld [vmem:[%s14051_s7 + $0x6e8] sm:$0xff]  }
 0x3df   : > { %9633 = vmatpush3.bf16.msra.mxu1 %v10626_v17  ;;  %v10655_v17 = vld [vmem:[%s14051_s7 + $0x470] sm:$0xff]  }
 0x3e0   : > { %9525 = vmatpush3.bf16.msra.mxu0 %v10628_v25  ;;  %9634 = vmatprep.subr.bf16.mxu1 %v10629_v56  ;;  %v10654_v25 = vld [vmem:[%s14051_s7 + $0x6a8] sm:$0xff]   ;;  %v10656_v56 = vld [vmem:[%s14051_s7 + $0x430] sm:$0xff]  }
 0x3e1   : > { %9554 = vmatprep.subr.bf16.mxu0 %v10631_v34  ;;  %v10657_v34 = vld [vmem:[%s14051_s7 + $0x6f0] sm:$0xff]  }
 0x3e3   : > { %9635 = vmatpush3.bf16.msra.mxu1 %v10630_v19  ;;  %7196 = vmatmul.mubr.bf16.vlgmr.msra.gmra.mrb[48].mxu0 %v12042_v30  ;;  %v10639_v30 = vld [vmem:[%s14051_s7 + $0x450] sm:$0xff]   ;;  %v10659_v19 = vld [vmem:[%s14051_s7 + $0x478] sm:$0xff]  }
 0x3e4   : > { %9555 = vmatpush3.bf16.msra.mxu0 %v10632_v42  ;;  %7275 = vmatprep.mubr.bf16.mxu0 %v12055_v40  ;;  %v10638_v40 = vld [vmem:[%s14051_s7 + $0x688] sm:$0xff]   ;;  %v10658_v42 = vld [vmem:[%s14051_s7 + $0x6b0] sm:$0xff]  }
 0x3e5   : > { %9664 = vmatprep.subr.bf16.mxu1 %v10633_v35  ;;  %9556 = vmatprep.subr.bf16.mxu0 %v10635_v50  ;;  %v10660_v35 = vld [vmem:[%s14051_s7 + $0x438] sm:$0xff]  }
 0x3e6   : > { %7396 = vmatmul.mubr.bf16.vlgmr.msra.gmra.mrb[24].mxu1 %v12064_v44  ;;  %v10643_v44 = vld [vmem:[%s14051_s7 + $0x458] sm:$0xff]  }
 0x3e7   : > { %9665 = vmatpush3.bf16.msra.mxu1 %v10634_v54  ;;  %7475 = vmatprep.mubr.bf16.mxu1 %v12084_v57  ;;  %v10642_v57 = vld [vmem:[%s14051_s7 + $0x690] sm:$0xff]   ;;  %v10661_v50 = vld [vmem:[%s14051_s7 + $0x6f8] sm:$0xff]   ;;  %v10663_v54 = vld [vmem:[%s14051_s7 + $0x540] sm:$0xff]  }
 0x3e8   : > { %9557 = vmatpush3.bf16.msra.mxu0 %v10636_v20  ;;  %9666 = vmatprep.subr.bf16.mxu1 %v10637_v21  ;;  %v10662_v20 = vld [vmem:[%s14051_s7 + $0x6b8] sm:$0xff]   ;;  %v10664_v21 = vld [vmem:[%s14051_s7 + $0x500] sm:$0xff]  }
 0x3e9   : > { %9558 = vmatprep.subr.bf16.mxu0 %v10639_v30  ;;  %v10665_v30 = vld [vmem:[%s14051_s7 + $0x7c0] sm:$0xff]  }
 0x3eb   : > { %9667 = vmatpush3.bf16.msra.mxu1 %v10638_v40  ;;  %v10667_v40 = vld [vmem:[%s14051_s7 + $0x548] sm:$0xff]  }
 0x3ec   : > { %9559 = vmatpush3.bf16.msra.mxu0 %v10640_v38  ;;  %9668 = vmatprep.subr.bf16.mxu1 %v10641_v16  ;;  %v10666_v38 = vld [vmem:[%s14051_s7 + $0x780] sm:$0xff]   ;;  %v10668_v16 = vld [vmem:[%s14051_s7 + $0x508] sm:$0xff]  }
 0x3ed   : > { %9560 = vmatprep.subr.bf16.mxu0 %v10643_v44  ;;  %v10669_v44 = vld [vmem:[%s14051_s7 + $0x7c8] sm:$0xff]  }
 0x3ef   : > { %9669 = vmatpush3.bf16.msra.mxu1 %v10642_v57  ;;  %v10672_v57 = vld [vmem:[%s14051_s7 + $0x510] sm:$0xff]  }
 0x3f0   : > { %9561 = vmatpush3.bf16.msra.mxu0 %v10644_v33  ;;  %9670 = vmatprep.subr.bf16.mxu1 %v10645_v47  ;;  %v10673_v33 = vld [vmem:[%s14051_s7 + $0x7d0] sm:$0xff]   ;;  %v10676_v47 = vld [vmem:[%s14051_s7 + $0x518] sm:$0xff]  }
 0x3f1   : > { %9562 = vmatprep.subr.bf16.mxu0 %v10647_v49  ;;  %v10677_v49 = vld [vmem:[%s14051_s7 + $0x7d8] sm:$0xff]  }
 0x3f3   : > { %9671 = vmatpush3.bf16.msra.mxu1 %v10646_v27  ;;  %v10679_v27 = vld [vmem:[%s14051_s7 + $0x560] sm:$0xff]  }
 0x3f4   : > { %9563 = vmatpush3.bf16.msra.mxu0 %v10648_v28  ;;  %9672 = vmatprep.subr.bf16.mxu1 %v10649_v1  ;;  %v10678_v28 = vld [vmem:[%s14051_s7 + $0x798] sm:$0xff]   ;;  %v10680_v1 = vld [vmem:[%s14051_s7 + $0x520] sm:$0xff]  }
 0x3f5   : > { %9564 = vmatprep.subr.bf16.mxu0 %v10651_v0  ;;  %v10681_v0 = vld [vmem:[%s14051_s7 + $0x7e0] sm:$0xff]  }
 0x3f7   : > { %9673 = vmatpush3.bf16.msra.mxu1 %v10650_v8  ;;  %v10683_v8 = vld [vmem:[%s14051_s7 + $0x568] sm:$0xff]  }
 0x3f8   : > { %9565 = vmatpush3.bf16.msra.mxu0 %v10652_v32  ;;  %9674 = vmatprep.subr.bf16.mxu1 %v10653_v59  ;;  %v10682_v32 = vld [vmem:[%s14051_s7 + $0x7a0] sm:$0xff]   ;;  %v10684_v59 = vld [vmem:[%s14051_s7 + $0x528] sm:$0xff]  }
 0x3f9   : > { %9566 = vmatprep.subr.bf16.mxu0 %v10655_v17  ;;  %v10685_v17 = vld [vmem:[%s14051_s7 + $0x7e8] sm:$0xff]  }
 0x3fb   : > { %9675 = vmatpush3.bf16.msra.mxu1 %v10654_v25  ;;  %v10687_v25 = vld [vmem:[%s14051_s7 + $0x570] sm:$0xff]  }
 0x3fc   : > { %9567 = vmatpush3.bf16.msra.mxu0 %v10656_v56  ;;  %9676 = vmatprep.subr.bf16.mxu1 %v10657_v34  ;;  %v10686_v56 = vld [vmem:[%s14051_s7 + $0x7a8] sm:$0xff]   ;;  %v10688_v34 = vld [vmem:[%s14051_s7 + $0x530] sm:$0xff]  }
 0x3fd   : > { %9568 = vmatprep.subr.bf16.mxu0 %v10659_v19  ;;  %v10689_v19 = vld [vmem:[%s14051_s7 + $0x7f0] sm:$0xff]  }
 0x3ff   : > { %9677 = vmatpush3.bf16.msra.mxu1 %v10658_v42  ;;  %v10691_v42 = vld [vmem:[%s14051_s7 + $0x578] sm:$0xff]  }
 0x400   : > { %9569 = vmatpush3.bf16.msra.mxu0 %v10660_v35  ;;  %9678 = vmatprep.subr.bf16.mxu1 %v10661_v50  ;;  %v10690_v35 = vld [vmem:[%s14051_s7 + $0x7b0] sm:$0xff]   ;;  %v10692_v50 = vld [vmem:[%s14051_s7 + $0x538] sm:$0xff]  }
 0x401   : > { %9598 = vmatprep.subr.bf16.mxu0 %v10663_v54  ;;  %v10693_v54 = vld [vmem:[%s14051_s7 + $0x7f8] sm:$0xff]  }
 0x403   : > { %9679 = vmatpush3.bf16.msra.mxu1 %v10662_v20  ;;  %7276 = vmatmul.mubr.bf16.vlgmr.msra.gmra.mrb[52].mxu0 %v12075_v51  ;;  %v10671_v51 = vld [vmem:[%s14051_s7 + $0x550] sm:$0xff]   ;;  %v10695_v20 = vld [vmem:[%s14051_s7 + $0x640] sm:$0xff]  }
 0x404   : > { %9599 = vmatpush3.bf16.msra.mxu0 %v10664_v21  ;;  %7355 = vmatprep.mubr.bf16.mxu0 %v12078_v53  ;;  %v10670_v53 = vld [vmem:[%s14051_s7 + $0x788] sm:$0xff]   ;;  %v10694_v21 = vld [vmem:[%s14051_s7 + $0x7b8] sm:$0xff]  }
 0x405   : > { %9708 = vmatprep.subr.bf16.mxu1 %v10665_v30  ;;  %9600 = vmatprep.subr.bf16.mxu0 %v10667_v40  ;;  %v10696_v30 = vld [vmem:[%s14051_s7 + $0x600] sm:$0xff]  }
 0x406   : > { %7476 = vmatmul.mubr.bf16.vlgmr.msra.gmra.mrb[28].mxu1 %v12087_v58  ;;  %v10675_v58 = vld [vmem:[%s14051_s7 + $0x558] sm:$0xff]   ;;  %v10697_v40 = vld [vmem:[%s14051_s7 + $0x8c0] sm:$0xff]  }
 0x407   : > { %9709 = vmatpush3.bf16.msra.mxu1 %v10666_v38  ;;  %7555 = vmatprep.mubr.bf16.mxu1 %v12090_v60  ;;  %v10674_v60 = vld [vmem:[%s14051_s7 + $0x790] sm:$0xff]   ;;  %v10699_v38 = vld [vmem:[%s14051_s7 + $0x648] sm:$0xff]  }
 0x408   : > { %9601 = vmatpush3.bf16.msra.mxu0 %v10668_v16  ;;  %9710 = vmatprep.subr.bf16.mxu1 %v10669_v44  ;;  %v10698_v16 = vld [vmem:[%s14051_s7 + $0x880] sm:$0xff]   ;;  %v10700_v44 = vld [vmem:[%s14051_s7 + $0x608] sm:$0xff]  }
 0x409   : > { %9602 = vmatprep.subr.bf16.mxu0 %v10671_v51  ;;  %v10701_v51 = vld [vmem:[%s14051_s7 + $0x8c8] sm:$0xff]  }
 0x40b   : > { %9711 = vmatpush3.bf16.msra.mxu1 %v10670_v53  ;;  %v10704_v53 = vld [vmem:[%s14051_s7 + $0x610] sm:$0xff]  }
 0x40c   : > { %9603 = vmatpush3.bf16.msra.mxu0 %v10672_v57  ;;  %9712 = vmatprep.subr.bf16.mxu1 %v10673_v33  ;;  %v10705_v57 = vld [vmem:[%s14051_s7 + $0x8d0] sm:$0xff]   ;;  %v10708_v33 = vld [vmem:[%s14051_s7 + $0x618] sm:$0xff]  }
 0x40d   : > { %9604 = vmatprep.subr.bf16.mxu0 %v10675_v58  ;;  %v10709_v58 = vld [vmem:[%s14051_s7 + $0x8d8] sm:$0xff]  }
 0x40f   : > { %9713 = vmatpush3.bf16.msra.mxu1 %v10674_v60  ;;  %v10711_v60 = vld [vmem:[%s14051_s7 + $0x660] sm:$0xff]  }
 0x410   : > { %9605 = vmatpush3.bf16.msra.mxu0 %v10676_v47  ;;  %9714 = vmatprep.subr.bf16.mxu1 %v10677_v49  ;;  %v10710_v47 = vld [vmem:[%s14051_s7 + $0x898] sm:$0xff]   ;;  %v10712_v49 = vld [vmem:[%s14051_s7 + $0x620] sm:$0xff]  }
 0x411   : > { %9606 = vmatprep.subr.bf16.mxu0 %v10679_v27  ;;  %v10713_v27 = vld [vmem:[%s14051_s7 + $0x8e0] sm:$0xff]  }
 0x413   : > { %9715 = vmatpush3.bf16.msra.mxu1 %v10678_v28  ;;  %v10715_v28 = vld [vmem:[%s14051_s7 + $0x668] sm:$0xff]  }
 0x414   : > { %9607 = vmatpush3.bf16.msra.mxu0 %v10680_v1  ;;  %9716 = vmatprep.subr.bf16.mxu1 %v10681_v0  ;;  %v10714_v1 = vld [vmem:[%s14051_s7 + $0x8a0] sm:$0xff]   ;;  %v10716_v0 = vld [vmem:[%s14051_s7 + $0x628] sm:$0xff]  }
 0x415   : > { %9608 = vmatprep.subr.bf16.mxu0 %v10683_v8  ;;  %v10717_v8 = vld [vmem:[%s14051_s7 + $0x8e8] sm:$0xff]  }
 0x417   : > { %9717 = vmatpush3.bf16.msra.mxu1 %v10682_v32  ;;  %v10719_v32 = vld [vmem:[%s14051_s7 + $0x670] sm:$0xff]  }
 0x418   : > { %9609 = vmatpush3.bf16.msra.mxu0 %v10684_v59  ;;  %9718 = vmatprep.subr.bf16.mxu1 %v10685_v17 }
 0x419   : > { %9610 = vmatprep.subr.bf16.mxu0 %v10687_v25  ;;  %v10718_v25 = vld [vmem:[%s14051_s7 + $0x8a8] sm:$0xff]  }
 0x41b   : > { %9719 = vmatpush3.bf16.msra.mxu1 %v10686_v56 }
 0x41c   : > { %9611 = vmatpush3.bf16.msra.mxu0 %v10688_v34  ;;  %9720 = vmatprep.subr.bf16.mxu1 %v10689_v19  ;;  %v10720_v19 = vld [vmem:[%s14051_s7 + $0x630] sm:$0xff]  }
 0x41d   : > { %9612 = vmatprep.subr.bf16.mxu0 %v10691_v42  ;;  %v10721_v42 = vld [vmem:[%s14051_s7 + $0x8f0] sm:$0xff]  }
 0x41f   : > { %9721 = vmatpush3.bf16.msra.mxu1 %v10690_v35 }
 0x420   : > { %9613 = vmatpush3.bf16.msra.mxu0 %v10692_v50  ;;  %9722 = vmatprep.subr.bf16.mxu1 %v10693_v54  ;;  %v10723_v54 = vld [vmem:[%s14051_s7 + $0x678] sm:$0xff]  }
 0x421   : > { %9642 = vmatprep.subr.bf16.mxu0 %v10695_v20 }
 0x423   : > { %9723 = vmatpush3.bf16.msra.mxu1 %v10694_v21  ;;  %7356 = vmatmul.mubr.bf16.vlgmr.msra.gmra.mrb[56].mxu0 %v12081_v55  ;;  %v10703_v55 = vld [vmem:[%s14051_s7 + $0x650] sm:$0xff]  }
 0x424   : > { %9643 = vmatpush3.bf16.msra.mxu0 %v10696_v30  ;;  %7435 = vmatprep.mubr.bf16.mxu0 %v12108_v9  ;;  %v10702_v9 = vld [vmem:[%s14051_s7 + $0x888] sm:$0xff]  }
 0x425   : > { %9752 = vmatprep.subr.bf16.mxu1 %v10697_v40  ;;  %9644 = vmatprep.subr.bf16.mxu0 %v10699_v38  ;;  %v10722_v40 = vld [vmem:[%s14051_s7 + $0x8b0] sm:$0xff]  }
 0x426   : > { %7556 = vmatmul.mubr.bf16.vlgmr.msra.gmra.mrb[32].mxu1 %v12115_v14  ;;  %v10707_v14 = vld [vmem:[%s14051_s7 + $0x658] sm:$0xff]  }
 0x427   : > { %9753 = vmatpush3.bf16.msra.mxu1 %v10698_v16  ;;  %7635 = vmatprep.mubr.bf16.mxu1 %v12131_v26  ;;  %v10706_v26 = vld [vmem:[%s14051_s7 + $0x890] sm:$0xff]   ;;  %v10724_v16 = vld [vmem:[%s14051_s7 + $0x638] sm:$0xff]  }
 0x428   : > { %9645 = vmatpush3.bf16.msra.mxu0 %v10700_v44  ;;  %9754 = vmatprep.subr.bf16.mxu1 %v10701_v51  ;;  %v10725_v44 = vld [vmem:[%s14051_s7 + $0x8f8] sm:$0xff]   ;;  %v10727_v51 = vld [vmem:[%s14051_s7 + $0x740] sm:$0xff]  }
 0x429   : > { %9646 = vmatprep.subr.bf16.mxu0 %v10703_v55  ;;  %v10726_v55 = vld [vmem:[%s14051_s7 + $0x8b8] sm:$0xff]  }
 0x42b   : > { %9755 = vmatpush3.bf16.msra.mxu1 %v10702_v9  ;;  %v10728_v9 = vld [vmem:[%s14051_s7 + $0x700] sm:$0xff]  }
 0x42c   : > { %9647 = vmatpush3.bf16.msra.mxu0 %v10704_v53  ;;  %9756 = vmatprep.subr.bf16.mxu1 %v10705_v57  ;;  %v10729_v53 = vld [vmem:[%s14051_s7 + $0x9c0] sm:$0xff]   ;;  %v10731_v57 = vld [vmem:[%s14051_s7 + $0x748] sm:$0xff]  }
 0x42d   : > { %9648 = vmatprep.subr.bf16.mxu0 %v10707_v14  ;;  %v10730_v14 = vld [vmem:[%s14051_s7 + $0x980] sm:$0xff]  }
 0x42f   : > { %9757 = vmatpush3.bf16.msra.mxu1 %v10706_v26  ;;  %v10732_v26 = vld [vmem:[%s14051_s7 + $0x708] sm:$0xff]  }
 0x430   : > { %9649 = vmatpush3.bf16.msra.mxu0 %v10708_v33  ;;  %9758 = vmatprep.subr.bf16.mxu1 %v10709_v58  ;;  %v10733_v33 = vld [vmem:[%s14051_s7 + $0x9c8] sm:$0xff]   ;;  %v10736_v58 = vld [vmem:[%s14051_s7 + $0x710] sm:$0xff]  }
 0x431   : > { %9650 = vmatprep.subr.bf16.mxu0 %v10711_v60  ;;  %v10737_v60 = vld [vmem:[%s14051_s7 + $0x9d0] sm:$0xff]  }
 0x433   : > { %9759 = vmatpush3.bf16.msra.mxu1 %v10710_v47  ;;  %v10740_v47 = vld [vmem:[%s14051_s7 + $0x718] sm:$0xff]  }
 0x434   : > { %9651 = vmatpush3.bf16.msra.mxu0 %v10712_v49  ;;  %9760 = vmatprep.subr.bf16.mxu1 %v10713_v27  ;;  %v10741_v49 = vld [vmem:[%s14051_s7 + $0x9d8] sm:$0xff]   ;;  %v10743_v27 = vld [vmem:[%s14051_s7 + $0x760] sm:$0xff]  }
 0x435   : > { %9652 = vmatprep.subr.bf16.mxu0 %v10715_v28  ;;  %v10742_v28 = vld [vmem:[%s14051_s7 + $0x998] sm:$0xff]  }
 0x436   : > { %v9394_v59 = vpop.f32.mrb[32].mxu0 }
 0x437   : > { %9761 = vmatpush3.bf16.msra.mxu1 %v10714_v1  ;;  %v9395_v17 = vpop.f32.mrb[33].mxu0  ;;  %v10744_v1 = vld [vmem:[%s14051_s7 + $0x720] sm:$0xff]  }
 0x438   : > { %v12884_v56 = vadd.f32 %v9395_v17, %v9394_v59  ;;  %9653 = vmatpush3.bf16.msra.mxu0 %v10716_v0  ;;  %v9397_v34 = vpop.f32.mrb[34].mxu0  ;;  %9762 = vmatprep.subr.bf16.mxu1 %v10717_v8  ;;  %v10745_v0 = vld [vmem:[%s14051_s7 + $0x9e0] sm:$0xff]   ;;  %v10747_v8 = vld [vmem:[%s14051_s7 + $0x768] sm:$0xff]  }
 0x439   : > { %v9460_v35 = vpop.f32.mrb[8].mxu1  ;;  %v9398_v50 = vpop.f32.mrb[35].mxu0  ;;  %9654 = vmatprep.subr.bf16.mxu0 %v10719_v32  ;;  %v10746_v32 = vld [vmem:[%s14051_s7 + $0x9a0] sm:$0xff]   ;;  %v10748_v59 = vld [vmem:[%s14051_s7 + $0x728] sm:$0xff]   ;;  %v10751_v34 = vld [vmem:[%s14051_s7 + $0x770] sm:$0xff]  }
 0x43a   : > { %v9461_v20 = vpop.f32.mrb[9].mxu1  ;;  %v10749_v17 = vld [vmem:[%s14051_s7 + $0x9e8] sm:$0xff]  }
 0x43b   : > { %v12895_v21 = vadd.f32 %v9461_v20, %v9460_v35  ;;  %9763 = vmatpush3.bf16.msra.mxu1 %v10718_v25  ;;  %v9463_v30 = vpop.f32.mrb[10].mxu1  ;;  %v3466_v25 = vld [vmem:[%s14052_s8] sm:$0x1]  ;;  %v10750_v35 = vld [vmem:[%s14051_s7 + $0x9a8] sm:$0xff]  }
 0x43c   : > { %v9464_v38 = vpop.f32.mrb[11].mxu1  ;;  %9655 = vmatpush3.bf16.msra.mxu0 %v10720_v19  ;;  %9764 = vmatprep.subr.bf16.mxu1 %v10721_v42  ;;  %v6958_v50 = vadd.f32 %v12884_v56, %v3466_v25  ;;  %v10752_v30 = vld [vmem:[%s14051_s7 + $0x730] sm:$0xff]   ;;  %v10778_v25 = vld [vmem:[%s14051_s7 + $0xaa0] sm:$0xff]  }
 0x43d   : > { %9656 = vmatprep.subr.bf16.mxu0 %v10723_v54 }
 0x43f   : > { %9765 = vmatpush3.bf16.msra.mxu1 %v10722_v40  ;;  %v10753_v40 = vld [vmem:[%s14051_s7 + $0x9f0] sm:$0xff]  }
 0x440   : > { %9657 = vmatpush3.bf16.msra.mxu0 %v10724_v16  ;;  %9766 = vmatprep.subr.bf16.mxu1 %v10725_v44  ;;  %v10755_v44 = vld [vmem:[%s14051_s7 + $0x778] sm:$0xff]  }
 0x441   : > { %9686 = vmatprep.subr.bf16.mxu0 %v10727_v51 }
 0x443   : > { %9767 = vmatpush3.bf16.msra.mxu1 %v10726_v55  ;;  %7436 = vmatmul.mubr.bf16.vlgmr.msra.gmra.mrb[60].mxu0 %v12099_v2  ;;  %v10735_v2 = vld [vmem:[%s14051_s7 + $0x750] sm:$0xff]  }
 0x444   : > { %9687 = vmatpush3.bf16.msra.mxu0 %v10728_v9  ;;  %7515 = vmatprep.mubr.bf16.mxu0 %v12118_v18  ;;  %v10734_v18 = vld [vmem:[%s14051_s7 + $0x988] sm:$0xff]  }
 0x445   : > { %9796 = vmatprep.subr.bf16.mxu1 %v10729_v53  ;;  %9688 = vmatprep.subr.bf16.mxu0 %v10731_v57  ;;  %v10754_v53 = vld [vmem:[%s14051_s7 + $0x9b0] sm:$0xff]  }
 0x446   : > { %7636 = vmatmul.mubr.bf16.vlgmr.msra.gmra.mrb[36].mxu1 %v12121_v5  ;;  %v10739_v5 = vld [vmem:[%s14051_s7 + $0x758] sm:$0xff]  }
 0x447   : > { %9797 = vmatpush3.bf16.msra.mxu1 %v10730_v14  ;;  %7715 = vmatprep.mubr.bf16.mxu1 %v12147_v39  ;;  %v10738_v39 = vld [vmem:[%s14051_s7 + $0x990] sm:$0xff]   ;;  %v10756_v14 = vld [vmem:[%s14051_s7 + $0x738] sm:$0xff]  }
 0x448   : > { %9689 = vmatpush3.bf16.msra.mxu0 %v10732_v26  ;;  %9798 = vmatprep.subr.bf16.mxu1 %v10733_v33  ;;  %v10757_v26 = vld [vmem:[%s14051_s7 + $0x9f8] sm:$0xff]   ;;  %v10759_v33 = vld [vmem:[%s14051_s7 + $0x840] sm:$0xff]  }
 0x449   : > { %9690 = vmatprep.subr.bf16.mxu0 %v10735_v2  ;;  %v10758_v2 = vld [vmem:[%s14051_s7 + $0x9b8] sm:$0xff]  }
 0x44b   : > { %9799 = vmatpush3.bf16.msra.mxu1 %v10734_v18  ;;  %v10760_v18 = vld [vmem:[%s14051_s7 + $0x800] sm:$0xff]  }
 0x44c   : > { %9691 = vmatpush3.bf16.msra.mxu0 %v10736_v58  ;;  %9800 = vmatprep.subr.bf16.mxu1 %v10737_v60  ;;  %v10761_v58 = vld [vmem:[%s14051_s7 + $0xac0] sm:$0xff]   ;;  %v10763_v60 = vld [vmem:[%s14051_s7 + $0x848] sm:$0xff]  }
 0x44d   : > { %9692 = vmatprep.subr.bf16.mxu0 %v10739_v5  ;;  %v10762_v5 = vld [vmem:[%s14051_s7 + $0xa80] sm:$0xff]  }
 0x44f   : > { %9801 = vmatpush3.bf16.msra.mxu1 %v10738_v39  ;;  %v10764_v39 = vld [vmem:[%s14051_s7 + $0x808] sm:$0xff]  }
 0x450   : > { %9693 = vmatpush3.bf16.msra.mxu0 %v10740_v47  ;;  %9802 = vmatprep.subr.bf16.mxu1 %v10741_v49  ;;  %v10765_v47 = vld [vmem:[%s14051_s7 + $0xac8] sm:$0xff]   ;;  %v10768_v49 = vld [vmem:[%s14051_s7 + $0x810] sm:$0xff]  }
 0x451   : > { %9694 = vmatprep.subr.bf16.mxu0 %v10743_v27  ;;  %v10769_v27 = vld [vmem:[%s14051_s7 + $0xad0] sm:$0xff]  }
 0x453   : > { %9803 = vmatpush3.bf16.msra.mxu1 %v10742_v28  ;;  %v10772_v28 = vld [vmem:[%s14051_s7 + $0x818] sm:$0xff]  }
 0x454   : > { %9695 = vmatpush3.bf16.msra.mxu0 %v10744_v1  ;;  %9804 = vmatprep.subr.bf16.mxu1 %v10745_v0  ;;  %v10773_v1 = vld [vmem:[%s14051_s7 + $0xad8] sm:$0xff]   ;;  %v10775_v0 = vld [vmem:[%s14051_s7 + $0x860] sm:$0xff]  }
 0x455   : > { %9696 = vmatprep.subr.bf16.mxu0 %v10747_v8  ;;  %v10774_v8 = vld [vmem:[%s14051_s7 + $0xa98] sm:$0xff]  }
 0x456   : > { %v9416_v19 = vpop.f32.mrb[36].mxu0 }
 0x457   : > { %9805 = vmatpush3.bf16.msra.mxu1 %v10746_v32  ;;  %v9417_v42 = vpop.f32.mrb[37].mxu0  ;;  %v10776_v32 = vld [vmem:[%s14051_s7 + $0x820] sm:$0xff]  }
 0x458   : > { %v9418_v54 = vadd.f32 %v9417_v42, %v9416_v19  ;;  %v9419_v20 = vpop.f32.mrb[38].mxu0  ;;  %9697 = vmatpush3.bf16.msra.mxu0 %v10748_v59  ;;  %9806 = vmatprep.subr.bf16.mxu1 %v10749_v17  ;;  %v10777_v59 = vld [vmem:[%s14051_s7 + $0xae0] sm:$0xff]   ;;  %v10779_v17 = vld [vmem:[%s14051_s7 + $0x868] sm:$0xff]   ;;  %v10783_v42 = vld [vmem:[%s14051_s7 + $0x870] sm:$0xff]  }
 0x459   : > { %v9504_v38 = vpop.f32.mrb[12].mxu1  ;;  %v9420_v16 = vpop.f32.mrb[39].mxu0  ;;  %9698 = vmatprep.subr.bf16.mxu0 %v10751_v34  ;;  %v10780_v34 = vld [vmem:[%s14051_s7 + $0x828] sm:$0xff]  }
 0x45a   : > { %v13001_v56 = vadd.f32 %v9418_v54, %v6958_v50  ;;  %v9505_v51 = vpop.f32.mrb[13].mxu1  ;;  %v10781_v19 = vld [vmem:[%s14051_s7 + $0xae8] sm:$0xff]  }
 0x45b   : > { %v13003_v55 = vadd.f32 %v9505_v51, %v9504_v38  ;;  %v9507_v9 = vpop.f32.mrb[14].mxu1  ;;  %9807 = vmatpush3.bf16.msra.mxu1 %v10750_v35  ;;  %v10782_v54 = vld [vmem:[%s14051_s7 + $0xaa8] sm:$0xff]   ;;  %v10785_v38 = vld [vmem:[%s14051_s7 + $0xaf0] sm:$0xff]   ;;  %v10787_v51 = vld [vmem:[%s14051_s7 + $0x878] sm:$0xff]  }
 0x45c   : > { %v9508_v57 = vpop.f32.mrb[15].mxu1  ;;  %9699 = vmatpush3.bf16.msra.mxu0 %v10752_v30  ;;  %9808 = vmatprep.subr.bf16.mxu1 %v10753_v40  ;;  %v10784_v40 = vld [vmem:[%s14051_s7 + $0x830] sm:$0xff]  }
 0x45d   : > { %9700 = vmatprep.subr.bf16.mxu0 %v10755_v44 }
 0x45f   : > { %9809 = vmatpush3.bf16.msra.mxu1 %v10754_v53 }
 0x460   : > { %9701 = vmatpush3.bf16.msra.mxu0 %v10756_v14  ;;  %9810 = vmatprep.subr.bf16.mxu1 %v10757_v26  ;;  %v10786_v26 = vld [vmem:[%s14051_s7 + $0xab0] sm:$0xff]  }
 0x461   : > { %9730 = vmatprep.subr.bf16.mxu0 %v10759_v33 }
 0x463   : > { %9811 = vmatpush3.bf16.msra.mxu1 %v10758_v2  ;;  %7516 = vmatmul.mubr.bf16.vlgmr.msra.gmra.mrb[64].mxu0 %v12124_v41  ;;  %v10767_v41 = vld [vmem:[%s14051_s7 + $0x850] sm:$0xff]   ;;  %v10788_v2 = vld [vmem:[%s14051_s7 + $0x838] sm:$0xff]  }
 0x464   : > { %9731 = vmatpush3.bf16.msra.mxu0 %v10760_v18  ;;  %7595 = vmatprep.mubr.bf16.mxu0 %v12134_v29  ;;  %v10766_v29 = vld [vmem:[%s14051_s7 + $0xa88] sm:$0xff]  }
 0x465   : > { %9840 = vmatprep.subr.bf16.mxu1 %v10761_v58  ;;  %9732 = vmatprep.subr.bf16.mxu0 %v10763_v60  ;;  %v10791_v58 = vld [vmem:[%s14051_s7 + $0x940] sm:$0xff]   ;;  %v10790_v60 = vld [vmem:[%s14051_s7 + $0xab8] sm:$0xff]  }
 0x466   : > { %7716 = vmatmul.mubr.bf16.vlgmr.msra.gmra.mrb[40].mxu1 %v12150_v24  ;;  %v10771_v24 = vld [vmem:[%s14051_s7 + $0x858] sm:$0xff]  }
 0x467   : > { %9841 = vmatpush3.bf16.msra.mxu1 %v10762_v5  ;;  %7795 = vmatprep.mubr.bf16.mxu1 %v12158_v45  ;;  %v10770_v45 = vld [vmem:[%s14051_s7 + $0xa90] sm:$0xff]   ;;  %v10792_v5 = vld [vmem:[%s14051_s7 + $0x900] sm:$0xff]  }
 0x468   : > { %9733 = vmatpush3.bf16.msra.mxu0 %v10764_v39  ;;  %9842 = vmatprep.subr.bf16.mxu1 %v10765_v47  ;;  %v10795_v39 = vld [vmem:[%s14051_s7 + $0x948] sm:$0xff]   ;;  %v10794_v47 = vld [vmem:[%s14051_s7 + $0xb80] sm:$0xff]  }
 0x469   : > { %9734 = vmatprep.subr.bf16.mxu0 %v10767_v41  ;;  %v10796_v41 = vld [vmem:[%s14051_s7 + $0x908] sm:$0xff]  }
 0x46b   : > { %9843 = vmatpush3.bf16.msra.mxu1 %v10766_v29  ;;  %v10797_v29 = vld [vmem:[%s14051_s7 + $0xbc8] sm:$0xff]  }
 0x46c   : > { %9735 = vmatpush3.bf16.msra.mxu0 %v10768_v49  ;;  %9844 = vmatprep.subr.bf16.mxu1 %v10769_v27  ;;  %v10800_v49 = vld [vmem:[%s14051_s7 + $0x910] sm:$0xff]  }
 0x46d   : > { %9736 = vmatprep.subr.bf16.mxu0 %v10771_v24  ;;  %v10801_v27 = vld [vmem:[%s14051_s7 + $0xbd0] sm:$0xff]   ;;  %v10804_v24 = vld [vmem:[%s14051_s7 + $0x918] sm:$0xff]  }
 0x46f   : > { %9845 = vmatpush3.bf16.msra.mxu1 %v10770_v45  ;;  %v10805_v45 = vld [vmem:[%s14051_s7 + $0xbd8] sm:$0xff]  }
 0x470   : > { %9737 = vmatpush3.bf16.msra.mxu0 %v10772_v28  ;;  %9846 = vmatprep.subr.bf16.mxu1 %v10773_v1  ;;  %v10807_v28 = vld [vmem:[%s14051_s7 + $0x960] sm:$0xff]   ;;  %v10806_v1 = vld [vmem:[%s14051_s7 + $0xb98] sm:$0xff]  }
 0x471   : > { %9738 = vmatprep.subr.bf16.mxu0 %v10775_v0  ;;  %v10808_v0 = vld [vmem:[%s14051_s7 + $0x920] sm:$0xff]  }
 0x473   : > { %9847 = vmatpush3.bf16.msra.mxu1 %v10774_v8  ;;  %v10809_v8 = vld [vmem:[%s14051_s7 + $0xbe0] sm:$0xff]  }
 0x474   : > { %9739 = vmatpush3.bf16.msra.mxu0 %v10776_v32  ;;  %9848 = vmatprep.subr.bf16.mxu1 %v10777_v59  ;;  %v10811_v32 = vld [vmem:[%s14051_s7 + $0x968] sm:$0xff]   ;;  %v10810_v59 = vld [vmem:[%s14051_s7 + $0xba0] sm:$0xff]  }
 0x475   : > { %9740 = vmatprep.subr.bf16.mxu0 %v10779_v17  ;;  %v10812_v17 = vld [vmem:[%s14051_s7 + $0x928] sm:$0xff]  }
 0x476   : > { %v9438_v35 = vpop.f32.mrb[40].mxu0 }
 0x477   : > { %9849 = vmatpush3.bf16.msra.mxu1 %v10778_v25  ;;  %v9439_v50 = vpop.f32.mrb[41].mxu0  ;;  %v10813_v25 = vld [vmem:[%s14051_s7 + $0xbe8] sm:$0xff]  }
 0x478   : > { %v9440_v20 = vadd.f32 %v9439_v50, %v9438_v35  ;;  %v9441_v30 = vpop.f32.mrb[42].mxu0  ;;  %9741 = vmatpush3.bf16.msra.mxu0 %v10780_v34  ;;  %9850 = vmatprep.subr.bf16.mxu1 %v10781_v19  ;;  %v10815_v34 = vld [vmem:[%s14051_s7 + $0x970] sm:$0xff]   ;;  %v10814_v35 = vld [vmem:[%s14051_s7 + $0xba8] sm:$0xff]  }
 0x479   : > { %v9548_v16 = vpop.f32.mrb[16].mxu1  ;;  %v9442_v44 = vpop.f32.mrb[43].mxu0  ;;  %9742 = vmatprep.subr.bf16.mxu0 %v10783_v42  ;;  %v10817_v30 = vld [vmem:[%s14051_s7 + $0xbf0] sm:$0xff]  }
 0x47a   : > { %v7038_v9 = vadd.f32 %v9440_v20, %v13001_v56  ;;  %v9549_v53 = vpop.f32.mrb[17].mxu1  ;;  %v10789_v56 = vld [vmem:[%s14051_s7 + $0xaf8] sm:$0xff]   ;;  %v10816_v20 = vld [vmem:[%s14051_s7 + $0x930] sm:$0xff]  }
 0x47b   : > { %v13106_v57 = vadd.f32 %v9549_v53, %v9548_v16  ;;  %v9551_v14 = vpop.f32.mrb[18].mxu1  ;;  %9851 = vmatpush3.bf16.msra.mxu1 %v10782_v54  ;;  %v10819_v16 = vld [vmem:[%s14051_s7 + $0x978] sm:$0xff]  }
 0x47c   : > { %v9552_v33 = vpop.f32.mrb[19].mxu1  ;;  %9743 = vmatpush3.bf16.msra.mxu0 %v10784_v40  ;;  %9852 = vmatprep.subr.bf16.mxu1 %v10785_v38  ;;  %v13118_v18 = vadd.f32 %v12895_v21, %v7038_v9  ;;  %v10793_v21 = vld [vmem:[%s14051_s7 + $0xbc0] sm:$0xff]   ;;  %v10818_v14 = vld [vmem:[%s14051_s7 + $0xbb0] sm:$0xff]  }
 0x47d   : > { %9744 = vmatprep.subr.bf16.mxu0 %v10787_v51  ;;  %v10820_v33 = vld [vmem:[%s14051_s7 + $0x938] sm:$0xff]  }
 0x47f   : > { %9853 = vmatpush3.bf16.msra.mxu1 %v10786_v26 }
 0x480   : > { %9745 = vmatpush3.bf16.msra.mxu0 %v10788_v2  ;;  %9854 = vmatprep.subr.bf16.mxu1 %v10789_v56  ;;  %v10821_v2 = vld [vmem:[%s14051_s7 + $0xbf8] sm:$0xff]  }
 0x481   : > { %9774 = vmatprep.subr.bf16.mxu0 %v10791_v58  ;;  %v10822_v58 = vld [vmem:[%s14051_s7 + $0xbb8] sm:$0xff]  }
 0x483   : > { %9855 = vmatpush3.bf16.msra.mxu1 %v10790_v60  ;;  %7596 = vmatmul.mubr.bf16.vlgmr.msra.gmra.mrb[68].mxu0 %v12138_v36  ;;  %v10799_v36 = vld [vmem:[%s14051_s7 + $0x950] sm:$0xff]   ;;  %v10824_v60 = vld [vmem:[%s14051_s7 + $0xa00] sm:$0xff]  }
 0x484   : > { %9775 = vmatpush3.bf16.msra.mxu0 %v10792_v5  ;;  %7675 = vmatprep.mubr.bf16.mxu0 %v12165_v61  ;;  %v10798_v61 = vld [vmem:[%s14051_s7 + $0xb88] sm:$0xff]  }
 0x485   : > { %9884 = vmatprep.subr.bf16.mxu1 %v10793_v21  ;;  %9776 = vmatprep.subr.bf16.mxu0 %v10795_v39  ;;  %v10827_v5 = vld [vmem:[%s14051_s7 + $0xa48] sm:$0xff]   ;;  %v10826_v21 = vld [vmem:[%s14051_s7 + $0xc80] sm:$0xff]  }
 0x486   : > { %7796 = vmatmul.mubr.bf16.vlgmr.msra.gmra.mrb[44].mxu1 %v12168_v52  ;;  %v10803_v52 = vld [vmem:[%s14051_s7 + $0x958] sm:$0xff]   ;;  %v10828_v39 = vld [vmem:[%s14051_s7 + $0xa08] sm:$0xff]  }
 0x487   : > { %9885 = vmatpush3.bf16.msra.mxu1 %v10794_v47  ;;  %7875 = vmatprep.mubr.bf16.mxu1 %v12198_v23  ;;  %v10802_v23 = vld [vmem:[%s14051_s7 + $0xb90] sm:$0xff]   ;;  %v10829_v47 = vld [vmem:[%s14051_s7 + $0xcc8] sm:$0xff]  }
 0x488   : > { %9777 = vmatpush3.bf16.msra.mxu0 %v10796_v41  ;;  %9886 = vmatprep.subr.bf16.mxu1 %v10797_v29  ;;  %v10832_v41 = vld [vmem:[%s14051_s7 + $0xa10] sm:$0xff]  }
 0x489   : > { %9778 = vmatprep.subr.bf16.mxu0 %v10799_v36  ;;  %v10833_v29 = vld [vmem:[%s14051_s7 + $0xcd0] sm:$0xff]   ;;  %v10836_v36 = vld [vmem:[%s14051_s7 + $0xa18] sm:$0xff]  }
 0x48b   : > { %9887 = vmatpush3.bf16.msra.mxu1 %v10798_v61  ;;  %v10837_v61 = vld [vmem:[%s14051_s7 + $0xcd8] sm:$0xff]  }
 0x48c   : > { %9779 = vmatpush3.bf16.msra.mxu0 %v10800_v49  ;;  %9888 = vmatprep.subr.bf16.mxu1 %v10801_v27  ;;  %v10839_v49 = vld [vmem:[%s14051_s7 + $0xa60] sm:$0xff]   ;;  %v10838_v27 = vld [vmem:[%s14051_s7 + $0xc98] sm:$0xff]  }
 0x48d   : > { %9780 = vmatprep.subr.bf16.mxu0 %v10803_v52  ;;  %v10840_v52 = vld [vmem:[%s14051_s7 + $0xa20] sm:$0xff]  }
 0x48f   : > { %9889 = vmatpush3.bf16.msra.mxu1 %v10802_v23  ;;  %v10841_v23 = vld [vmem:[%s14051_s7 + $0xce0] sm:$0xff]  }
 0x490   : > { %9781 = vmatpush3.bf16.msra.mxu0 %v10804_v24  ;;  %9890 = vmatprep.subr.bf16.mxu1 %v10805_v45  ;;  %v10843_v24 = vld [vmem:[%s14051_s7 + $0xa68] sm:$0xff]   ;;  %v10842_v45 = vld [vmem:[%s14051_s7 + $0xca0] sm:$0xff]  }
 0x491   : > { %9782 = vmatprep.subr.bf16.mxu0 %v10807_v28  ;;  %v10844_v28 = vld [vmem:[%s14051_s7 + $0xa28] sm:$0xff]  }
 0x493   : > { %9891 = vmatpush3.bf16.msra.mxu1 %v10806_v1  ;;  %v10845_v1 = vld [vmem:[%s14051_s7 + $0xce8] sm:$0xff]  }
 0x494   : > { %9783 = vmatpush3.bf16.msra.mxu0 %v10808_v0  ;;  %9892 = vmatprep.subr.bf16.mxu1 %v10809_v8  ;;  %v10847_v0 = vld [vmem:[%s14051_s7 + $0xa70] sm:$0xff]  }
 0x495   : > { %9784 = vmatprep.subr.bf16.mxu0 %v10811_v32 }
 0x496   : > { %v9482_v19 = vpop.f32.mrb[44].mxu0 }
 0x497   : > { %9893 = vmatpush3.bf16.msra.mxu1 %v10810_v59  ;;  %v9483_v42 = vpop.f32.mrb[45].mxu0  ;;  %v10846_v59 = vld [vmem:[%s14051_s7 + $0xca8] sm:$0xff]  }
 0x498   : > { %v9484_v50 = vadd.f32 %v9483_v42, %v9482_v19  ;;  %v9485_v54 = vpop.f32.mrb[46].mxu0  ;;  %9785 = vmatpush3.bf16.msra.mxu0 %v10812_v17  ;;  %9894 = vmatprep.subr.bf16.mxu1 %v10813_v25  ;;  %v10849_v19 = vld [vmem:[%s14051_s7 + $0xcf0] sm:$0xff]  }
 0x499   : > { %v9592_v40 = vpop.f32.mrb[20].mxu1  ;;  %v9486_v38 = vpop.f32.mrb[47].mxu0  ;;  %9786 = vmatprep.subr.bf16.mxu0 %v10815_v34  ;;  %v10848_v34 = vld [vmem:[%s14051_s7 + $0xa30] sm:$0xff]  }
 0x49a   : > { %v7118_v44 = vadd.f32 %v9484_v50, %v13118_v18  ;;  %v9593_v51 = vpop.f32.mrb[21].mxu1  ;;  %v10823_v18 = vld [vmem:[%s14051_s7 + $0xa40] sm:$0xff]   ;;  %v10851_v50 = vld [vmem:[%s14051_s7 + $0xa78] sm:$0xff]   ;;  %v10850_v38 = vld [vmem:[%s14051_s7 + $0xcb0] sm:$0xff]  }
 0x49b   : > { %v13212_v9 = vadd.f32 %v9593_v51, %v9592_v40  ;;  %v9595_v53 = vpop.f32.mrb[22].mxu1  ;;  %9895 = vmatpush3.bf16.msra.mxu1 %v10814_v35  ;;  %v10853_v51 = vld [vmem:[%s14051_s7 + $0xcf8] sm:$0xff]  }
 0x49c   : > { %v9596_v26 = vpop.f32.mrb[23].mxu1  ;;  %9787 = vmatpush3.bf16.msra.mxu0 %v10816_v20  ;;  %9896 = vmatprep.subr.bf16.mxu1 %v10817_v30  ;;  %v13224_v56 = vadd.f32 %v13003_v55, %v7118_v44  ;;  %v10825_v55 = vld [vmem:[%s14051_s7 + $0xcc0] sm:$0xff]   ;;  %v10852_v44 = vld [vmem:[%s14051_s7 + $0xa38] sm:$0xff]  }
 0x49d   : > { %9788 = vmatprep.subr.bf16.mxu0 %v10819_v16  ;;  %v10854_v26 = vld [vmem:[%s14051_s7 + $0xcb8] sm:$0xff]  }
 0x49f   : > { %9897 = vmatpush3.bf16.msra.mxu1 %v10818_v14  ;;  %v10855_v14 = vld [vmem:[%s14051_s7 + $0xb40] sm:$0xff]  }
 0x4a0   : > { %9789 = vmatpush3.bf16.msra.mxu0 %v10820_v33  ;;  %9898 = vmatprep.subr.bf16.mxu1 %v10821_v2  ;;  %v10856_v33 = vld [vmem:[%s14051_s7 + $0xb00] sm:$0xff]   ;;  %v10859_v2 = vld [vmem:[%s14051_s7 + $0xb48] sm:$0xff]  }
 0x4a1   : > { %9818 = vmatprep.subr.bf16.mxu0 %v10823_v18  ;;  %v10860_v18 = vld [vmem:[%s14051_s7 + $0xb08] sm:$0xff]  }
 0x4a3   : > { %9899 = vmatpush3.bf16.msra.mxu1 %v10822_v58  ;;  %7676 = vmatmul.mubr.bf16.vlgmr.msra.gmra.mrb[72].mxu0 %v12162_v48  ;;  %v10831_v48 = vld [vmem:[%s14051_s7 + $0xa50] sm:$0xff]   ;;  %v10861_v58 = vld [vmem:[%s14051_s7 + $0xdc8] sm:$0xff]  }
 0x4a4   : > { %9819 = vmatpush3.bf16.msra.mxu0 %v10824_v60  ;;  %7755 = vmatprep.mubr.bf16.mxu0 %v12175_v6  ;;  %v10830_v6 = vld [vmem:[%s14051_s7 + $0xc88] sm:$0xff]  }
 0x4a5   : > { %9928 = vmatprep.subr.bf16.mxu1 %v10825_v55  ;;  %9820 = vmatprep.subr.bf16.mxu0 %v10827_v5  ;;  %v14079_v60 = vld [vmem:[#allocation7_spill] sm:$0xff]  ;;  %v14080_v55 = vld [vmem:[#allocation9_spill] sm:$0xff] }
 0x4a6   : > { %7876 = vmatmul.mubr.bf16.vlgmr.msra.gmra.mrb[48].mxu1 %v12184_v13  ;;  %v10835_v13 = vld [vmem:[%s14051_s7 + $0xa58] sm:$0xff]   ;;  %v10864_v5 = vld [vmem:[%s14051_s7 + $0xb10] sm:$0xff]  }
 0x4a7   : > { %9929 = vmatpush3.bf16.msra.mxu1 %v10826_v21  ;;  %7955 = vmatprep.mubr.bf16.mxu1 %v12187_v15  ;;  %v10834_v15 = vld [vmem:[%s14051_s7 + $0xc90] sm:$0xff]  }
 0x4a8   : > { %9821 = vmatpush3.bf16.msra.mxu0 %v10828_v39  ;;  %9930 = vmatprep.subr.bf16.mxu1 %v10829_v47  ;;  %v10865_v21 = vld [vmem:[%s14051_s7 + $0xdd0] sm:$0xff]   ;;  %v10867_v39 = vld [vmem:[%s14051_s7 + $0xb58] sm:$0xff]  }
 0x4a9   : > { %9822 = vmatprep.subr.bf16.mxu0 %v10831_v48  ;;  %v10866_v47 = vld [vmem:[%s14051_s7 + $0xd90] sm:$0xff]   ;;  %v10868_v48 = vld [vmem:[%s14051_s7 + $0xb18] sm:$0xff]  }
 0x4ab   : > { %9931 = vmatpush3.bf16.msra.mxu1 %v10830_v6  ;;  %v10869_v6 = vld [vmem:[%s14051_s7 + $0xdd8] sm:$0xff]  }
 0x4ac   : > { %9823 = vmatpush3.bf16.msra.mxu0 %v10832_v41  ;;  %9932 = vmatprep.subr.bf16.mxu1 %v10833_v29  ;;  %v10871_v41 = vld [vmem:[%s14051_s7 + $0xb60] sm:$0xff]   ;;  %v10870_v29 = vld [vmem:[%s14051_s7 + $0xd98] sm:$0xff]  }
 0x4ad   : > { %9824 = vmatprep.subr.bf16.mxu0 %v10835_v13  ;;  %v10872_v13 = vld [vmem:[%s14051_s7 + $0xb20] sm:$0xff]  }
 0x4af   : > { %9933 = vmatpush3.bf16.msra.mxu1 %v10834_v15  ;;  %v10873_v15 = vld [vmem:[%s14051_s7 + $0xde0] sm:$0xff]  }
 0x4b0   : > { %9825 = vmatpush3.bf16.msra.mxu0 %v10836_v36  ;;  %9934 = vmatprep.subr.bf16.mxu1 %v10837_v61  ;;  %v10875_v36 = vld [vmem:[%s14051_s7 + $0xb68] sm:$0xff]   ;;  %v10874_v61 = vld [vmem:[%s14051_s7 + $0xda0] sm:$0xff]  }
 0x4b1   : > { %9826 = vmatprep.subr.bf16.mxu0 %v10839_v49  ;;  %v10876_v49 = vld [vmem:[%s14051_s7 + $0xb28] sm:$0xff]  }
 0x4b3   : > { %9935 = vmatpush3.bf16.msra.mxu1 %v10838_v27  ;;  %v10877_v27 = vld [vmem:[%s14051_s7 + $0xde8] sm:$0xff]  }
 0x4b4   : > { %9827 = vmatpush3.bf16.msra.mxu0 %v10840_v52  ;;  %9936 = vmatprep.subr.bf16.mxu1 %v10841_v23  ;;  %v10879_v52 = vld [vmem:[%s14051_s7 + $0xb70] sm:$0xff]  }
 0x4b5   : > { %9828 = vmatprep.subr.bf16.mxu0 %v10843_v24 }
 0x4b6   : > { %v9526_v8 = vpop.f32.mrb[48].mxu0 }
 0x4b7   : > { %9937 = vmatpush3.bf16.msra.mxu1 %v10842_v45  ;;  %v9527_v32 = vpop.f32.mrb[49].mxu0  ;;  %v10878_v45 = vld [vmem:[%s14051_s7 + $0xda8] sm:$0xff]  }
 0x4b8   : > { %v9528_v17 = vadd.f32 %v9527_v32, %v9526_v8  ;;  %v9529_v25 = vpop.f32.mrb[50].mxu0  ;;  %9829 = vmatpush3.bf16.msra.mxu0 %v10844_v28  ;;  %9938 = vmatprep.subr.bf16.mxu1 %v10845_v1  ;;  %v10881_v8 = vld [vmem:[%s14051_s7 + $0xdf0] sm:$0xff]  }
 0x4b9   : > { %v9636_v42 = vpop.f32.mrb[24].mxu1  ;;  %v9530_v35 = vpop.f32.mrb[51].mxu0  ;;  %9830 = vmatprep.subr.bf16.mxu0 %v10847_v0  ;;  %v10880_v0 = vld [vmem:[%s14051_s7 + $0xb30] sm:$0xff]  }
 0x4ba   : > { %v7198_v54 = vadd.f32 %v9528_v17, %v13224_v56  ;;  %v9637_v20 = vpop.f32.mrb[25].mxu1  ;;  %v10858_v56 = vld [vmem:[%s14051_s7 + $0xd80] sm:$0xff]   ;;  %v10883_v17 = vld [vmem:[%s14051_s7 + $0xb78] sm:$0xff]   ;;  %v10882_v35 = vld [vmem:[%s14051_s7 + $0xdb0] sm:$0xff]  }
 0x4bb   : > { %v13318_v30 = vadd.f32 %v9637_v20, %v9636_v42  ;;  %v9639_v40 = vpop.f32.mrb[26].mxu1  ;;  %9939 = vmatpush3.bf16.msra.mxu1 %v10846_v59  ;;  %v10885_v20 = vld [vmem:[%s14051_s7 + $0xdf8] sm:$0xff]  }
 0x4bc   : > { %v9640_v16 = vpop.f32.mrb[27].mxu1  ;;  %9831 = vmatpush3.bf16.msra.mxu0 %v10848_v34  ;;  %9940 = vmatprep.subr.bf16.mxu1 %v10849_v19  ;;  %v13330_v53 = vadd.f32 %v13106_v57, %v7198_v54  ;;  %v10857_v57 = vld [vmem:[%s14051_s7 + $0xdc0] sm:$0xff]   ;;  %v10884_v54 = vld [vmem:[%s14051_s7 + $0xb38] sm:$0xff]  }
 0x4bd   : > { %9832 = vmatprep.subr.bf16.mxu0 %v10851_v50  ;;  %v10886_v16 = vld [vmem:[%s14051_s7 + $0xdb8] sm:$0xff]  }
 0x4bf   : > { %9941 = vmatpush3.bf16.msra.mxu1 %v10850_v38  ;;  %v10887_v38 = vld [vmem:[%s14051_s7 + $0xc40] sm:$0xff]  }
 0x4c0   : > { %9833 = vmatpush3.bf16.msra.mxu0 %v10852_v44  ;;  %9942 = vmatprep.subr.bf16.mxu1 %v10853_v51  ;;  %v10888_v44 = vld [vmem:[%s14051_s7 + $0xc00] sm:$0xff]   ;;  %v10891_v51 = vld [vmem:[%s14051_s7 + $0xc48] sm:$0xff]  }
 0x4c1   : > { %9862 = vmatprep.subr.bf16.mxu0 %v10855_v14  ;;  %v10890_v14 = vld [vmem:[%s14051_s7 + $0xe80] sm:$0xff]  }
 0x4c3   : > { %9943 = vmatpush3.bf16.msra.mxu1 %v10854_v26  ;;  %7756 = vmatmul.mubr.bf16.vlgmr.msra.gmra.mrb[76].mxu0 %v12201_v31  ;;  %v10863_v31 = vld [vmem:[%s14051_s7 + $0xb50] sm:$0xff]   ;;  %v14082_v26 = vld [vmem:[#allocation10_spill] sm:$0xff] }
 0x4c4   : > { %9863 = vmatpush3.bf16.msra.mxu0 %v10856_v33  ;;  %7835 = vmatprep.mubr.bf16.mxu0 %v12204_v37  ;;  %v10862_v37 = vld [vmem:[%s14051_s7 + $0xd88] sm:$0xff]  }
 0x4c5   : > { %9972 = vmatprep.subr.bf16.mxu1 %v10857_v57  ;;  %9864 = vmatprep.subr.bf16.mxu0 %v10859_v2  ;;  %v10892_v33 = vld [vmem:[%s14051_s7 + $0xc08] sm:$0xff]   ;;  %v10895_v2 = vld [vmem:[%s14051_s7 + $0xc50] sm:$0xff]  }
 0x4c6   : > { %7956 = vmatmul.mubr.bf16.vlgmr.msra.gmra.mrb[52].mxu1 %v14079_v60  ;;  %v10893_v57 = vld [vmem:[%s14051_s7 + $0xec8] sm:$0xff]   ;;  %v10899_v60 = vld [vmem:[%s14051_s7 + $0xc58] sm:$0xff]  }
 0x4c7   : > { %9973 = vmatpush3.bf16.msra.mxu1 %v10858_v56  ;;  %8035 = vmatprep.mubr.bf16.mxu1 %v14080_v55  ;;  %v14083_v56 = vld [vmem:[#allocation12_spill] sm:$0xff]  ;;  %v10900_v55 = vld [vmem:[%s14051_s7 + $0xc18] sm:$0xff]  }
 0x4c8   : > { %9865 = vmatpush3.bf16.msra.mxu0 %v10860_v18  ;;  %9974 = vmatprep.subr.bf16.mxu1 %v10861_v58  ;;  %v10894_v18 = vld [vmem:[%s14051_s7 + $0xe88] sm:$0xff]   ;;  %v10896_v58 = vld [vmem:[%s14051_s7 + $0xc10] sm:$0xff]  }
 0x4c9   : > { %9866 = vmatprep.subr.bf16.mxu0 %v10863_v31  ;;  %v10897_v31 = vld [vmem:[%s14051_s7 + $0xed0] sm:$0xff]  }
 0x4cb   : > { %9975 = vmatpush3.bf16.msra.mxu1 %v10862_v37  ;;  %v10901_v37 = vld [vmem:[%s14051_s7 + $0xed8] sm:$0xff]  }
 0x4cc   : > { %9867 = vmatpush3.bf16.msra.mxu0 %v10864_v5  ;;  %9976 = vmatprep.subr.bf16.mxu1 %v10865_v21  ;;  %v10903_v5 = vld [vmem:[%s14051_s7 + $0xc60] sm:$0xff]   ;;  %v10902_v21 = vld [vmem:[%s14051_s7 + $0xe98] sm:$0xff]  }
 0x4cd   : > { %9868 = vmatprep.subr.bf16.mxu0 %v10867_v39  ;;  %v10904_v39 = vld [vmem:[%s14051_s7 + $0xc20] sm:$0xff]  }
 0x4cf   : > { %9977 = vmatpush3.bf16.msra.mxu1 %v10866_v47  ;;  %v10905_v47 = vld [vmem:[%s14051_s7 + $0xee0] sm:$0xff]  }
 0x4d0   : > { %9869 = vmatpush3.bf16.msra.mxu0 %v10868_v48  ;;  %9978 = vmatprep.subr.bf16.mxu1 %v10869_v6  ;;  %v10907_v48 = vld [vmem:[%s14051_s7 + $0xc68] sm:$0xff]   ;;  %v10906_v6 = vld [vmem:[%s14051_s7 + $0xea0] sm:$0xff]  }
 0x4d1   : > { %9870 = vmatprep.subr.bf16.mxu0 %v10871_v41  ;;  %v10908_v41 = vld [vmem:[%s14051_s7 + $0xc28] sm:$0xff]  }
 0x4d3   : > { %9979 = vmatpush3.bf16.msra.mxu1 %v10870_v29  ;;  %v10909_v29 = vld [vmem:[%s14051_s7 + $0xee8] sm:$0xff]  }
 0x4d4   : > { %9871 = vmatpush3.bf16.msra.mxu0 %v10872_v13  ;;  %9980 = vmatprep.subr.bf16.mxu1 %v10873_v15  ;;  %v10911_v13 = vld [vmem:[%s14051_s7 + $0xc70] sm:$0xff]  }
 0x4d5   : > { %9872 = vmatprep.subr.bf16.mxu0 %v10875_v36 }
 0x4d6   : > { %v9570_v23 = vpop.f32.mrb[52].mxu0 }
 0x4d7   : > { %9981 = vmatpush3.bf16.msra.mxu1 %v10874_v61  ;;  %v9571_v24 = vpop.f32.mrb[53].mxu0  ;;  %v10910_v61 = vld [vmem:[%s14051_s7 + $0xea8] sm:$0xff]  }
 0x4d8   : > { %v9572_v28 = vadd.f32 %v9571_v24, %v9570_v23  ;;  %v9573_v1 = vpop.f32.mrb[54].mxu0  ;;  %9873 = vmatpush3.bf16.msra.mxu0 %v10876_v49  ;;  %9982 = vmatprep.subr.bf16.mxu1 %v10877_v27  ;;  %v10913_v23 = vld [vmem:[%s14051_s7 + $0xef0] sm:$0xff]  }
 0x4d9   : > { %v9680_v32 = vpop.f32.mrb[28].mxu1  ;;  %v9574_v59 = vpop.f32.mrb[55].mxu0  ;;  %9874 = vmatprep.subr.bf16.mxu0 %v10879_v52  ;;  %v10912_v52 = vld [vmem:[%s14051_s7 + $0xc30] sm:$0xff]  }
 0x4da   : > { %v7278_v25 = vadd.f32 %v9572_v28, %v13330_v53  ;;  %v9681_v34 = vpop.f32.mrb[29].mxu1  ;;  %v14081_v53 = vld [vmem:[#allocation8_spill] sm:$0xff]  ;;  %v10915_v28 = vld [vmem:[%s14051_s7 + $0xc78] sm:$0xff]  }
 0x4db   : > { %v13424_v19 = vadd.f32 %v9681_v34, %v9680_v32  ;;  %v9683_v42 = vpop.f32.mrb[30].mxu1  ;;  %9983 = vmatpush3.bf16.msra.mxu1 %v10878_v45  ;;  %v10914_v59 = vld [vmem:[%s14051_s7 + $0xeb0] sm:$0xff]   ;;  %v10917_v34 = vld [vmem:[%s14051_s7 + $0xef8] sm:$0xff]  }
 0x4dc   : > { %v9684_v50 = vpop.f32.mrb[31].mxu1  ;;  %9875 = vmatpush3.bf16.msra.mxu0 %v10880_v0  ;;  %9984 = vmatprep.subr.bf16.mxu1 %v10881_v8  ;;  %v13436_v40 = vadd.f32 %v13212_v9, %v7278_v25  ;;  %v10889_v9 = vld [vmem:[%s14051_s7 + $0xec0] sm:$0xff]   ;;  %v10916_v25 = vld [vmem:[%s14051_s7 + $0xc38] sm:$0xff]  }
 0x4dd   : > { %9876 = vmatprep.subr.bf16.mxu0 %v10883_v17  ;;  %v10918_v50 = vld [vmem:[%s14051_s7 + $0xeb8] sm:$0xff]  }
 0x4df   : > { %9985 = vmatpush3.bf16.msra.mxu1 %v10882_v35  ;;  %v10919_v35 = vld [vmem:[%s14051_s7 + $0xd40] sm:$0xff]  }
 0x4e0   : > { %9877 = vmatpush3.bf16.msra.mxu0 %v10884_v54  ;;  %9986 = vmatprep.subr.bf16.mxu1 %v10885_v20  ;;  %v10920_v54 = vld [vmem:[%s14051_s7 + $0xd00] sm:$0xff]   ;;  %v10923_v20 = vld [vmem:[%s14051_s7 + $0xd48] sm:$0xff]  }
 0x4e1   : > { %9906 = vmatprep.subr.bf16.mxu0 %v10887_v38  ;;  %v10922_v38 = vld [vmem:[%s14051_s7 + $0xf80] sm:$0xff]  }
 0x4e3   : > { %9987 = vmatpush3.bf16.msra.mxu1 %v10886_v16  ;;  %7836 = vmatmul.mubr.bf16.vlgmr.msra.gmra.mrb[80].mxu0 %v14081_v53  ;;  %v10924_v16 = vld [vmem:[%s14051_s7 + $0xd08] sm:$0xff]   ;;  %v10928_v53 = vld [vmem:[%s14051_s7 + $0xd10] sm:$0xff]  }
 0x4e4   : > { %9907 = vmatpush3.bf16.msra.mxu0 %v10888_v44  ;;  %7915 = vmatprep.mubr.bf16.mxu0 %v14082_v26  ;;  %v10925_v44 = vld [vmem:[%s14051_s7 + $0xfc8] sm:$0xff]   ;;  %v10931_v26 = vld [vmem:[%s14051_s7 + $0xd58] sm:$0xff]  }
 0x4e5   : > { %10016 = vmatprep.subr.bf16.mxu1 %v10889_v9  ;;  %9908 = vmatprep.subr.bf16.mxu0 %v10891_v51  ;;  %v10927_v9 = vld [vmem:[%s14051_s7 + $0xd50] sm:$0xff]  }
 0x4e6   : > { %8036 = vmatmul.mubr.bf16.vlgmr.msra.gmra.mrb[56].mxu1 %v14083_v56  ;;  %v14085_v51 = vld [vmem:[#allocation13_spill] sm:$0xff] }
 0x4e7   : > { %10017 = vmatpush3.bf16.msra.mxu1 %v10890_v14  ;;  %8115 = vmatprep.mubr.bf16.mxu1 %v12248_v7  ;;  %v10898_v7 = vld [vmem:[%s14051_s7 + $0xe90] sm:$0xff]   ;;  %v10934_v56 = vld [vmem:[%s14051_s7 + $0xf98] sm:$0xff]  }
 0x4e8   : > { %9909 = vmatpush3.bf16.msra.mxu0 %v10892_v33  ;;  %10018 = vmatprep.subr.bf16.mxu1 %v10893_v57  ;;  %v10929_v14 = vld [vmem:[%s14051_s7 + $0xfd0] sm:$0xff]   ;;  %v10932_v33 = vld [vmem:[%s14051_s7 + $0xd18] sm:$0xff]  }
 0x4e9   : > { %9910 = vmatprep.subr.bf16.mxu0 %v10895_v2  ;;  %v10933_v57 = vld [vmem:[%s14051_s7 + $0xfd8] sm:$0xff]   ;;  %v10935_v2 = vld [vmem:[%s14051_s7 + $0xd60] sm:$0xff]  }
 0x4eb   : > { %10019 = vmatpush3.bf16.msra.mxu1 %v10894_v18  ;;  %v10936_v18 = vld [vmem:[%s14051_s7 + $0xd20] sm:$0xff]  }
 0x4ec   : > { %9911 = vmatpush3.bf16.msra.mxu0 %v10896_v58  ;;  %10020 = vmatprep.subr.bf16.mxu1 %v10897_v31  ;;  %v10937_v58 = vld [vmem:[%s14051_s7 + $0xfe0] sm:$0xff]   ;;  %v10939_v31 = vld [vmem:[%s14051_s7 + $0xd68] sm:$0xff]  }
 0x4ed   : > { %9912 = vmatprep.subr.bf16.mxu0 %v10899_v60  ;;  %v10938_v60 = vld [vmem:[%s14051_s7 + $0xfa0] sm:$0xff]  }
 0x4ef   : > { %10021 = vmatpush3.bf16.msra.mxu1 %v10898_v7  ;;  %v10940_v7 = vld [vmem:[%s14051_s7 + $0xd28] sm:$0xff]  }
 0x4f0   : > { %9913 = vmatpush3.bf16.msra.mxu0 %v10900_v55  ;;  %10022 = vmatprep.subr.bf16.mxu1 %v10901_v37  ;;  %v10941_v55 = vld [vmem:[%s14051_s7 + $0xfe8] sm:$0xff]   ;;  %v10943_v37 = vld [vmem:[%s14051_s7 + $0xd70] sm:$0xff]  }
 0x4f1   : > { %9914 = vmatprep.subr.bf16.mxu0 %v10903_v5 }
 0x4f3   : > { %10023 = vmatpush3.bf16.msra.mxu1 %v10902_v21 }
 0x4f4   : > { %9915 = vmatpush3.bf16.msra.mxu0 %v10904_v39  ;;  %10024 = vmatprep.subr.bf16.mxu1 %v10905_v47  ;;  %v10942_v39 = vld [vmem:[%s14051_s7 + $0xfa8] sm:$0xff]  }
 0x4f5   : > { %9916 = vmatprep.subr.bf16.mxu0 %v10907_v48 }
 0x4f6   : > { %v9614_v15 = vpop.f32.mrb[56].mxu0 }
 0x4f7   : > { %10025 = vmatpush3.bf16.msra.mxu1 %v10906_v6  ;;  %v9615_v36 = vpop.f32.mrb[57].mxu0  ;;  %v10944_v6 = vld [vmem:[%s14051_s7 + $0xd30] sm:$0xff]  }
 0x4f8   : > { %v9616_v49 = vadd.f32 %v9615_v36, %v9614_v15  ;;  %v9617_v27 = vpop.f32.mrb[58].mxu0  ;;  %9917 = vmatpush3.bf16.msra.mxu0 %v10908_v41  ;;  %10026 = vmatprep.subr.bf16.mxu1 %v10909_v29  ;;  %v10945_v41 = vld [vmem:[%s14051_s7 + $0xff0] sm:$0xff]   ;;  %v10947_v15 = vld [vmem:[%s14051_s7 + $0xd78] sm:$0xff]  }
 0x4f9   : > { %v9724_v24 = vpop.f32.mrb[32].mxu1  ;;  %v9618_v45 = vpop.f32.mrb[59].mxu0  ;;  %9918 = vmatprep.subr.bf16.mxu0 %v10911_v13 }
 0x4fa   : > { %v7358_v1 = vadd.f32 %v9616_v49, %v13436_v40  ;;  %v9725_v0 = vpop.f32.mrb[33].mxu1  ;;  %v14084_v40 = vld [vmem:[#allocation11_spill] sm:$0xff]  ;;  %v10949_v45 = vld [vmem:[%s14051_s7 + $0xff8] sm:$0xff]  }
 0x4fb   : > { %v13530_v8 = vadd.f32 %v9725_v0, %v9724_v24  ;;  %v9727_v32 = vpop.f32.mrb[34].mxu1  ;;  %10027 = vmatpush3.bf16.msra.mxu1 %v10910_v61  ;;  %v10948_v24 = vld [vmem:[%s14051_s7 + $0xd38] sm:$0xff]  }
 0x4fc   : > { %v9728_v17 = vpop.f32.mrb[35].mxu1  ;;  %9919 = vmatpush3.bf16.msra.mxu0 %v10912_v52  ;;  %10028 = vmatprep.subr.bf16.mxu1 %v10913_v23  ;;  %v13542_v42 = vadd.f32 %v13318_v30, %v7358_v1  ;;  %v10921_v30 = vld [vmem:[%s14051_s7 + $0xfc0] sm:$0xff]   ;;  %v10946_v52 = vld [vmem:[%s14051_s7 + $0xfb0] sm:$0xff]   ;;  %v10950_v0 = vld [vmem:[%s14051_s7 + $0xfb8] sm:$0xff]  }
 0x4fd   : > { %9920 = vmatprep.subr.bf16.mxu0 %v10915_v28  ;;  %v10951_v1 = vld [vmem:[%s14051_s7 + $0xe40] sm:$0xff]  }
 0x4fe   : > { %v10952_v32 = vld [vmem:[%s14051_s7 + $0xe00] sm:$0xff]  }
 0x4ff   : > { %10029 = vmatpush3.bf16.msra.mxu1 %v10914_v59  ;;  %v10955_v59 = vld [vmem:[%s14051_s7 + $0xe48] sm:$0xff]   ;;  %v14086_v17 = vld [vmem:[#allocation14_spill] sm:$0xff] }
 0x500   : > { %9921 = vmatpush3.bf16.msra.mxu0 %v10916_v25  ;;  %10030 = vmatprep.subr.bf16.mxu1 %v10917_v34  ;;  %v10954_v25 = vld [vmem:[%s14051_s7 + $0x1080] sm:$0xff]  }
 0x501   : > { %9950 = vmatprep.subr.bf16.mxu0 %v10919_v35  ;;  %v14087_v34 = vld [vmem:[#allocation15_spill] sm:$0xff] }
 0x502   : > { %v10957_v35 = vld [vmem:[%s14051_s7 + $0x10c8] sm:$0xff]  }
 0x503   : > { %10031 = vmatpush3.bf16.msra.mxu1 %v10918_v50  ;;  %7916 = vmatmul.mubr.bf16.vlgmr.msra.gmra.mrb[84].mxu0 %v14084_v40  ;;  %v10959_v50 = vld [vmem:[%s14051_s7 + $0xe50] sm:$0xff]  }
 0x504   : > { %9951 = vmatpush3.bf16.msra.mxu0 %v10920_v54  ;;  %7995 = vmatprep.mubr.bf16.mxu0 %v12241_v12  ;;  %v10926_v12 = vld [vmem:[%s14051_s7 + $0xf88] sm:$0xff]   ;;  %v10960_v40 = vld [vmem:[%s14051_s7 + $0xe10] sm:$0xff]  }
 0x505   : > { %10060 = vmatprep.subr.bf16.mxu1 %v10921_v30  ;;  %9952 = vmatprep.subr.bf16.mxu0 %v10923_v20  ;;  %v14088_v54 = vld [vmem:[#allocation16_spill] sm:$0xff]  ;;  %v14089_v30 = vld [vmem:[#allocation18_spill] sm:$0xff] }
 0x506   : > { %8116 = vmatmul.mubr.bf16.vlgmr.msra.gmra.mrb[60].mxu1 %v14085_v51  ;;  %v10958_v20 = vld [vmem:[%s14051_s7 + $0x1088] sm:$0xff]   ;;  %v10965_v51 = vld [vmem:[%s14051_s7 + $0x10d8] sm:$0xff]  }
 0x507   : > { %10061 = vmatpush3.bf16.msra.mxu1 %v10922_v38  ;;  %8195 = vmatprep.mubr.bf16.mxu1 %v12261_v4  ;;  %v10930_v4 = vld [vmem:[%s14051_s7 + $0xf90] sm:$0xff]  }
 0x508   : > { %9953 = vmatpush3.bf16.msra.mxu0 %v10924_v16  ;;  %10062 = vmatprep.subr.bf16.mxu1 %v10925_v44  ;;  %v10961_v38 = vld [vmem:[%s14051_s7 + $0x10d0] sm:$0xff]   ;;  %v10963_v16 = vld [vmem:[%s14051_s7 + $0xe58] sm:$0xff]  }
 0x509   : > { %9954 = vmatprep.subr.bf16.mxu0 %v10927_v9  ;;  %v10962_v44 = vld [vmem:[%s14051_s7 + $0x1090] sm:$0xff]   ;;  %v10964_v9 = vld [vmem:[%s14051_s7 + $0xe18] sm:$0xff]  }
 0x50b   : > { %10063 = vmatpush3.bf16.msra.mxu1 %v10926_v12  ;;  %v10967_v12 = vld [vmem:[%s14051_s7 + $0xe60] sm:$0xff]  }
 0x50c   : > { %9955 = vmatpush3.bf16.msra.mxu0 %v10928_v53  ;;  %10064 = vmatprep.subr.bf16.mxu1 %v10929_v14  ;;  %v10966_v53 = vld [vmem:[%s14051_s7 + $0x1098] sm:$0xff]   ;;  %v10968_v14 = vld [vmem:[%s14051_s7 + $0xe20] sm:$0xff]  }
 0x50d   : > { %9956 = vmatprep.subr.bf16.mxu0 %v10931_v26  ;;  %v10969_v26 = vld [vmem:[%s14051_s7 + $0x10e0] sm:$0xff]  }
 0x50f   : > { %10065 = vmatpush3.bf16.msra.mxu1 %v10930_v4  ;;  %v10971_v4 = vld [vmem:[%s14051_s7 + $0xe68] sm:$0xff]  }
 0x510   : > { %9957 = vmatpush3.bf16.msra.mxu0 %v10932_v33  ;;  %10066 = vmatprep.subr.bf16.mxu1 %v10933_v57  ;;  %v10970_v33 = vld [vmem:[%s14051_s7 + $0x10a0] sm:$0xff]   ;;  %v10972_v57 = vld [vmem:[%s14051_s7 + $0xe28] sm:$0xff]  }
 0x511   : > { %9958 = vmatprep.subr.bf16.mxu0 %v10935_v2  ;;  %v10973_v2 = vld [vmem:[%s14051_s7 + $0x10e8] sm:$0xff]  }
 0x513   : > { %10067 = vmatpush3.bf16.msra.mxu1 %v10934_v56  ;;  %v10975_v56 = vld [vmem:[%s14051_s7 + $0xe70] sm:$0xff]  }
 0x514   : > { %9959 = vmatpush3.bf16.msra.mxu0 %v10936_v18  ;;  %10068 = vmatprep.subr.bf16.mxu1 %v10937_v58 }
 0x515   : > { %9960 = vmatprep.subr.bf16.mxu0 %v10939_v31  ;;  %v10974_v31 = vld [vmem:[%s14051_s7 + $0x10a8] sm:$0xff]  }
 0x516   : > { %v9658_v5 = vpop.f32.mrb[60].mxu0 }
 0x517   : > { %10069 = vmatpush3.bf16.msra.mxu1 %v10938_v60  ;;  %v9659_v21 = vpop.f32.mrb[61].mxu0 }
 0x518   : > { %v9660_v47 = vadd.f32 %v9659_v21, %v9658_v5  ;;  %v9661_v48 = vpop.f32.mrb[62].mxu0  ;;  %9961 = vmatpush3.bf16.msra.mxu0 %v10940_v7  ;;  %10070 = vmatprep.subr.bf16.mxu1 %v10941_v55  ;;  %v10976_v55 = vld [vmem:[%s14051_s7 + $0xe30] sm:$0xff]  }
 0x519   : > { %v9768_v29 = vpop.f32.mrb[36].mxu1  ;;  %v9662_v13 = vpop.f32.mrb[63].mxu0  ;;  %9962 = vmatprep.subr.bf16.mxu0 %v10943_v37  ;;  %v10977_v37 = vld [vmem:[%s14051_s7 + $0x10f0] sm:$0xff]  }
 0x51a   : > { %v7438_v36 = vadd.f32 %v9660_v47, %v13542_v42  ;;  %v9769_v61 = vpop.f32.mrb[37].mxu1  ;;  %v10956_v42 = vld [vmem:[%s14051_s7 + $0xe08] sm:$0xff]  }
 0x51b   : > { %v13636_v49 = vadd.f32 %v9769_v61, %v9768_v29  ;;  %v9771_v27 = vpop.f32.mrb[38].mxu1  ;;  %10071 = vmatpush3.bf16.msra.mxu1 %v10942_v39  ;;  %v10979_v39 = vld [vmem:[%s14051_s7 + $0xe78] sm:$0xff]   ;;  %v10978_v29 = vld [vmem:[%s14051_s7 + $0x10b0] sm:$0xff]  }
 0x51c   : > { %v9772_v23 = vpop.f32.mrb[39].mxu1  ;;  %9963 = vmatpush3.bf16.msra.mxu0 %v10944_v6  ;;  %10072 = vmatprep.subr.bf16.mxu1 %v10945_v41  ;;  %v13648_v28 = vadd.f32 %v13424_v19, %v7438_v36  ;;  %v10953_v19 = vld [vmem:[%s14051_s7 + $0x10c0] sm:$0xff]   ;;  %v10981_v36 = vld [vmem:[%s14051_s7 + $0x10f8] sm:$0xff]  }
 0x51d   : > { %9964 = vmatprep.subr.bf16.mxu0 %v10947_v15  ;;  %v10980_v15 = vld [vmem:[%s14051_s7 + $0xe38] sm:$0xff]   ;;  %v10983_v27 = vld [vmem:[%s14051_s7 + $0xf40] sm:$0xff]  }
 0x51e   : > { %v10984_v23 = vld [vmem:[%s14051_s7 + $0xf00] sm:$0xff]  }
 0x51f   : > { %10073 = vmatpush3.bf16.msra.mxu1 %v10946_v52  ;;  %v10982_v52 = vld [vmem:[%s14051_s7 + $0x10b8] sm:$0xff]  }
 0x520   : > { %9965 = vmatpush3.bf16.msra.mxu0 %v10948_v24  ;;  %10074 = vmatprep.subr.bf16.mxu1 %v10949_v45  ;;  %v10987_v24 = vld [vmem:[%s14051_s7 + $0xf48] sm:$0xff]   ;;  %v14090_v45 = vld [vmem:[#allocation17_spill] sm:$0xff] }
 0x521   : > { %9994 = vmatprep.subr.bf16.mxu0 %v10951_v1  ;;  %v10988_v1 = vld [vmem:[%s14051_s7 + $0xf08] sm:$0xff]  }
 0x523   : > { %10075 = vmatpush3.bf16.msra.mxu1 %v10950_v0  ;;  %7996 = vmatmul.mubr.bf16.vlgmr.msra.gmra.mrb[88].mxu0 %v14086_v17  ;;  %v10989_v0 = vld [vmem:[%s14051_s7 + $0x11c8] sm:$0xff]   ;;  %v10996_v17 = vld [vmem:[%s14051_s7 + $0xf18] sm:$0xff]  }
 0x524   : > { %9995 = vmatpush3.bf16.msra.mxu0 %v10952_v32  ;;  %8075 = vmatprep.mubr.bf16.mxu0 %v14087_v34  ;;  %v10991_v32 = vld [vmem:[%s14051_s7 + $0xf50] sm:$0xff]   ;;  %v10999_v34 = vld [vmem:[%s14051_s7 + $0xf60] sm:$0xff]  }
 0x525   : > { %10104 = vmatprep.subr.bf16.mxu1 %v10953_v19  ;;  %9996 = vmatprep.subr.bf16.mxu0 %v10955_v59  ;;  %v10992_v19 = vld [vmem:[%s14051_s7 + $0xf10] sm:$0xff]  }
 0x526   : > { %8196 = vmatmul.mubr.bf16.vlgmr.msra.gmra.mrb[64].mxu1 %v14088_v54  ;;  %v10993_v59 = vld [vmem:[%s14051_s7 + $0x11d0] sm:$0xff]   ;;  %v11003_v54 = vld [vmem:[%s14051_s7 + $0xf68] sm:$0xff]  }
 0x527   : > { %10105 = vmatpush3.bf16.msra.mxu1 %v10954_v25  ;;  %8275 = vmatprep.mubr.bf16.mxu1 %v14089_v30  ;;  %v10997_v25 = vld [vmem:[%s14051_s7 + $0x11d8] sm:$0xff]   ;;  %v11002_v30 = vld [vmem:[%s14051_s7 + $0x11a0] sm:$0xff]  }
 0x528   : > { %9997 = vmatpush3.bf16.msra.mxu0 %v10956_v42  ;;  %10106 = vmatprep.subr.bf16.mxu1 %v10957_v35  ;;  %v10998_v42 = vld [vmem:[%s14051_s7 + $0x1198] sm:$0xff]   ;;  %v11000_v35 = vld [vmem:[%s14051_s7 + $0xf20] sm:$0xff]  }
 0x529   : > { %9998 = vmatprep.subr.bf16.mxu0 %v10959_v50  ;;  %v11001_v50 = vld [vmem:[%s14051_s7 + $0x11e0] sm:$0xff]  }
 0x52b   : > { %10107 = vmatpush3.bf16.msra.mxu1 %v10958_v20  ;;  %v11004_v20 = vld [vmem:[%s14051_s7 + $0xf28] sm:$0xff]  }
 0x52c   : > { %9999 = vmatpush3.bf16.msra.mxu0 %v10960_v40  ;;  %10108 = vmatprep.subr.bf16.mxu1 %v10961_v38  ;;  %v11005_v40 = vld [vmem:[%s14051_s7 + $0x11e8] sm:$0xff]   ;;  %v11007_v38 = vld [vmem:[%s14051_s7 + $0xf70] sm:$0xff]  }
 0x52d   : > { %10000 = vmatprep.subr.bf16.mxu0 %v10963_v16 }
 0x52f   : > { %10109 = vmatpush3.bf16.msra.mxu1 %v10962_v44 }
 0x530   : > { %10001 = vmatpush3.bf16.msra.mxu0 %v10964_v9  ;;  %10110 = vmatprep.subr.bf16.mxu1 %v10965_v51  ;;  %v11006_v9 = vld [vmem:[%s14051_s7 + $0x11a8] sm:$0xff]  }
 0x531   : > { %10002 = vmatprep.subr.bf16.mxu0 %v10967_v12 }
 0x533   : > { %10111 = vmatpush3.bf16.msra.mxu1 %v10966_v53  ;;  %v11008_v53 = vld [vmem:[%s14051_s7 + $0xf30] sm:$0xff]  }
 0x534   : > { %10003 = vmatpush3.bf16.msra.mxu0 %v10968_v14  ;;  %10112 = vmatprep.subr.bf16.mxu1 %v10969_v26  ;;  %v11009_v14 = vld [vmem:[%s14051_s7 + $0x11f0] sm:$0xff]  }
 0x535   : > { %10004 = vmatprep.subr.bf16.mxu0 %v10971_v4 }
 0x536   : > { %v9702_v18 = vpop.f32.mrb[64].mxu0 }
 0x537   : > { %10113 = vmatpush3.bf16.msra.mxu1 %v10970_v33  ;;  %v9703_v58 = vpop.f32.mrb[65].mxu0  ;;  %v11011_v33 = vld [vmem:[%s14051_s7 + $0xf78] sm:$0xff]  }
 0x538   : > { %v9704_v60 = vadd.f32 %v9703_v58, %v9702_v18  ;;  %v9705_v7 = vpop.f32.mrb[66].mxu0  ;;  %10005 = vmatpush3.bf16.msra.mxu0 %v10972_v57  ;;  %10114 = vmatprep.subr.bf16.mxu1 %v10973_v2  ;;  %v11010_v58 = vld [vmem:[%s14051_s7 + $0x11b0] sm:$0xff]  }
 0x539   : > { %v9812_v5 = vpop.f32.mrb[40].mxu1  ;;  %v9706_v21 = vpop.f32.mrb[67].mxu0  ;;  %10006 = vmatprep.subr.bf16.mxu0 %v10975_v56  ;;  %v11013_v7 = vld [vmem:[%s14051_s7 + $0x11f8] sm:$0xff]  }
 0x53a   : > { %v7518_v47 = vadd.f32 %v9704_v60, %v13648_v28  ;;  %v9813_v48 = vpop.f32.mrb[41].mxu1  ;;  %v10986_v28 = vld [vmem:[%s14051_s7 + $0x1180] sm:$0xff]   ;;  %v11012_v60 = vld [vmem:[%s14051_s7 + $0xf38] sm:$0xff]  }
 0x53b   : > { %v13742_v6 = vadd.f32 %v9813_v48, %v9812_v5  ;;  %v9815_v41 = vpop.f32.mrb[42].mxu1  ;;  %10115 = vmatpush3.bf16.msra.mxu1 %v10974_v31  ;;  %v11014_v5 = vld [vmem:[%s14051_s7 + $0x11b8] sm:$0xff]   ;;  %v11016_v21 = vld [vmem:[%s14051_s7 + $0x1000] sm:$0xff]   ;;  %v11019_v48 = vld [vmem:[%s14051_s7 + $0x1050] sm:$0xff]  }
 0x53c   : > { %v9816_v13 = vpop.f32.mrb[43].mxu1  ;;  %10007 = vmatpush3.bf16.msra.mxu0 %v10976_v55  ;;  %10116 = vmatprep.subr.bf16.mxu1 %v10977_v37  ;;  %v13754_v61 = vadd.f32 %v13530_v8, %v7518_v47  ;;  %v10985_v8 = vld [vmem:[%s14051_s7 + $0x11c0] sm:$0xff]   ;;  %v11018_v47 = vld [vmem:[%s14051_s7 + $0x1008] sm:$0xff]   ;;  %v11020_v41 = vld [vmem:[%s14051_s7 + $0x1010] sm:$0xff]  }
 0x53d   : > { %10008 = vmatprep.subr.bf16.mxu0 %v10979_v39  ;;  %v11015_v37 = vld [vmem:[%s14051_s7 + $0x1040] sm:$0xff]  }
 0x53e   : > { %v14091_v39 = vld [vmem:[#allocation19_spill] sm:$0xff] }
 0x53f   : > { %10117 = vmatpush3.bf16.msra.mxu1 %v10978_v29  ;;  %v11022_v29 = vld [vmem:[%s14051_s7 + $0x1018] sm:$0xff]   ;;  %v11024_v13 = vld [vmem:[%s14051_s7 + $0x1020] sm:$0xff]  }
 0x540   : > { %10009 = vmatpush3.bf16.msra.mxu0 %v10980_v15  ;;  %10118 = vmatprep.subr.bf16.mxu1 %v10981_v36  ;;  %v11025_v15 = vld [vmem:[%s14051_s7 + $0x1068] sm:$0xff]  }
 0x541   : > { %10038 = vmatprep.subr.bf16.mxu0 %v10983_v27  ;;  %v11026_v36 = vld [vmem:[%s14051_s7 + $0x1028] sm:$0xff]  }
 0x543   : > { %10119 = vmatpush3.bf16.msra.mxu1 %v10982_v52  ;;  %8076 = vmatmul.mubr.bf16.vlgmr.msra.gmra.mrb[92].mxu0 %v14090_v45 }
 0x544   : > { %10039 = vmatpush3.bf16.msra.mxu0 %v10984_v23  ;;  %8155 = vmatprep.mubr.bf16.mxu0 %v12288_v10  ;;  %v10990_v10 = vld [vmem:[%s14051_s7 + $0x1188] sm:$0xff]  }
 0x545   : > { %10148 = vmatprep.subr.bf16.mxu1 %v10985_v8  ;;  %10040 = vmatprep.subr.bf16.mxu0 %v10987_v24  ;;  %v11028_v24 = vld [vmem:[%s14051_s7 + $0x1030] sm:$0xff]  }
 0x546   : > { %8276 = vmatmul.mubr.bf16.vlgmr.msra.gmra.mrb[68].mxu1 %v12291_v3  ;;  %v10995_v3 = vld [vmem:[%s14051_s7 + $0xf58] sm:$0xff]  }
 0x547   : > { %10149 = vmatpush3.bf16.msra.mxu1 %v10986_v28  ;;  %8355 = vmatprep.mubr.bf16.mxu1 %v12319_v63  ;;  %v10994_v63 = vld [vmem:[%s14051_s7 + $0x1190] sm:$0xff]  }
 0x548   : > { %10041 = vmatpush3.bf16.msra.mxu0 %v10988_v1  ;;  %10150 = vmatprep.subr.bf16.mxu1 %v10989_v0  ;;  %v11029_v1 = vld [vmem:[%s14051_s7 + $0x1078] sm:$0xff]  }
 0x549   : > { %10042 = vmatprep.subr.bf16.mxu0 %v10991_v32 }
 0x54b   : > { %10151 = vmatpush3.bf16.msra.mxu1 %v10990_v10 }
 0x54c   : > { %10043 = vmatpush3.bf16.msra.mxu0 %v10992_v19  ;;  %10152 = vmatprep.subr.bf16.mxu1 %v10993_v59 }
 0x54d   : > { %10044 = vmatprep.subr.bf16.mxu0 %v10995_v3  ;;  %v11030_v3 = vld [vmem:[%s14051_s7 + $0x1038] sm:$0xff]  }
 0x54f   : > { %10153 = vmatpush3.bf16.msra.mxu1 %v10994_v63 }
 0x550   : > { %10045 = vmatpush3.bf16.msra.mxu0 %v10996_v17  ;;  %10154 = vmatprep.subr.bf16.mxu1 %v10997_v25  ;;  %v11031_v17 = vld [vmem:[%s14051_s7 + $0x1140] sm:$0xff]  }
 0x551   : > { %10046 = vmatprep.subr.bf16.mxu0 %v10999_v34  ;;  %v11032_v25 = vld [vmem:[%s14051_s7 + $0x1100] sm:$0xff]   ;;  %v11033_v34 = vld [vmem:[%s14051_s7 + $0x1148] sm:$0xff]  }
 0x553   : > { %10155 = vmatpush3.bf16.msra.mxu1 %v10998_v42  ;;  %v11035_v42 = vld [vmem:[%s14051_s7 + $0x1150] sm:$0xff]  }
 0x554   : > { %10047 = vmatpush3.bf16.msra.mxu0 %v11000_v35  ;;  %10156 = vmatprep.subr.bf16.mxu1 %v11001_v50  ;;  %v11036_v35 = vld [vmem:[%s14051_s7 + $0x1110] sm:$0xff]   ;;  %v11039_v50 = vld [vmem:[%s14051_s7 + $0x1160] sm:$0xff]  }
 0x555   : > { %10048 = vmatprep.subr.bf16.mxu0 %v11003_v54  ;;  %v11040_v54 = vld [vmem:[%s14051_s7 + $0x1120] sm:$0xff]  }
 0x556   : > { %v9746_v16 = vpop.f32.mrb[68].mxu0 }
 0x557   : > { %10157 = vmatpush3.bf16.msra.mxu1 %v11002_v30  ;;  %v9747_v44 = vpop.f32.mrb[69].mxu0  ;;  %v11041_v30 = vld [vmem:[%s14051_s7 + $0x1168] sm:$0xff]  }
 0x558   : > { %v9748_v51 = vadd.f32 %v9747_v44, %v9746_v16  ;;  %v9749_v12 = vpop.f32.mrb[70].mxu0  ;;  %10049 = vmatpush3.bf16.msra.mxu0 %v11004_v20  ;;  %10158 = vmatprep.subr.bf16.mxu1 %v11005_v40  ;;  %v11042_v20 = vld [vmem:[%s14051_s7 + $0x1128] sm:$0xff]   ;;  %v11043_v40 = vld [vmem:[%s14051_s7 + $0x1170] sm:$0xff]  }
 0x559   : > { %v9856_v26 = vpop.f32.mrb[44].mxu1  ;;  %v9750_v4 = vpop.f32.mrb[71].mxu0  ;;  %10050 = vmatprep.subr.bf16.mxu0 %v11007_v38 }
 0x55a   : > { %v7598_v57 = vadd.f32 %v9748_v51, %v13754_v61  ;;  %v9857_v2 = vpop.f32.mrb[45].mxu1  ;;  %v11027_v61 = vld [vmem:[%s14051_s7 + $0x1070] sm:$0xff]  }
 0x55b   : > { %v13848_v56 = vadd.f32 %v9857_v2, %v9856_v26  ;;  %v9859_v18 = vpop.f32.mrb[46].mxu1  ;;  %10159 = vmatpush3.bf16.msra.mxu1 %v11006_v9  ;;  %v11044_v51 = vld [vmem:[%s14051_s7 + $0x1130] sm:$0xff]  }
 0x55c   : > { %v9860_v31 = vpop.f32.mrb[47].mxu1  ;;  %10051 = vmatpush3.bf16.msra.mxu0 %v11008_v53  ;;  %10160 = vmatprep.subr.bf16.mxu1 %v11009_v14  ;;  %v7638_v55 = vadd.f32 %v13636_v49, %v7598_v57  ;;  %v11017_v49 = vld [vmem:[%s14051_s7 + $0x1048] sm:$0xff]   ;;  %v11045_v14 = vld [vmem:[%s14051_s7 + $0x1178] sm:$0xff]  }
 0x55d   : > { %10052 = vmatprep.subr.bf16.mxu0 %v11011_v33  ;;  %v11046_v18 = vld [vmem:[%s14051_s7 + $0x1138] sm:$0xff]  }
 0x55f   : > { %10161 = vmatpush3.bf16.msra.mxu1 %v11010_v58 }
 0x560   : > { %10053 = vmatpush3.bf16.msra.mxu0 %v11012_v60  ;;  %10162 = vmatprep.subr.bf16.mxu1 %v11013_v7 }
 0x561   : > { %10082 = vmatprep.subr.bf16.mxu0 %v11015_v37 }
 0x563   : > { %10163 = vmatpush3.bf16.msra.mxu1 %v11014_v5  ;;  %8156 = vmatmul.mubr.bf16.vlgmr.msra.gmra.mrb[96].mxu0 %v14091_v39 }
 0x564   : > { %10083 = vmatpush3.bf16.msra.mxu0 %v11016_v21  ;;  %8235 = vmatprep.mubr.bf16.mxu0 %v12304_v43  ;;  %v11021_v43 = vld [vmem:[%s14051_s7 + $0x1058] sm:$0xff]  }
 0x565   : > { %10084 = vmatprep.subr.bf16.mxu0 %v11017_v49 }
 0x566   : > { %8356 = vmatmul.mubr.bf16.vlgmr.msra.gmra.mrb[72].mxu1 %v12307_v46  ;;  %v11023_v46 = vld [vmem:[%s14051_s7 + $0x1060] sm:$0xff]  }
 0x568   : > { %10085 = vmatpush3.bf16.msra.mxu0 %v11018_v47 }
 0x569   : > { %10086 = vmatprep.subr.bf16.mxu0 %v11019_v48 }
 0x56c   : > { %10087 = vmatpush3.bf16.msra.mxu0 %v11020_v41 }
 0x56d   : > { %10088 = vmatprep.subr.bf16.mxu0 %v11021_v43 }
 0x570   : > { %10089 = vmatpush3.bf16.msra.mxu0 %v11022_v29 }
 0x571   : > { %10090 = vmatprep.subr.bf16.mxu0 %v11023_v46 }
 0x574   : > { %10091 = vmatpush3.bf16.msra.mxu0 %v11024_v13 }
 0x575   : > { %10092 = vmatprep.subr.bf16.mxu0 %v11025_v15 }
 0x576   : > { %v9790_v27 = vpop.f32.mrb[72].mxu0 }
 0x577   : > { %v9791_v52 = vpop.f32.mrb[73].mxu0 }
 0x578   : > { %v9792_v23 = vadd.f32 %v9791_v52, %v9790_v27  ;;  %v9793_v8 = vpop.f32.mrb[74].mxu0  ;;  %10093 = vmatpush3.bf16.msra.mxu0 %v11026_v36 }
 0x579   : > { %v9900_v45 = vpop.f32.mrb[48].mxu1  ;;  %v9794_v28 = vpop.f32.mrb[75].mxu0  ;;  %10094 = vmatprep.subr.bf16.mxu0 %v11027_v61  ;;  %v11047_v61 = vld [vmem:[%s14053_s9] sm:$0xff]  }
 0x57a   : > { %v7678_v0 = vadd.f32 %v9792_v23, %v7638_v55  ;;  %v9901_v32 = vpop.f32.mrb[49].mxu1  ;;  %v11123_v23 = vmov 0.0   ;;  %v11049_v28 = vld [vmem:[%s14053_s9 + $0x10] sm:$0xff]  }
 0x57b   : > { %v13911_v10 = vadd.f32 %v9901_v32, %v9900_v45  ;;  %v9903_v19 = vpop.f32.mrb[50].mxu1  ;;  %v11048_v45 = vld [vmem:[%s14053_s9 + $0x8] sm:$0xff]  }
 0x57c   : > { %v9904_v59 = vpop.f32.mrb[51].mxu1  ;;  %10095 = vmatpush3.bf16.msra.mxu0 %v11028_v24  ;;  %v7718_v63 = vadd.f32 %v13742_v6, %v7678_v0  ;;  %v11034_v6 = vld [vmem:[%s14051_s7 + $0x1108] sm:$0xff]   ;;  %v11051_v0 = vld [vmem:[%s14053_s9 + $0x20] sm:$0xff]  }
 0x57d   : > { %10096 = vmatprep.subr.bf16.mxu0 %v11029_v1  ;;  %v11050_v1 = vld [vmem:[%s14053_s9 + $0x18] sm:$0xff]  }
 0x580   : > { %10097 = vmatpush3.bf16.msra.mxu0 %v11030_v3 }
 0x581   : > { %10126 = vmatprep.subr.bf16.mxu0 %v11031_v17 }
 0x583   : > { %8236 = vmatmul.mubr.bf16.vlgmr.msra.gmra.mrb[100].mxu0 %v12310_v22  ;;  %v11037_v22 = vld [vmem:[%s14051_s7 + $0x1158] sm:$0xff]  }
 0x584   : > { %10127 = vmatpush3.bf16.msra.mxu0 %v11032_v25  ;;  %8315 = vmatprep.mubr.bf16.mxu0 %v12322_v62  ;;  %v11038_v62 = vld [vmem:[%s14051_s7 + $0x1118] sm:$0xff]  }
 0x585   : > { %10128 = vmatprep.subr.bf16.mxu0 %v11033_v34 }
 0x588   : > { %10129 = vmatpush3.bf16.msra.mxu0 %v11034_v6 }
 0x589   : > { %10130 = vmatprep.subr.bf16.mxu0 %v11035_v42 }
 0x58c   : > { %10131 = vmatpush3.bf16.msra.mxu0 %v11036_v35 }
 0x58d   : > { %10132 = vmatprep.subr.bf16.mxu0 %v11037_v22  ;;  %v11052_v22 = vld [vmem:[%s14053_s9 + $0x28] sm:$0xff]  }
 0x590   : > { %10133 = vmatpush3.bf16.msra.mxu0 %v11038_v62  ;;  %v11053_v62 = vld [vmem:[%s14053_s9 + $0x30] sm:$0xff]  }
 0x591   : > { %10134 = vmatprep.subr.bf16.mxu0 %v11039_v50  ;;  %v11054_v50 = vld [vmem:[%s14053_s9 + $0x38] sm:$0xff]  }
 0x594   : > { %10135 = vmatpush3.bf16.msra.mxu0 %v11040_v54 }
 0x595   : > { %10136 = vmatprep.subr.bf16.mxu0 %v11041_v30 }
 0x596   : > { %v9834_v38 = vpop.f32.mrb[76].mxu0 }
 0x597   : > { %v9835_v16 = vpop.f32.mrb[77].mxu0 }
 0x598   : > { %v9836_v44 = vadd.f32 %v9835_v16, %v9834_v38  ;;  %v9837_v9 = vpop.f32.mrb[78].mxu0  ;;  %10137 = vmatpush3.bf16.msra.mxu0 %v11042_v20 }
 0x599   : > { %v9944_v12 = vpop.f32.mrb[52].mxu1  ;;  %v9838_v53 = vpop.f32.mrb[79].mxu0  ;;  %10138 = vmatprep.subr.bf16.mxu0 %v11043_v40 }
 0x59a   : > { %v7758_v26 = vadd.f32 %v9836_v44, %v7718_v63  ;;  %v9945_v4 = vpop.f32.mrb[53].mxu1 }
 0x59b   : > { %v9946_v33 = vadd.f32 %v9945_v4, %v9944_v12  ;;  %v9947_v57 = vpop.f32.mrb[54].mxu1 }
 0x59c   : > { %v9948_v2 = vpop.f32.mrb[55].mxu1  ;;  %10139 = vmatpush3.bf16.msra.mxu0 %v11044_v51  ;;  %v7798_v58 = vadd.f32 %v13848_v56, %v7758_v26 }
 0x59d   : > { %10140 = vmatprep.subr.bf16.mxu0 %v11045_v14 }
 0x5a0   : > { %10141 = vmatpush3.bf16.msra.mxu0 %v11046_v18 }
 0x5a1   : > { %10179 = vmatprep.subr.bf16.mxu0 %v11123_v23 }
 0x5a3   : > { %8316 = vmatmul.mubr.bf16.vlgmr.msra.gmra.mrb[104].mxu0 %v12294_v11 }
 0x5a4   : > { %10180 = vmatpush3.bf16.msra.mxu0 %v11047_v61  ;;  %10195 = vmatprep.mubr.msk.bf16.mxu0 %vm11124_vm11, %v11123_v23 }
 0x5a5   : > { %10181 = vmatprep.subr.bf16.mxu0 %v11123_v23 }
 0x5a8   : > { %10182 = vmatpush3.bf16.msra.mxu0 %v11048_v45 }
 0x5a9   : > { %10183 = vmatprep.subr.bf16.mxu0 %v11123_v23 }
 0x5ac   : > { %10184 = vmatpush3.bf16.msra.mxu0 %v11049_v28 }
 0x5ad   : > { %10185 = vmatprep.subr.bf16.mxu0 %v11123_v23 }
 0x5b0   : > { %10186 = vmatpush3.bf16.msra.mxu0 %v11050_v1 }
 0x5b1   : > { %10187 = vmatprep.subr.bf16.mxu0 %v11123_v23 }
 0x5b4   : > { %10188 = vmatpush3.bf16.msra.mxu0 %v11051_v0 }
 0x5b5   : > { %10189 = vmatprep.subr.bf16.mxu0 %v11123_v23 }
 0x5b6   : > { %v9878_v31 = vpop.f32.mrb[80].mxu0 }
 0x5b7   : > { %v9879_v60 = vpop.f32.mrb[81].mxu0 }
 0x5b8   : > { %v9880_v7 = vadd.f32 %v9879_v60, %v9878_v31  ;;  %v9881_v55 = vpop.f32.mrb[82].mxu0  ;;  %10190 = vmatpush3.bf16.msra.mxu0 %v11052_v22 }
 0x5b9   : > { %v9988_v37 = vpop.f32.mrb[56].mxu1  ;;  %v9882_v5 = vpop.f32.mrb[83].mxu0  ;;  %10191 = vmatprep.subr.bf16.mxu0 %v11123_v23 }
 0x5ba   : > { %v7838_v21 = vadd.f32 %v9880_v7, %v7798_v58  ;;  %v9989_v49 = vpop.f32.mrb[57].mxu1 }
 0x5bb   : > { %v9990_v39 = vadd.f32 %v9989_v49, %v9988_v37  ;;  %v9991_v47 = vpop.f32.mrb[58].mxu1 }
 0x5bc   : > { %v9992_v48 = vpop.f32.mrb[59].mxu1  ;;  %v7878_v41 = vadd.f32 %v13911_v10, %v7838_v21  ;;  %10192 = vmatpush3.bf16.msra.mxu0 %v11053_v62 }
 0x5bd   : > { %10193 = vmatprep.subr.bf16.mxu0 %v11123_v23 }
 0x5c0   : > { %10194 = vmatpush3.bf16.msra.mxu0 %v11054_v50 }
 0x5d6   : > { %v9922_v43 = vpop.f32.mrb[84].mxu0 }
 0x5d7   : > { %v9923_v29 = vpop.f32.mrb[85].mxu0 }
 0x5d8   : > { %v9924_v56 = vadd.f32 %v9923_v29, %v9922_v43  ;;  %v9925_v46 = vpop.f32.mrb[86].mxu0 }
 0x5d9   : > { %v10032_v13 = vpop.f32.mrb[60].mxu1  ;;  %v9926_v15 = vpop.f32.mrb[87].mxu0 }
 0x5da   : > { %v7918_v11 = vadd.f32 %v9924_v56, %v7878_v41  ;;  %v10033_v36 = vpop.f32.mrb[61].mxu1 }
 0x5db   : > { %v10034_v27 = vadd.f32 %v10033_v36, %v10032_v13  ;;  %v10035_v52 = vpop.f32.mrb[62].mxu1 }
 0x5dc   : > { %v10036_v8 = vpop.f32.mrb[63].mxu1  ;;  %v7958_v24 = vadd.f32 %v9946_v33, %v7918_v11 }
 0x5f6   : > { %v9966_v32 = vpop.f32.mrb[88].mxu0 }
 0x5f7   : > { %v9967_v10 = vpop.f32.mrb[89].mxu0 }
 0x5f8   : > { %v9968_v19 = vadd.f32 %v9967_v10, %v9966_v32  ;;  %v9969_v59 = vpop.f32.mrb[90].mxu0 }
 0x5f9   : > { %v10076_v3 = vpop.f32.mrb[64].mxu1  ;;  %v9970_v63 = vpop.f32.mrb[91].mxu0 }
 0x5fa   : > { %v7998_v17 = vadd.f32 %v9968_v19, %v7958_v24  ;;  %v10077_v25 = vpop.f32.mrb[65].mxu1 }
 0x5fb   : > { %v10078_v34 = vadd.f32 %v10077_v25, %v10076_v3  ;;  %v10079_v6 = vpop.f32.mrb[66].mxu1 }
 0x5fc   : > { %v10080_v42 = vpop.f32.mrb[67].mxu1  ;;  %v8038_v35 = vadd.f32 %v9990_v39, %v7998_v17 }
 0x616   : > { %v10010_v54 = vpop.f32.mrb[92].mxu0 }
 0x617   : > { %v10011_v30 = vpop.f32.mrb[93].mxu0 }
 0x618   : > { %v10012_v20 = vadd.f32 %v10011_v30, %v10010_v54  ;;  %v10013_v40 = vpop.f32.mrb[94].mxu0 }
 0x619   : > { %v10120_v38 = vpop.f32.mrb[68].mxu1  ;;  %v10014_v16 = vpop.f32.mrb[95].mxu0 }
 0x61a   : > { %v8078_v44 = vadd.f32 %v10012_v20, %v8038_v35  ;;  %v10121_v9 = vpop.f32.mrb[69].mxu1 }
 0x61b   : > { %v10122_v51 = vadd.f32 %v10121_v9, %v10120_v38  ;;  %v10123_v12 = vpop.f32.mrb[70].mxu1 }
 0x61c   : > { %v10124_v53 = vpop.f32.mrb[71].mxu1  ;;  %v8118_v14 = vadd.f32 %v10034_v27, %v8078_v44  ;;  %v8381_v27 = vld [vmem:[%s14054_s10] sm:$0x1] }
 0x636   : > { %v10054_v26 = vpop.f32.mrb[96].mxu0 }
 0x637   : > { %v10055_v4 = vpop.f32.mrb[97].mxu0 }
 0x638   : > { %v10056_v33 = vadd.f32 %v10055_v4, %v10054_v26  ;;  %v10057_v57 = vpop.f32.mrb[98].mxu0 }
 0x639   : > { %v10164_v2 = vpop.f32.mrb[72].mxu1  ;;  %v10058_v18 = vpop.f32.mrb[99].mxu0 }
 0x63a   : > { %v8158_v58 = vadd.f32 %v10056_v33, %v8118_v14  ;;  %v10165_v31 = vpop.f32.mrb[73].mxu1 }
 0x63b   : > { %v10166_v60 = vadd.f32 %v10165_v31, %v10164_v2  ;;  %v10167_v7 = vpop.f32.mrb[74].mxu1 }
 0x63c   : > { %v10168_v55 = vpop.f32.mrb[75].mxu1  ;;  %v8198_v37 = vadd.f32 %v10078_v34, %v8158_v58 }
 0x656   : > { %v10098_v5 = vpop.f32.mrb[100].mxu0 }
 0x657   : > { %v10099_v21 = vpop.f32.mrb[101].mxu0 }
 0x658   : > { %v10100_v49 = vadd.f32 %v10099_v21, %v10098_v5  ;;  %v10101_v39 = vpop.f32.mrb[102].mxu0 }
 0x659   : > { %v10102_v47 = vpop.f32.mrb[103].mxu0 }
 0x65a   : > { %v8238_v48 = vadd.f32 %v10100_v49, %v8198_v37 }
 0x65c   : > { %v8278_v41 = vadd.f32 %v10122_v51, %v8238_v48 }
 0x676   : > { %v10142_v43 = vpop.f32.mrb[104].mxu0 }
 0x677   : > { %v10143_v29 = vpop.f32.mrb[105].mxu0 }
 0x678   : > { %v10144_v56 = vadd.f32 %v10143_v29, %v10142_v43  ;;  %v10145_v46 = vpop.f32.mrb[106].mxu0 }
 0x679   : > { %v10146_v13 = vpop.f32.mrb[107].mxu0 }
 0x67a   : > { %v8318_v15 = vadd.f32 %v10144_v56, %v8278_v41 }
 0x67c   : > { %v8358_v11 = vadd.f32 %v10166_v60, %v8318_v15 }
 0x67e   : > { %v8363_v36 = vmax.f32 %v8358_v11, 0.0 }
 0x680   : > { %v8364_v61 = vpack.c.bf16 %v8363_v36, %v8363_v36 }
 0x682   : > { %10196 = vmatmul.mubr.bf16.vlgmr.msra.gmra.mrb[108].mxu0 %v8364_v61 }
 0x755   : > { %v8464_v52 = vpop.f32.mrb[108].mxu0 }
 0x756   : > { %v8465_v23 = vadd.f32 %v8464_v52, %v8381_v27  ;;  %v10197_v8 = vpop.f32.mrb[109].mxu0 }
 0x757   : > { %v8467_v24 = vpop.f32.mrb[110].mxu0 }
 0x758   : > { %8470 = vst [vmem:[%s378_s13] sm:$0x1] %v8465_v23  ;;  %v10198_v45 = vpop.f32.mrb[111].mxu0 }
 0x759   : > { %11068 = shalt.err (!%p11065_p3)
}
 0x75a   : > { %s11069_s29 = scalar_lea.hbm %s14002_s15, 16  ;;  %s11073_s13 = scalar_lea.hbm %s14055_s11, 32 }
 0x75b   : > { %p11070_p4 = scmp.ne.s32.totalorder %s14002_s15, %s11069_s29  ;;  %p11074_p9 = scmp.lt.u32.totalorder %s14002_s15, %s14055_s11 }
 0x75c   : > { %p11075_p10 = scmp.lt.u32.totalorder %s11073_s13, %s11069_s29  ;;  %p11077_p12 = scmp.lt.u32.totalorder %s11069_s29, %s14002_s15 }
 0x75d   : > { %p11071_p7 = pnand %p11070_p4, %p11224_p5 }
 0x75e   : > { %p11076_p11 = por %p11075_p10, %p11074_p9 }
 0x75f   : > { %p11072_p8 = pneg %p11071_p7 }
 0x760   : > { %p11078_p13 = por %p11077_p12, %p11076_p11 }
 0x762   : > { %p11079_p0 = pnand %p11078_p13, %p11072_p8 }
 0x764   : > { %11082 = shalt.err (!%p11079_p0)
}
 0x765   : > { %10215 = dma.vmem_to_hbm [thread:$0]  (%p11224_p5), %s14004_s14, 16, %s14002_s15, %s8472_s16  }
 0x766 PF: > { %p10221_p1 = scmp.ge.s32.totalorder %s11117_s20, 2  ;;  %s8496_s21 = sand.u32 1, %s11105_s17  }
 0x767   : > { %s8497_s22 = scalar_lea.sflag [#allocation3], %s8496_s21 }
 0x768   : > { %p10218_p2 = pnand %p10221_p1, %p11228_p6 }
 0x76a   : > { %11100 = dma.done.wait (!%p10218_p2), %s8497_s22, 16  }
 0x76b   : > { %11102 = vsyncadd (!%p10218_p2), %s8497_s22, 4294967280  ;;  %s14092_s24 = sld [smem:[#allocation5_spill]]  ;;  %s14093_s19 = sld [smem:[#allocation6_spill]] }
 0x76c   : > { %p21_p3 = scmp.ge.s32.totalorder %s11211_s23, 4   ;;  %s14094_s17 = smov %s11109_s18 }
 0x76d   : > { %s14096_s20 = smov %s11211_s23 }
 0x76e   :  { %23 = sbr.rel (!%p21_p3) target bundleno = 3 (0x3), region = 99 }
 0x771   : > { %s14095_s18 = smov %s14092_s24 }
 0x775   :  { %8501 = vsyncpa [#allocation3], 1 }
 0x776   :  { %8503 = vsyncpa [#allocation3 + $0x1], 1 }

</bundles_post_ra>
